<compile_context>
chip_gen: v7x
topology: tpu7x:2x2x1
jax: 0.10.0
libtpu: 0.0.40
codegen_flags: <defaults>
</compile_context>

<pallas_src>
import jax
import jax.numpy as jnp
from jax.experimental import pallas as pl
from jax.experimental.pallas import tpu as pltpu

GAMMA = 10.0
LATENT_DIM = 10
DISC_HIDDEN = 256   # reference Factor-VAE discriminator uses 1000; pad to 1024 if restored
NEG_SLOPE = 0.2     # LeakyReLU slope of the reference Discriminator


def _round_up(x, m):
    return ((x + m - 1) // m) * m


def _pick_tile(full, candidates):
    """Largest candidate that divides `full`; fall back to the full extent."""
    for c in candidates:
        if c <= full and full % c == 0:
            return c
    return full


# ----------------------------------------------------------------------------
# Fused kernel: reparameterize + Discriminator MLP + all Factor-VAE loss terms.
# grid = (batch tiles [parallel], feature tiles [arbitrary / reduction, innermost])
# Output: one lane-dense (1, 1, 128) row per batch tile; lanes 0/1/2 hold the
# rec / kl / tc partial sums.  The trivial scalar combine (sum, /half, *gamma)
# happens in the wrapper.
# ----------------------------------------------------------------------------
def _factor_loss_kernel(data_ref, recon_ref, mu_ref, lv_ref, eps_ref,
                        w_in_ref, w_hid_ref, b_all_ref, w_out_ref, b_out_ref,
                        out_ref, rec_acc_ref):
    j = pl.program_id(1)            # feature-tile index (reduction axis)
    nj = pl.num_programs(1)

    @pl.when(j == 0)
    def _init():
        rec_acc_ref[...] = jnp.zeros_like(rec_acc_ref)

    # Sum-MSE partial for this feature tile: VALU tree + sublane fold only; the
    # cross-lane reduce is deferred to the finalize step below.
    diff = recon_ref[...] - data_ref[...]
    rec_acc_ref[...] += jnp.sum(diff * diff, axis=0, keepdims=True)

    @pl.when(j == nj - 1)
    def _finalize():
        rec = jnp.sum(rec_acc_ref[...])            # single cross-lane reduce

        mu = mu_ref[...]                            # (bm, L) f32
        lv = lv_ref[...]
        eps = eps_ref[...]

        # KL(N(mu, sigma) || N(0, 1)), summed over latent dim and batch-tile rows.
        kl = -0.5 * jnp.sum(1.0 + lv - mu * mu - jnp.exp(lv))

        # Reparameterization trick (model.reparameterize).
        z = mu + jnp.exp(0.5 * lv) * eps

        # Discriminator MLP: bf16 operands on the MXU, f32 accumulation.
        # Bias add + LeakyReLU stay in f32 (v5e VPU has no bf16).
        h = jnp.dot(z.astype(jnp.bfloat16), w_in_ref[...],
                    preferred_element_type=jnp.float32) + b_all_ref[0]
        h = jnp.maximum(h, NEG_SLOPE * h)                       # LeakyReLU(0.2)
        for layer in range(4):
            h = jnp.dot(h.astype(jnp.bfloat16), w_hid_ref[layer],
                        preferred_element_type=jnp.float32) + b_all_ref[layer + 1]
            h = jnp.maximum(h, NEG_SLOPE * h)
        logits = jnp.dot(h.astype(jnp.bfloat16), w_out_ref[...],
                         preferred_element_type=jnp.float32) + b_out_ref[...]

        # TC numerator: sum_b (d_z[:, 0] - d_z[:, 1]) over this batch tile.
        tc = jnp.sum(logits[:, 0:1] - logits[:, 1:2])

        # Lane-dense output row (unmasked 128-lane store): lanes 0/1/2 = rec/kl/tc.
        lane = jax.lax.broadcasted_iota(jnp.int32, out_ref.shape, 2)
        out_ref[...] = jnp.where(lane == 0, rec,
                       jnp.where(lane == 1, kl,
                       jnp.where(lane == 2, tc, 0.0))).astype(jnp.float32)


def factor_vae_loss_fused(data1, recon, mu, logvar, eps_latent, disc_packed, gamma):
    """rec + kl + gamma * tc (anneal_reg = 1), eval-path Factor-VAE loss."""
    half, d = data1.shape
    latent = mu.shape[1]
    w_in, w_hid, b_all, w_out, b_out = disc_packed
    hidden = w_in.shape[1]

    # 128 rows fills the MXU height and (for half >= 256) keeps >= 2 batch tiles for
    # v7x's 2 TensorCores on the "parallel" grid axis.
    bm = _pick_tile(half, (128, 64, 32, 16, 8))
    num_bt = half // bm

    # Feature dim padded with zeros to a multiple of 128 (MSE-invariant), then the
    # largest dividing tile up to 2048 is used: large tiles amortize the ~0.35 us per
    # grid-step pipeline overhead.  2 inputs x 2 buffers x (128 x 2048 x 4B) = 4 MiB,
    # comfortably under the 32 MiB scoped-VMEM budget that is safe even on v7x.
    d_pad = _round_up(d, 128)
    if d_pad != d:
        pad = ((0, 0), (0, d_pad - d))
        data1 = jnp.pad(data1, pad)
        recon = jnp.pad(recon, pad)
    bd = _pick_tile(d_pad, (2048, 1024, 512, 256, 128))
    num_ft = d_pad // bd

    grid_spec = pltpu.PrefetchScalarGridSpec(
        num_scalar_prefetch=0,
        grid=(num_bt, num_ft),
        in_specs=[
            pl.BlockSpec((bm, bd), lambda i, j: (i, j)),                  # data1
            pl.BlockSpec((bm, bd), lambda i, j: (i, j)),                  # recon
            pl.BlockSpec((bm, latent), lambda i, j: (i, 0)),              # mu
            pl.BlockSpec((bm, latent), lambda i, j: (i, 0)),              # logvar
            pl.BlockSpec((bm, latent), lambda i, j: (i, 0)),              # eps
            pl.BlockSpec((latent, hidden), lambda i, j: (0, 0)),          # w_in (resident)
            pl.BlockSpec((4, hidden, hidden), lambda i, j: (0, 0, 0)),    # w2..w5 (resident)
            pl.BlockSpec((5, 1, hidden), lambda i, j: (0, 0, 0)),         # b1..b5 (resident)
            pl.BlockSpec((hidden, 2), lambda i, j: (0, 0)),               # w_out (resident)
            pl.BlockSpec((1, 2), lambda i, j: (0, 0)),                    # b_out (resident)
        ],
        out_specs=pl.BlockSpec((1, 1, 128), lambda i, j: (i, 0, 0)),      # lane-dense row
        scratch_shapes=[pltpu.VMEM((1, bd), jnp.float32)],                # deferred MSE acc
    )

    partials = pl.pallas_call(
        _factor_loss_kernel,
        out_shape=jax.ShapeDtypeStruct((num_bt, 1, 128), jnp.float32),
        grid_spec=grid_spec,
        compiler_params=pltpu.CompilerParams(
            dimension_semantics=("parallel", "arbitrary"),
            vmem_limit_bytes=32 * 1024 * 1024),
    )(data1, recon,
      mu.astype(jnp.float32), logvar.astype(jnp.float32),
      eps_latent.astype(jnp.float32),
      w_in, w_hid, b_all, w_out, b_out)

    rec_loss = jnp.sum(partials[:, 0, 0])
    kl_loss = jnp.sum(partials[:, 0, 1]) / half   # mean over batch of per-sample KL sums
    tc_loss = jnp.sum(partials[:, 0, 2]) / half   # mean(d_z[:,0] - d_z[:,1])
    return rec_loss + kl_loss + gamma * tc_loss


# ----------------------------------------------------------------------------
# Deterministic parameter init (shapes follow the reference Discriminator:
# latent_dim -> H -> H -> H -> H -> H -> 2), plus packing for the kernel.
# ----------------------------------------------------------------------------
def init_discriminator(key, latent_dim=LATENT_DIM, hidden=DISC_HIDDEN):
    dims = [latent_dim] + [hidden] * 5 + [2]
    params = []
    for i in range(6):
        key, kw = jax.random.split(key)
        w = (jax.random.normal(kw, (dims[i], dims[i + 1]), jnp.float32)
             / jnp.sqrt(float(dims[i])))
        b = jnp.zeros((1, dims[i + 1]), jnp.float32)
        params += [w, b]
    return params


def pack_discriminator(params):
    (w1, b1, w2, b2, w3, b3, w4, b4, w5, b5, w6, b6) = params
    w_in = w1.astype(jnp.bfloat16)                               # (L, H)
    w_hid = jnp.stack([w2, w3, w4, w5]).astype(jnp.bfloat16)     # (4, H, H)
    b_all = jnp.stack([b1, b2, b3, b4, b5])                      # (5, 1, H) f32
    w_out = w6.astype(jnp.bfloat16)                              # (H, 2)
    b_out = b6                                                   # (1, 2) f32
    return w_in, w_hid, b_all, w_out, b_out


def init_standin_vae(key, x_dim, latent_dim=LATENT_DIM):
    # stand-in VAE "model" (external to FactorKLoss); plain-JAX glue only.
    k1, k2, k3 = jax.random.split(key, 3)
    return dict(
        w_mu=jax.random.normal(k1, (x_dim, latent_dim), jnp.float32) * 0.05,
        w_lv=jax.random.normal(k2, (x_dim, latent_dim), jnp.float32) * 0.05,
        w_dec=jax.random.normal(k3, (latent_dim, x_dim), jnp.float32) * 0.05,
    )


def standin_vae_forward(params, x_flat, eps_model):
    mu = x_flat @ params["w_mu"]
    logvar = x_flat @ params["w_lv"]
    z = mu + jnp.exp(0.5 * logvar) * eps_model
    recon = jax.nn.sigmoid(z @ params["w_dec"])
    return recon, mu, logvar


# ----------------------------------------------------------------------------
# FactorKLoss.forward (eval path: `if not model.training: return vae_loss`)
# ----------------------------------------------------------------------------
def factor_k_loss_forward(data_nchw, vae_params, disc_packed, eps_model,
                          eps_latent, gamma=GAMMA):
    batch = data_nchw.shape[0]
    half = batch // 2
    data_flat = data_nchw.reshape(batch, -1).astype(jnp.float32)
    data1 = data_flat[:half]
    # data2 = data_flat[half:]  # only used in the (untranslated) training branch

    recon, mu, logvar = standin_vae_forward(vae_params, data1, eps_model)
    vae_loss = factor_vae_loss_fused(data1, recon, mu, logvar, eps_latent,
                                     disc_packed, gamma)
    return vae_loss, (recon, mu, logvar)


# ----------------------------------------------------------------------------
# Pure-JAX references for correctness checking
# ----------------------------------------------------------------------------
def _reference_matched(data1, recon, mu, logvar, eps_latent, disc_packed, gamma):
    """Same bf16-operand / f32-accumulate math as the kernel."""
    w_in, w_hid, b_all, w_out, b_out = disc_packed
    z = mu + jnp.exp(0.5 * logvar) * eps_latent
    h = jnp.dot(z.astype(jnp.bfloat16), w_in,
                preferred_element_type=jnp.float32) + b_all[0]
    h = jnp.maximum(h, NEG_SLOPE * h)
    for layer in range(4):
        h = jnp.dot(h.astype(jnp.bfloat16), w_hid[layer],
                    preferred_element_type=jnp.float32) + b_all[layer + 1]
        h = jnp.maximum(h, NEG_SLOPE * h)
    d_z = jnp.dot(h.astype(jnp.bfloat16), w_out,
                  preferred_element_type=jnp.float32) + b_out
    rec = jnp.sum((recon - data1) ** 2)
    kl = jnp.mean(-0.5 * jnp.sum(1.0 + logvar - mu ** 2 - jnp.exp(logvar), axis=1))
    tc = jnp.mean(d_z[:, 0] - d_z[:, 1])
    return rec + kl + gamma * tc


def _reference_f32(data1, recon, mu, logvar, eps_latent, disc_params, gamma):
    """Full-f32 PyTorch-semantics reference (looser tolerance vs bf16 kernel)."""
    z = mu + jnp.exp(0.5 * logvar) * eps_latent
    h = z
    for i in range(5):
        h = h @ disc_params[2 * i] + disc_params[2 * i + 1]
        h = jnp.maximum(h, NEG_SLOPE * h)
    d_z = h @ disc_params[10] + disc_params[11]
    rec = jnp.sum((recon - data1) ** 2)
    kl = jnp.mean(-0.5 * jnp.sum(1.0 + logvar - mu ** 2 - jnp.exp(logvar), axis=1))
    tc = jnp.mean(d_z[:, 0] - d_z[:, 1])
    return rec + kl + gamma * tc


if __name__ == "__main__":
    def run_case(case_key, B, C, H, W):
        k_data, k_vae, k_disc, k_eps_m, k_eps_l = jax.random.split(case_key, 5)
        half = B // 2
        x_dim = C * H * W

        data = jax.random.uniform(k_data, (B, C, H, W), jnp.float32)
        vae_params = init_standin_vae(k_vae, x_dim, LATENT_DIM)
        disc_raw = init_discriminator(k_disc, LATENT_DIM, DISC_HIDDEN)
        disc_packed = pack_discriminator(disc_raw)
        eps_model = jax.random.normal(k_eps_m, (half, LATENT_DIM), jnp.float32)
        eps_latent = jax.random.normal(k_eps_l, (half, LATENT_DIM), jnp.float32)

        vae_loss, (recon, mu, logvar) = factor_k_loss_forward(
            data, vae_params, disc_packed, eps_model, eps_latent, GAMMA)
        vae_loss = jax.block_until_ready(vae_loss)

        data1 = data.reshape(B, -1)[:half].astype(jnp.float32)
        ref_matched = _reference_matched(data1, recon, mu, logvar, eps_latent,
                                         disc_packed, GAMMA)
        ref_f32 = _reference_f32(data1, recon, mu, logvar, eps_latent,
                                 disc_raw, GAMMA)

        assert jnp.allclose(vae_loss, ref_matched, rtol=1e-4, atol=1e-2), \
            (vae_loss, ref_matched)
        assert jnp.allclose(vae_loss, ref_f32, rtol=1e-3, atol=1.0), \
            (vae_loss, ref_f32)

    key = jax.random.PRNGKey(0)
    k1, k2 = jax.random.split(key)

    # Case 1: half = 256 -> two 128-row batch tiles (parallel axis for v7x's 2 TCs),
    # feature dim 1024 -> a single 1024-wide feature tile.
    run_case(k1, B=512, C=1, H=32, W=32)

    # Case 2: odd feature dim 300 -> zero-padded to 384 -> three 128-wide feature
    # tiles (exercises the deferred-MSE accumulation + padding path) with small
    # 8-row batch tiles.
    run_case(k2, B=48, C=3, H=10, W=10)

    print("KERNEL_OK")
</pallas_src>

<mosaic_0001>
module attributes {stable_mosaic.version = 11 : i64} {
  func.func @_factor_loss_kernel(%arg0: i32, %arg1: i32, %arg2: memref<128x1024xf32, #tpu.memory_space<vmem>>, %arg3: memref<128x1024xf32, #tpu.memory_space<vmem>>, %arg4: memref<128x10xf32, #tpu.memory_space<vmem>>, %arg5: memref<128x10xf32, #tpu.memory_space<vmem>>, %arg6: memref<128x10xf32, #tpu.memory_space<vmem>>, %arg7: memref<10x256xbf16, #tpu.memory_space<vmem>>, %arg8: memref<4x256x256xbf16, #tpu.memory_space<vmem>>, %arg9: memref<5x1x256xf32, #tpu.memory_space<vmem>>, %arg10: memref<256x2xbf16, #tpu.memory_space<vmem>>, %arg11: memref<1x2xf32, #tpu.memory_space<vmem>>, %arg12: memref<1x1x128xf32, #tpu.memory_space<vmem>>, %arg13: memref<1x1024xf32, #tpu.memory_space<vmem>>) attributes {dimension_semantics = [#tpu.dimension_semantics<parallel>, #tpu.dimension_semantics<arbitrary>], iteration_bounds = array<i64: 2, 1>, scalar_prefetch = 0 : i64, scratch_operands = 1 : i64, tpu.core_type = #tpu.core_type<tc>, window_params = [{transform_indices = @transform_0, window_bounds = array<i64: 128, 1024>}, {transform_indices = @transform_1, window_bounds = array<i64: 128, 1024>}, {transform_indices = @transform_2, window_bounds = array<i64: 128, 10>}, {transform_indices = @transform_3, window_bounds = array<i64: 128, 10>}, {transform_indices = @transform_4, window_bounds = array<i64: 128, 10>}, {pipeline_mode = #tpu.pipeline_mode<synchronous>, transform_indices = @transform_5, window_bounds = array<i64: 10, 256>}, {pipeline_mode = #tpu.pipeline_mode<synchronous>, transform_indices = @transform_6, window_bounds = array<i64: 4, 256, 256>}, {pipeline_mode = #tpu.pipeline_mode<synchronous>, transform_indices = @transform_7, window_bounds = array<i64: 5, 1, 256>}, {pipeline_mode = #tpu.pipeline_mode<synchronous>, transform_indices = @transform_8, window_bounds = array<i64: 256, 2>}, {pipeline_mode = #tpu.pipeline_mode<synchronous>, transform_indices = @transform_9, window_bounds = array<i64: 1, 2>}, {transform_indices = @transform_10, window_bounds = array<i64: 1, 1, 128>}]} {
    %c0_i32 = arith.constant 0 : i32
    %0 = arith.cmpi eq, %arg1, %c0_i32 : i32
    %1 = arith.extui %0 : i1 to i32
    %c0_i32_0 = arith.constant 0 : i32
    %2 = arith.cmpi ne, %1, %c0_i32_0 : i32
    scf.if %2 {
      %cst_10 = arith.constant 0.000000e+00 : f32
      %15 = vector.broadcast %cst_10 : f32 to vector<1x1024xf32>
      %c0_11 = arith.constant 0 : index
      %c0_12 = arith.constant 0 : index
      %16 = vector.load %arg13[%c0_11, %c0_12] : memref<1x1024xf32, #tpu.memory_space<vmem>>, vector<1x1024xf32>
      tpu.vector_store %arg13[%c0_11, %c0_12], %15 {strides = array<i32>} : memref<1x1024xf32, #tpu.memory_space<vmem>>, vector<1x1024xf32>,
    } else {
    }
    %c0 = arith.constant 0 : index
    %c0_1 = arith.constant 0 : index
    %3 = vector.load %arg3[%c0, %c0_1] : memref<128x1024xf32, #tpu.memory_space<vmem>>, vector<128x1024xf32>
    %c0_2 = arith.constant 0 : index
    %c0_3 = arith.constant 0 : index
    %4 = vector.load %arg2[%c0_2, %c0_3] : memref<128x1024xf32, #tpu.memory_space<vmem>>, vector<128x1024xf32>
    %5 = arith.subf %3, %4 : vector<128x1024xf32>
    %c0_4 = arith.constant 0 : index
    %c0_5 = arith.constant 0 : index
    %6 = vector.load %arg13[%c0_4, %c0_5] : memref<1x1024xf32, #tpu.memory_space<vmem>>, vector<1x1024xf32>
    %7 = arith.mulf %5, %5 : vector<128x1024xf32>
    %cst = arith.constant dense<0.000000e+00> : vector<1024xf32>
    %8 = vector.multi_reduction <add>, %7, %cst [0] : vector<128x1024xf32> to vector<1024xf32>
    %9 = vector.shape_cast %8 : vector<1024xf32> to vector<1x1024xf32>
    %10 = arith.addf %6, %9 : vector<1x1024xf32>
    %c0_6 = arith.constant 0 : index
    %c0_7 = arith.constant 0 : index
    %11 = vector.load %arg13[%c0_6, %c0_7] : memref<1x1024xf32, #tpu.memory_space<vmem>>, vector<1x1024xf32>
    tpu.vector_store %arg13[%c0_6, %c0_7], %10 {strides = array<i32>} : memref<1x1024xf32, #tpu.memory_space<vmem>>, vector<1x1024xf32>,
    %c0_i32_8 = arith.constant 0 : i32
    %12 = arith.cmpi eq, %arg1, %c0_i32_8 : i32
    %13 = arith.extui %12 : i1 to i32
    %c0_i32_9 = arith.constant 0 : i32
    %14 = arith.cmpi ne, %13, %c0_i32_9 : i32
    scf.if %14 {
      %c0_10 = arith.constant 0 : index
      %c0_11 = arith.constant 0 : index
      %15 = vector.load %arg13[%c0_10, %c0_11] : memref<1x1024xf32, #tpu.memory_space<vmem>>, vector<1x1024xf32>
      %16 = vector.shape_cast %15 : vector<1x1024xf32> to vector<1x1x1024xf32>
      %cst_12 = arith.constant dense<0.000000e+00> : vector<1xf32>
      %17 = vector.multi_reduction <add>, %16, %cst_12 [1, 2] : vector<1x1x1024xf32> to vector<1xf32>
      %18 = vector.shape_cast %17 : vector<1xf32> to vector<1x1x1xf32>
      %19 = vector.extract %18[0, 0, 0] : f32 from vector<1x1x1xf32>
      %c0_13 = arith.constant 0 : index
      %c0_14 = arith.constant 0 : index
      %20 = vector.load %arg4[%c0_13, %c0_14] : memref<128x10xf32, #tpu.memory_space<vmem>>, vector<128x10xf32>
      %c0_15 = arith.constant 0 : index
      %c0_16 = arith.constant 0 : index
      %21 = vector.load %arg5[%c0_15, %c0_16] : memref<128x10xf32, #tpu.memory_space<vmem>>, vector<128x10xf32>
      %c0_17 = arith.constant 0 : index
      %c0_18 = arith.constant 0 : index
      %22 = vector.load %arg6[%c0_17, %c0_18] : memref<128x10xf32, #tpu.memory_space<vmem>>, vector<128x10xf32>
      %cst_19 = arith.constant 1.000000e+00 : f32
      %23 = vector.broadcast %cst_19 : f32 to vector<128x10xf32>
      %24 = arith.addf %23, %21 : vector<128x10xf32>
      %25 = arith.mulf %20, %20 : vector<128x10xf32>
      %26 = arith.subf %24, %25 : vector<128x10xf32>
      %27 = math.exp %21 : vector<128x10xf32>
      %28 = arith.subf %26, %27 : vector<128x10xf32>
      %29 = vector.shape_cast %28 : vector<128x10xf32> to vector<1x128x10xf32>
      %cst_20 = arith.constant dense<0.000000e+00> : vector<1xf32>
      %30 = vector.multi_reduction <add>, %29, %cst_20 [1, 2] : vector<1x128x10xf32> to vector<1xf32>
      %31 = vector.shape_cast %30 : vector<1xf32> to vector<1x1x1xf32>
      %32 = vector.extract %31[0, 0, 0] : f32 from vector<1x1x1xf32>
      %cst_21 = arith.constant -5.000000e-01 : f32
      %33 = arith.mulf %cst_21, %32 : f32
      %cst_22 = arith.constant 5.000000e-01 : f32
      %34 = vector.broadcast %cst_22 : f32 to vector<128x10xf32>
      %35 = arith.mulf %34, %21 : vector<128x10xf32>
      %36 = math.exp %35 : vector<128x10xf32>
      %37 = arith.mulf %36, %22 : vector<128x10xf32>
      %38 = arith.addf %20, %37 : vector<128x10xf32>
      %39 = arith.truncf %38 : vector<128x10xf32> to vector<128x10xbf16>
      %c0_23 = arith.constant 0 : index
      %c0_24 = arith.constant 0 : index
      %40 = vector.load %arg7[%c0_23, %c0_24] : memref<10x256xbf16, #tpu.memory_space<vmem>>, vector<10x256xbf16>
      %cst_25 = arith.constant dense<0.000000e+00> : vector<128x256xf32>
      %41 = tpu.matmul %39, %40, %cst_25 {dimension_numbers = #tpu.dot_dimension_numbers<[1], [0], [0], [1], [0, 0, 1, 1], [], []>} : vector<128x10xbf16>, vector<10x256xbf16>, vector<128x256xf32> -> vector<128x256xf32>
      %c0_26 = arith.constant 0 : index
      %c0_27 = arith.constant 0 : index
      %c0_28 = arith.constant 0 : index
      %42 = vector.load %arg9[%c0_26, %c0_27, %c0_28] : memref<5x1x256xf32, #tpu.memory_space<vmem>>, vector<1x1x256xf32>
      %43 = vector.shape_cast %42 : vector<1x1x256xf32> to vector<1x256xf32>
      %44 = vector.broadcast %43 : vector<1x256xf32> to vector<128x256xf32>
      %45 = arith.addf %41, %44 : vector<128x256xf32>
      %cst_29 = arith.constant 2.000000e-01 : f32
      %46 = vector.broadcast %cst_29 : f32 to vector<128x256xf32>
      %47 = arith.mulf %46, %45 : vector<128x256xf32>
      %48 = arith.maximumf %45, %47 : vector<128x256xf32>
      %49 = arith.truncf %48 : vector<128x256xf32> to vector<128x256xbf16>
      %c0_30 = arith.constant 0 : index
      %c0_31 = arith.constant 0 : index
      %c0_32 = arith.constant 0 : index
      %50 = vector.load %arg8[%c0_30, %c0_31, %c0_32] : memref<4x256x256xbf16, #tpu.memory_space<vmem>>, vector<1x256x256xbf16>
      %51 = vector.shape_cast %50 : vector<1x256x256xbf16> to vector<256x256xbf16>
      %cst_33 = arith.constant dense<0.000000e+00> : vector<128x256xf32>
      %52 = tpu.matmul %49, %51, %cst_33 {dimension_numbers = #tpu.dot_dimension_numbers<[1], [0], [0], [1], [0, 0, 1, 1], [], []>} : vector<128x256xbf16>, vector<256x256xbf16>, vector<128x256xf32> -> vector<128x256xf32>
      %c1 = arith.constant 1 : index
      %c0_34 = arith.constant 0 : index
      %c0_35 = arith.constant 0 : index
      %53 = vector.load %arg9[%c1, %c0_34, %c0_35] : memref<5x1x256xf32, #tpu.memory_space<vmem>>, vector<1x1x256xf32>
      %54 = vector.shape_cast %53 : vector<1x1x256xf32> to vector<1x256xf32>
      %55 = vector.broadcast %54 : vector<1x256xf32> to vector<128x256xf32>
      %56 = arith.addf %52, %55 : vector<128x256xf32>
      %cst_36 = arith.constant 2.000000e-01 : f32
      %57 = vector.broadcast %cst_36 : f32 to vector<128x256xf32>
      %58 = arith.mulf %57, %56 : vector<128x256xf32>
      %59 = arith.maximumf %56, %58 : vector<128x256xf32>
      %60 = arith.truncf %59 : vector<128x256xf32> to vector<128x256xbf16>
      %c1_37 = arith.constant 1 : index
      %c0_38 = arith.constant 0 : index
      %c0_39 = arith.constant 0 : index
      %61 = vector.load %arg8[%c1_37, %c0_38, %c0_39] : memref<4x256x256xbf16, #tpu.memory_space<vmem>>, vector<1x256x256xbf16>
      %62 = vector.shape_cast %61 : vector<1x256x256xbf16> to vector<256x256xbf16>
      %cst_40 = arith.constant dense<0.000000e+00> : vector<128x256xf32>
      %63 = tpu.matmul %60, %62, %cst_40 {dimension_numbers = #tpu.dot_dimension_numbers<[1], [0], [0], [1], [0, 0, 1, 1], [], []>} : vector<128x256xbf16>, vector<256x256xbf16>, vector<128x256xf32> -> vector<128x256xf32>
      %c2 = arith.constant 2 : index
      %c0_41 = arith.constant 0 : index
      %c0_42 = arith.constant 0 : index
      %64 = vector.load %arg9[%c2, %c0_41, %c0_42] : memref<5x1x256xf32, #tpu.memory_space<vmem>>, vector<1x1x256xf32>
      %65 = vector.shape_cast %64 : vector<1x1x256xf32> to vector<1x256xf32>
      %66 = vector.broadcast %65 : vector<1x256xf32> to vector<128x256xf32>
      %67 = arith.addf %63, %66 : vector<128x256xf32>
      %cst_43 = arith.constant 2.000000e-01 : f32
      %68 = vector.broadcast %cst_43 : f32 to vector<128x256xf32>
      %69 = arith.mulf %68, %67 : vector<128x256xf32>
      %70 = arith.maximumf %67, %69 : vector<128x256xf32>
      %71 = arith.truncf %70 : vector<128x256xf32> to vector<128x256xbf16>
      %c2_44 = arith.constant 2 : index
      %c0_45 = arith.constant 0 : index
      %c0_46 = arith.constant 0 : index
      %72 = vector.load %arg8[%c2_44, %c0_45, %c0_46] : memref<4x256x256xbf16, #tpu.memory_space<vmem>>, vector<1x256x256xbf16>
      %73 = vector.shape_cast %72 : vector<1x256x256xbf16> to vector<256x256xbf16>
      %cst_47 = arith.constant dense<0.000000e+00> : vector<128x256xf32>
      %74 = tpu.matmul %71, %73, %cst_47 {dimension_numbers = #tpu.dot_dimension_numbers<[1], [0], [0], [1], [0, 0, 1, 1], [], []>} : vector<128x256xbf16>, vector<256x256xbf16>, vector<128x256xf32> -> vector<128x256xf32>
      %c3 = arith.constant 3 : index
      %c0_48 = arith.constant 0 : index
      %c0_49 = arith.constant 0 : index
      %75 = vector.load %arg9[%c3, %c0_48, %c0_49] : memref<5x1x256xf32, #tpu.memory_space<vmem>>, vector<1x1x256xf32>
      %76 = vector.shape_cast %75 : vector<1x1x256xf32> to vector<1x256xf32>
      %77 = vector.broadcast %76 : vector<1x256xf32> to vector<128x256xf32>
      %78 = arith.addf %74, %77 : vector<128x256xf32>
      %cst_50 = arith.constant 2.000000e-01 : f32
      %79 = vector.broadcast %cst_50 : f32 to vector<128x256xf32>
      %80 = arith.mulf %79, %78 : vector<128x256xf32>
      %81 = arith.maximumf %78, %80 : vector<128x256xf32>
      %82 = arith.truncf %81 : vector<128x256xf32> to vector<128x256xbf16>
      %c3_51 = arith.constant 3 : index
      %c0_52 = arith.constant 0 : index
      %c0_53 = arith.constant 0 : index
      %83 = vector.load %arg8[%c3_51, %c0_52, %c0_53] : memref<4x256x256xbf16, #tpu.memory_space<vmem>>, vector<1x256x256xbf16>
      %84 = vector.shape_cast %83 : vector<1x256x256xbf16> to vector<256x256xbf16>
      %cst_54 = arith.constant dense<0.000000e+00> : vector<128x256xf32>
      %85 = tpu.matmul %82, %84, %cst_54 {dimension_numbers = #tpu.dot_dimension_numbers<[1], [0], [0], [1], [0, 0, 1, 1], [], []>} : vector<128x256xbf16>, vector<256x256xbf16>, vector<128x256xf32> -> vector<128x256xf32>
      %c4 = arith.constant 4 : index
      %c0_55 = arith.constant 0 : index
      %c0_56 = arith.constant 0 : index
      %86 = vector.load %arg9[%c4, %c0_55, %c0_56] : memref<5x1x256xf32, #tpu.memory_space<vmem>>, vector<1x1x256xf32>
      %87 = vector.shape_cast %86 : vector<1x1x256xf32> to vector<1x256xf32>
      %88 = vector.broadcast %87 : vector<1x256xf32> to vector<128x256xf32>
      %89 = arith.addf %85, %88 : vector<128x256xf32>
      %cst_57 = arith.constant 2.000000e-01 : f32
      %90 = vector.broadcast %cst_57 : f32 to vector<128x256xf32>
      %91 = arith.mulf %90, %89 : vector<128x256xf32>
      %92 = arith.maximumf %89, %91 : vector<128x256xf32>
      %93 = arith.truncf %92 : vector<128x256xf32> to vector<128x256xbf16>
      %c0_58 = arith.constant 0 : index
      %c0_59 = arith.constant 0 : index
      %94 = vector.load %arg10[%c0_58, %c0_59] : memref<256x2xbf16, #tpu.memory_space<vmem>>, vector<256x2xbf16>
      %cst_60 = arith.constant dense<0.000000e+00> : vector<128x2xf32>
      %95 = tpu.matmul %93, %94, %cst_60 {dimension_numbers = #tpu.dot_dimension_numbers<[1], [0], [0], [1], [0, 0, 1, 1], [], []>} : vector<128x256xbf16>, vector<256x2xbf16>, vector<128x2xf32> -> vector<128x2xf32>
      %c0_61 = arith.constant 0 : index
      %c0_62 = arith.constant 0 : index
      %96 = vector.load %arg11[%c0_61, %c0_62] : memref<1x2xf32, #tpu.memory_space<vmem>>, vector<1x2xf32>
      %97 = vector.broadcast %96 : vector<1x2xf32> to vector<128x2xf32>
      %98 = arith.addf %95, %97 : vector<128x2xf32>
      %99 = vector.extract_strided_slice %98 {offsets = [0, 0], sizes = [128, 1], strides = [1, 1]} : vector<128x2xf32> to vector<128x1xf32>
      %100 = vector.extract_strided_slice %98 {offsets = [0, 1], sizes = [128, 1], strides = [1, 1]} : vector<128x2xf32> to vector<128x1xf32>
      %101 = arith.subf %99, %100 : vector<128x1xf32>
      %102 = vector.shape_cast %101 : vector<128x1xf32> to vector<1x128x1xf32>
      %cst_63 = arith.constant dense<0.000000e+00> : vector<1xf32>
      %103 = vector.multi_reduction <add>, %102, %cst_63 [1, 2] : vector<1x128x1xf32> to vector<1xf32>
      %104 = vector.shape_cast %103 : vector<1xf32> to vector<1x1x1xf32>
      %105 = vector.extract %104[0, 0, 0] : f32 from vector<1x1x1xf32>
      %106 = tpu.iota {dimensions = array<i32: 2>} : vector<1x1x128xi32>
      %c0_i32_64 = arith.constant 0 : i32
      %107 = vector.broadcast %c0_i32_64 : i32 to vector<1x1x128xi32>
      %108 = arith.cmpi eq, %106, %107 : vector<1x1x128xi32>
      %c1_i32 = arith.constant 1 : i32
      %109 = vector.broadcast %c1_i32 : i32 to vector<1x1x128xi32>
      %110 = arith.cmpi eq, %106, %109 : vector<1x1x128xi32>
      %c2_i32 = arith.constant 2 : i32
      %111 = vector.broadcast %c2_i32 : i32 to vector<1x1x128xi32>
      %112 = arith.cmpi eq, %106, %111 : vector<1x1x128xi32>
      %cst_65 = arith.constant 0.000000e+00 : f32
      %113 = vector.broadcast %105 : f32 to vector<1x1x128xf32>
      %114 = vector.broadcast %cst_65 : f32 to vector<1x1x128xf32>
      %115 = arith.select %112, %113, %114 : vector<1x1x128xi1>, vector<1x1x128xf32>
      %116 = vector.broadcast %33 : f32 to vector<1x1x128xf32>
      %117 = arith.select %110, %116, %115 : vector<1x1x128xi1>, vector<1x1x128xf32>
      %118 = vector.broadcast %19 : f32 to vector<1x1x128xf32>
      %119 = arith.select %108, %118, %117 : vector<1x1x128xi1>, vector<1x1x128xf32>
      %c0_66 = arith.constant 0 : index
      %c0_67 = arith.constant 0 : index
      %c0_68 = arith.constant 0 : index
      %120 = vector.load %arg12[%c0_66, %c0_67, %c0_68] : memref<1x1x128xf32, #tpu.memory_space<vmem>>, vector<1x1x128xf32>
      tpu.vector_store %arg12[%c0_66, %c0_67, %c0_68], %119 {strides = array<i32>} : memref<1x1x128xf32, #tpu.memory_space<vmem>>, vector<1x1x128xf32>,
    } else {
    }
    return
  }
  func.func @transform_0(%arg0: i32, %arg1: i32) -> (i32, i32) {
    %c0_i32 = arith.constant 0 : i32
    return %arg0, %arg1 : i32, i32
  }
  func.func @transform_1(%arg0: i32, %arg1: i32) -> (i32, i32) {
    %c0_i32 = arith.constant 0 : i32
    return %arg0, %arg1 : i32, i32
  }
  func.func @transform_2(%arg0: i32, %arg1: i32) -> (i32, i32) {
    %c0_i32 = arith.constant 0 : i32
    %c0_i32_0 = arith.constant 0 : i32
    return %arg0, %c0_i32 : i32, i32
  }
  func.func @transform_3(%arg0: i32, %arg1: i32) -> (i32, i32) {
    %c0_i32 = arith.constant 0 : i32
    %c0_i32_0 = arith.constant 0 : i32
    return %arg0, %c0_i32 : i32, i32
  }
  func.func @transform_4(%arg0: i32, %arg1: i32) -> (i32, i32) {
    %c0_i32 = arith.constant 0 : i32
    %c0_i32_0 = arith.constant 0 : i32
    return %arg0, %c0_i32 : i32, i32
  }
  func.func @transform_5(%arg0: i32, %arg1: i32) -> (i32, i32) {
    %c0_i32 = arith.constant 0 : i32
    %c0_i32_0 = arith.constant 0 : i32
    %c0_i32_1 = arith.constant 0 : i32
    return %c0_i32, %c0_i32_0 : i32, i32
  }
  func.func @transform_6(%arg0: i32, %arg1: i32) -> (i32, i32, i32) {
    %c0_i32 = arith.constant 0 : i32
    %c0_i32_0 = arith.constant 0 : i32
    %c0_i32_1 = arith.constant 0 : i32
    %c0_i32_2 = arith.constant 0 : i32
    return %c0_i32, %c0_i32_0, %c0_i32_1 : i32, i32, i32
  }
  func.func @transform_7(%arg0: i32, %arg1: i32) -> (i32, i32, i32) {
    %c0_i32 = arith.constant 0 : i32
    %c0_i32_0 = arith.constant 0 : i32
    %c0_i32_1 = arith.constant 0 : i32
    %c0_i32_2 = arith.constant 0 : i32
    return %c0_i32, %c0_i32_0, %c0_i32_1 : i32, i32, i32
  }
  func.func @transform_8(%arg0: i32, %arg1: i32) -> (i32, i32) {
    %c0_i32 = arith.constant 0 : i32
    %c0_i32_0 = arith.constant 0 : i32
    %c0_i32_1 = arith.constant 0 : i32
    return %c0_i32, %c0_i32_0 : i32, i32
  }
  func.func @transform_9(%arg0: i32, %arg1: i32) -> (i32, i32) {
    %c0_i32 = arith.constant 0 : i32
    %c0_i32_0 = arith.constant 0 : i32
    %c0_i32_1 = arith.constant 0 : i32
    return %c0_i32, %c0_i32_0 : i32, i32
  }
  func.func @transform_10(%arg0: i32, %arg1: i32) -> (i32, i32, i32) {
    %c0_i32 = arith.constant 0 : i32
    %c0_i32_0 = arith.constant 0 : i32
    %c0_i32_1 = arith.constant 0 : i32
    return %arg0, %c0_i32, %c0_i32_0 : i32, i32, i32
  }
}

</mosaic_0001>

<bundles_post_ra>
// kernel: tpu_custom_call.1
= control target key start
LH: loop header
LB: loop body
LE: loop exit
PB: predicated region body
PF: predicated region fallthrough
CT: control target
= control target key end

     0   :  { %s7051_s0 = inlined_call_operand.hbm [shape: f32[256,1024], index: 0, kind: input, shape index: {}]   ;;  %s7052_s1 = inlined_call_operand.hbm [shape: f32[256,1024], index: 1, kind: input, shape index: {}]   ;;  %s7053_s2 = inlined_call_operand.vmem [shape: f32[256,10], index: 2, kind: input, shape index: {}]   ;;  %s7054_s3 = inlined_call_operand.vmem [shape: f32[256,10], index: 3, kind: input, shape index: {}]   ;;  %s7055_s4 = inlined_call_operand.vmem [shape: f32[256,10], index: 4, kind: input, shape index: {}]   ;;  %s7056_s5 = inlined_call_operand.vmem [shape: bf16[10,256], index: 5, kind: input, shape index: {}]   ;;  %s7057_s6 = inlined_call_operand.hbm [shape: bf16[4,256,256], index: 6, kind: input, shape index: {}]   ;;  %s7058_s7 = inlined_call_operand.vmem [shape: f32[5,1,256], index: 7, kind: input, shape index: {}]   ;;  %s7059_s8 = inlined_call_operand.vmem [shape: bf16[256,2], index: 8, kind: input, shape index: {}]   ;;  %s7060_s9 = inlined_call_operand.vmem [shape: f32[1,2], index: 9, kind: input, shape index: {}]   ;;  %s7061_s10 = inlined_call_operand.hbm [shape: f32[2,1,128], index: 10, kind: output, shape index: {}]  }
   0x1   :  { %7098 = sst [smem:[#allocation136_spill]] %s7051_s0 }
   0x2   :  { %7099 = sst [smem:[#allocation137_spill]] %s7057_s6 }
   0x3   :  { %7100 = sst [smem:[#allocation138_spill]] %s7061_s10 }
   0x4   :  { %15 = vsyncpa [#allocation4], 0 }
   0x5   :  { %17 = vsyncpa [#allocation4 + $0x1], 0 }
   0x6   :  { %18 = vsyncpa [#allocation7], 0 }
   0x7   :  { %20 = vsyncpa [#allocation7 + $0x1], 0 }
   0x8   :  { %21 = vsyncpa [#allocation5], 0 }
   0x9   :  { %23 = vsyncpa [#allocation5 + $0x1], 0  ;;  %s4873_s13 = smov 0   ;;  %s4875_s14 = smov 0  }
   0xa   :  { %s4877_s15 = smov 0   ;;  %s4879_s16 = smov 0  }
   0xb   :  { %s4881_s17 = smov 0   ;;  %s4883_s18 = smov 0  }
   0xc LB: > { %7101 = sst [smem:[#allocation14_spill]] %s4785_s13  ;;  %s4904_s19 = sadd.s32 4294967295, %s4805_s18   ;;  %s4805_s18 = sphi %s4883_s18, %s29_s18   ;;  %s4801_s17 = sphi %s4881_s17, %s7498_s17   ;;  %s4797_s16 = sphi %s4879_s16, %s7497_s16   ;;  %s4793_s15 = sphi %s4877_s15, %s7496_s15   ;;  %s4789_s14 = sphi %s4875_s14, %s7495_s14   ;;  %s4785_s13 = sphi %s4873_s13, %s7494_s13  }
   0xd   : > { %7102 = sst [smem:[#allocation15_spill]] %s4793_s15  ;;  %s3982_s20 = sadd.s32 4294967294, %s4805_s18  }
   0xe   : > { %p63_p0 = scmp.ne.s32.totalorder %s4789_s14, %s4785_s13  ;;  %p7063_p1 = scmp.eq.s32.totalorder %s4904_s19, 0 }
   0xf   : > { %p304_p3 = scmp.eq.s32.totalorder %s3982_s20, 1  ;;  %p3983_p5 = scmp.ge.s32.totalorder %s4805_s18, 1 }
  0x10   : > { %p4913_p4 = por %p7063_p1, %p63_p0  ;;  %p311_p7 = scmp.lt.s32.totalorder %s4805_s18, 3 }
  0x11   : > { %p4918_p6 = por %p304_p3, %p63_p0  ;;  %s4807_s24 = smov [#allocation8]  }
  0x12   : > { %s7103_s21 = scalar_select %p4913_p4, 1, 0 }
  0x13   : > { %s7104_s22 = scalar_select %p4918_p6, 1, 0 }
  0x14   : > { %p4923_p8 = pnand %p3983_p5, %p311_p7  ;;  %s326_s25 = sshll.u32 %s4807_s24, 4  ;;  %s327_s25 = int_to_ptr.vmem [resolvable:$true] %s326_s25 }
  0x15   : > { %7105 = sst [smem:[#allocation16_spill]] %s7104_s22  ;;  %s41_s27 = sadd.s32 1, %s4801_s17 }
  0x16   : > { %s7106_s23 = scalar_select %p4923_p8, 1, 0 }
  0x17   : > { %p4267_p9 = pneg %p4923_p8  ;;  %s7108_s6 = sld [smem:[#allocation137_spill]] }
  0x19   : > { %p4932_p11 = pnand %p4267_p9, %p7063_p1 }
  0x1b   : > { %p4629_p13 = pneg %p4932_p11 }
  0x1d   : > { %s4627_s30 = scalar_lea.hbm %s7108_s6, 16384 }
  0x1e   : > { %p4628_p12 = scmp.ne.s32.totalorder %s7108_s6, %s4627_s30  ;;  %p4634_p5 = scmp.lt.u32.totalorder %s4627_s30, %s7108_s6 }
  0x20   : > { %p4630_p0 = pnand %p4629_p13, %p4628_p12 }
  0x22   : > { %p4631_p3 = pneg %p4630_p0 }
  0x24   : > { %p4636_p7 = pnand %p4634_p5, %p4631_p3 }
  0x26   : > { %4639 = shalt.err (!%p4636_p7)
}
  0x27   : > { %s4640_s22 = scalar_lea.vmem %s327_s25, 16384  ;;  %p4648_p2 = scmp.lt.s32.totalorder %s327_s25, %s327_s25 }
  0x28   : > { %p4641_p9 = scmp.ne.s32.totalorder %s327_s25, %s4640_s22  ;;  %p4649_p6 = scmp.lt.s32.totalorder %s4640_s22, %s4640_s22 }
  0x2a   : > { %p4643_p10 = pnand %p4641_p9, %p4629_p13  ;;  %p4650_p4 = por %p4649_p6, %p4648_p2 }
  0x2c   : > { %p4644_p1 = pneg %p4643_p10 }
  0x2e   : > { %p4651_p8 = pnand %p4650_p4, %p4644_p1 }
  0x30   : > { %4654 = shalt.err (!%p4651_p8)
}
  0x31   : > { %s4808_s28 = smov 128   ;;  %s4809_s29 = smov 8  }
  0x32   : > { %4270 = dma.hbm_to_vmem [thread:$0]  (!%p4932_p11), %s7108_s6, 16384, %s327_s25, [#allocation7], %s4808_s28, %s4808_s28, %s4809_s29  }
  0x33   : > { %p43_p1 = scmp.ge.s32.totalorder %s41_s27, 2  ;;  %s50_s22 = sadd.s32 1, %s4793_s15 }
  0x34   : > { %p57_p2 = scmp.ne.s32.totalorder %s4793_s15, %s4789_s14  ;;  %p58_p4 = scmp.eq.s32.totalorder %s4805_s18, 0 }
  0x35   : > { %s7500_s27 = smov (%p43_p1, %s41_s27), 0  ;;  %p7111_p8 = scmp.eq.s32.totalorder %s4904_s19, 1 }
  0x36   : > { %7109 = sst [smem:[#allocation17_spill]] %s7500_s27  ;;  %p4959_p6 = por %p58_p4, %p57_p2 }
  0x37   : > { %p4965_p10 = por %p7111_p8, %p57_p2  ;;  %s45_s20 = ssub.s32 %s4801_s17, %s7500_s27 }
  0x38   : > { %p4283_p12 = scmp.lt.s32.totalorder %s4805_s18, 2  ;;  %p48_p11 = scmp.eq.s32.totalorder %s45_s20, 0 }
  0x39   : > { %s7112_s26 = scalar_select %p4965_p10, 1, 0 }
  0x3a   : > { %s349_s25 = sand.u32 1, %s4793_s15   ;;  %s7068_s29 = sshll.u32 %s4801_s17, 14 }
  0x3b   : > { %7113 = sst [smem:[#allocation18_spill]] %s7112_s26  ;;  %s4973_s24 = sshll.u32 %s349_s25, 10 }
  0x3c   : > { %s4976_s28 = scalar_select %p48_p11, %s4793_s15, %s50_s22  }
  0x3d   : > { %s7115_s0 = sld [smem:[#allocation136_spill]]  ;;  %s353_s27 = scalar_lea.vmem [#allocation3], %s4973_s24 }
  0x3e   : > { %7114 = sst [smem:[#allocation19_spill]] %s4976_s28  ;;  %s363_s13 = sshll.u32 %s353_s27, 4  ;;  %s4987_s13 = int_to_ptr.vmem [resolvable:$true] %s363_s13 }
  0x3f   : > { %p4991_p13 = pnand %p4283_p12, %p4959_p6  ;;  %s4995_s22 = scalar_lea.sflag [#allocation4], %s349_s25 }
  0x41   : > { %p4657_p3 = pneg %p4991_p13 }
  0x43   : > { %s4984_s6 = scalar_lea.hbm %s7115_s0, %s7068_s29  ;;  %s4660_s12 = scalar_lea.hbm %s7115_s0, 32768 }
  0x44   : > { %s4655_s30 = scalar_lea.hbm %s4984_s6, 16384  ;;  %p4661_p9 = scmp.lt.u32.totalorder %s4984_s6, %s7115_s0 }
  0x45   : > { %p4656_p0 = scmp.ne.s32.totalorder %s4984_s6, %s4655_s30  ;;  %p4662_p1 = scmp.lt.u32.totalorder %s4660_s12, %s4655_s30 }
  0x46   : > { %p4664_p4 = scmp.lt.u32.totalorder %s4655_s30, %s4984_s6 }
  0x47   : > { %p4658_p5 = pnand %p4657_p3, %p4656_p0  ;;  %p4663_p2 = por %p4662_p1, %p4661_p9 }
  0x49   : > { %p4659_p7 = pneg %p4658_p5  ;;  %p4665_p6 = por %p4664_p4, %p4663_p2 }
  0x4b   : > { %p4666_p8 = pnand %p4665_p6, %p4659_p7 }
  0x4d   : > { %4669 = shalt.err (!%p4666_p8)
}
  0x4e   : > { %s4670_s25 = scalar_lea.vmem %s4987_s13, 16384  ;;  %s4810_s27 = smov [#allocation3]  }
  0x4f   : > { %p4671_p12 = scmp.ne.s32.totalorder %s4987_s13, %s4670_s25  ;;  %s4675_s11 = sshll.u32 %s4810_s27, 4  ;;  %s4676_s11 = int_to_ptr.vmem [resolvable:$false] %s4675_s11 }
  0x50   : > { %s4677_s28 = scalar_lea.vmem %s4676_s11, 32768  ;;  %p4678_p5 = scmp.lt.s32.totalorder %s4987_s13, %s4676_s11 }
  0x51   : > { %p4673_p11 = pnand %p4671_p12, %p4657_p3  ;;  %p4679_p9 = scmp.lt.s32.totalorder %s4677_s28, %s4670_s25 }
  0x53   : > { %p4674_p0 = pneg %p4673_p11  ;;  %p4680_p1 = por %p4679_p9, %p4678_p5 }
  0x55   : > { %p4681_p2 = pnand %p4680_p1, %p4674_p0 }
  0x57   : > { %4684 = shalt.err (!%p4681_p2)
}
  0x58   : > { %s4811_s29 = smov 1024   ;;  %s4812_s30 = smov 64  }
  0x59   : > { %4274 = dma.hbm_to_vmem [thread:$0]  (!%p4991_p13), %s4984_s6, 16384, %s4987_s13, %s4995_s22, %s4811_s29, %s4811_s29, %s4812_s30  }
  0x5a   : > { %s7117_s12 = sshll.u32 %s4801_s17, 14  ;;  %s377_s28 = scalar_lea.vmem [#allocation6], %s4973_s24 }
  0x5b   : > { %s5031_s11 = scalar_lea.hbm %s7052_s1, %s7117_s12  ;;  %s387_s0 = sshll.u32 %s377_s28, 4  ;;  %s5034_s0 = int_to_ptr.vmem [resolvable:$true] %s387_s0 }
  0x5c   : > { %s373_s15 = sand.u32 1, %s4805_s18   ;;  %s4685_s26 = scalar_lea.hbm %s5031_s11, 16384 }
  0x5d   : > { %s5037_s10 = scalar_lea.sflag [#allocation7], %s373_s15  ;;  %p4686_p7 = scmp.ne.s32.totalorder %s5031_s11, %s4685_s26 }
  0x5e   : > { %s4690_s22 = scalar_lea.hbm %s7052_s1, 32768  ;;  %p4691_p8 = scmp.lt.u32.totalorder %s5031_s11, %s7052_s1 }
  0x5f   : > { %p4688_p4 = pnand %p4686_p7, %p4657_p3  ;;  %p4692_p12 = scmp.lt.u32.totalorder %s4690_s22, %s4685_s26 }
  0x60   : > { %p4694_p0 = scmp.lt.u32.totalorder %s4685_s26, %s5031_s11 }
  0x61   : > { %p4689_p6 = pneg %p4688_p4  ;;  %p4693_p11 = por %p4692_p12, %p4691_p8 }
  0x63   : > { %p4695_p5 = por %p4694_p0, %p4693_p11 }
  0x65   : > { %p4696_p9 = pnand %p4695_p5, %p4689_p6 }
  0x67   : > { %4699 = shalt.err (!%p4696_p9)
}
  0x68   : > { %s4700_s15 = scalar_lea.vmem %s5034_s0, 16384  ;;  %s4813_s24 = smov [#allocation6]  }
  0x69   : > { %p4701_p1 = scmp.ne.s32.totalorder %s5034_s0, %s4700_s15  ;;  %s4705_s27 = sshll.u32 %s4813_s24, 4  ;;  %s4706_s27 = int_to_ptr.vmem [resolvable:$false] %s4705_s27 }
  0x6a   : > { %s4707_s28 = scalar_lea.vmem %s4706_s27, 32768  ;;  %p4708_p4 = scmp.lt.s32.totalorder %s5034_s0, %s4706_s27 }
  0x6b   : > { %p4703_p2 = pnand %p4701_p1, %p4657_p3  ;;  %p4709_p8 = scmp.lt.s32.totalorder %s4707_s28, %s4700_s15 }
  0x6d   : > { %p4704_p7 = pneg %p4703_p2  ;;  %p4710_p12 = por %p4709_p8, %p4708_p4 }
  0x6f   : > { %p4711_p11 = pnand %p4710_p12, %p4704_p7 }
  0x71   : > { %4714 = shalt.err (!%p4711_p11)
}
  0x72   : > { %4277 = dma.hbm_to_vmem [thread:$0]  (!%p4991_p13), %s5031_s11, 16384, %s5034_s0, %s5037_s10, %s4811_s29, %s4811_s29, %s4812_s30  }
  0x73   : > { %p7118_p3 = scmp.ne.s32.totalorder %s7106_s23, 0 }
  0x75   : > { %426 = sbr.rel (%p7118_p3) target bundleno = 1946 (0x79a), region = 60 }
  0x7c   : > { %s5069_s26 = sand.u32 1, %s4789_s14   ;;  %p7119_p6 = scmp.ne.s32.totalorder %s7103_s21, 0 }
  0x7d   : > { %s3995_s6 = sshll.u32 %s5069_s26, 10  ;;  %s429_s13 = scalar_lea.sflag [#allocation4], %s5069_s26 }
  0x7e   : > { %s5073_s22 = scalar_lea.vmem [#allocation3], %s3995_s6 }
  0x7f   : > { %4768 = dma.done.wait (%p7119_p6), %s429_s13, 16384  }
  0x80   : > { %4770 = vsyncadd (%p7119_p6), %s429_s13, 4294950912  ;;  %s437_s0 = sand.u32 1, %s4904_s19   ;;  %s5080_s23 = scalar_lea.vmem [#allocation6], %s3995_s6 }
  0x81   : > { %s438_s10 = scalar_lea.sflag [#allocation7], %s437_s0 }
  0x82   : > { %4772 = dma.done.wait (%p7119_p6), %s438_s10, 16384  }
  0x83   : > { %4774 = vsyncadd (%p7119_p6), %s438_s10, 4294950912  ;;  %p7120_p13 = scmp.eq.s32.totalorder %s4904_s19, 0 }
  0x85   : > { %4776 = dma.done.wait (%p7120_p13), [#allocation7], 16384   ;;  %p7121_p0 = pmov %p7120_p13 }
  0x86   : > { %s5091_s20 = sshll.u32 %s4797_s16, 4  ;;  %v4814_v0 = vmov 0   ;;  %vm1660_vm0 = vcmask 1044480   ;;  %v4342_v1 = vld [vmem:[%s7056_s5 + $0x4] ss:$8 sps:$4 sm:$0x1f]  }
  0x87   : > { %4778 = vsyncadd (%p7121_p0), [#allocation7], 4294950912  ;;  %1699 = vmatprep.mubr.bf16.mxu0 %v4814_v0  ;;  %p506_p5 = scmp.lt.s32.totalorder %s5091_s20, 31  ;;  %v4344_v2 = vld [vmem:[%s7056_s5] ss:$8 sps:$4 sm:$0x1f]   ;;  %4006 = vmatprep.subr.msk.bf16.mxu0 %vm1660_vm0, %v4342_v1 }
  0x88   : > { %v1662_v9 = vsel %vm1660_vm0, %v4344_v2, 0  ;;  %vm1484_vm1 = vcmask 80896   ;;  %vm3767_vm2 = vcmask 7168   ;;  %vm1315_vm3 = vcmask 1040384   ;;  %s500_s11 = scalar_lea.vmem [#allocation9], %s5069_s26  ;;  %s7486_s24 = sld [smem:[#allocation138_spill]] }
  0x89   : > { %s507_s29 = scalar_select %p506_p5, %s5091_s20, 31  ;;  %1668 = vmatpush1.bf16.msra.mxu0 %v1662_v9 }
  0x8a   : > { %s3833_s12 = sshll.u32 %s500_s11, 4  ;;  %s3821_s28 = scalar_lea.sflag [#allocation5], %s5069_s26  ;;  %s7004_s12 = int_to_ptr.vmem [resolvable:$true] %s3833_s12 }
  0x8b   : > { %s5096_s30 = sshll.u32 %s507_s29, 3  ;;  %s4715_s6 = scalar_lea.vmem %s7004_s12, 16 }
  0x8c   : > { %s5102_s19 = scalar_lea.vmem %s7053_s2, %s5096_s30  ;;  %s5108_s25 = scalar_lea.vmem %s7054_s3, %s5096_s30 }
  0x8d   : > { %v5117_v3 = vld [vmem:[%s5102_s19] sm:$0xff]  ;;  %v5120_v4 = vld [vmem:[%s5102_s19 + $0x8] sm:$0xff]  ;;  %v5137_v16 = vld [vmem:[%s5102_s19 + $0x10] sm:$0xff]  ;;  %s5192_s0 = scalar_lea.vmem %s7055_s4, %s5096_s30  ;;  %s4815_s30 = smov 127  }
  0x8e   : > { %v1356_v5 = vld [vmem:[%s5108_s25] sm:$0xff]  ;;  %v1357_v6 = vld [vmem:[%s5108_s25 + $0x8] sm:$0xff]  ;;  %v5126_v7 = vmul.f32 %v5117_v3, %v5117_v3  ;;  %v5130_v8 = vmul.f32 %v5120_v4, %v5120_v4  ;;  %v1358_v19 = vld [vmem:[%s5108_s25 + $0x10] sm:$0xff]  ;;  %v5147_v21 = vmul.f32 %v5137_v16, %v5137_v16  ;;  %s7002_s27 = scalar_lea.hbm %s7486_s24, %s5091_s20  ;;  %p4716_p9 = scmp.ne.s32.totalorder %s7004_s12, %s4715_s6 }
  0x8f   : > { %v5132_v10 = vadd.f32 1.0, %v1356_v5  ;;  %v5134_v11 = vadd.f32 1.0, %v1357_v6  ;;  %v1436_v12 = vmul.f32 1.442695, %v1356_v5  ;;  %v1438_v13 = vmul.f32 1.442695, %v1357_v6 }
  0x90   : > { %v1526_v14 = vmul.f32 0.5, %v1356_v5  ;;  %v1527_v15 = vmul.f32 0.5, %v1357_v6  ;;  %v1359_v20 = vld [vmem:[%s5108_s25 + $0x18] sm:$0xff]  ;;  %v5152_v25 = vadd.f32 1.0, %v1358_v19  ;;  %v1440_v28 = vmul.f32 1.442695, %v1358_v19  ;;  %p4717_p1 = pnand %p4716_p9, %p4965_p10 }
  0x91   : > { %v1420_v17 = vsub.f32 %v5132_v10, %v5126_v7  ;;  %v1421_v18 = vsub.f32 %v5134_v11, %v5130_v8  ;;  %4553 = vpow2.f32 %v1436_v12  ;;  %v5150_v24 = vld [vmem:[%s5102_s19 + $0x18] sm:$0xff]  ;;  %v5154_v26 = vadd.f32 1.0, %v1359_v20  ;;  %v1360_v33 = vld [vmem:[%s5108_s25 + $0x20] sm:$0xff]  ;;  %v1361_v34 = vld [vmem:[%s5108_s25 + $0x28] sm:$0xff]  ;;  %s4817_s13 = smov [#allocation9]  }
  0x92   : > { %4555 = vpow2.f32 %v1438_v13  ;;  %v1542_v22 = vmul.f32 1.442695, %v1526_v14  ;;  %v1544_v23 = vmul.f32 1.442695, %v1527_v15  ;;  %v5158_v27 = vmul.f32 %v5150_v24, %v5150_v24  ;;  %v5167_v36 = vld [vmem:[%s5102_s19 + $0x20] sm:$0xff]  ;;  %v5174_v41 = vld [vmem:[%s5102_s19 + $0x28] sm:$0xff]  ;;  %p4718_p2 = pneg %p4717_p1 }
  0x93   : > { %v1442_v29 = vmul.f32 1.442695, %v1359_v20  ;;  %v1422_v30 = vsub.f32 %v5152_v25, %v5147_v21  ;;  %v1528_v31 = vmul.f32 0.5, %v1358_v19  ;;  %v1529_v32 = vmul.f32 0.5, %v1359_v20  ;;  %v1362_v49 = vld [vmem:[%s5108_s25 + $0x30] sm:$0xff]  ;;  %v1363_v50 = vld [vmem:[%s5108_s25 + $0x38] sm:$0xff] }
  0x94   : > { %4557 = vpow2.f32 %v1542_v22  ;;  %v1423_v35 = vsub.f32 %v5154_v26, %v5158_v27  ;;  %v5169_v37 = vadd.f32 1.0, %v1360_v33  ;;  %v5171_v38 = vadd.f32 1.0, %v1361_v34  ;;  %v5197_v52 = vld [vmem:[%s5102_s19 + $0x30] sm:$0xff]  ;;  %v5204_v57 = vld [vmem:[%s5102_s19 + $0x38] sm:$0xff]  ;;  %v1372_v1 = vld [vmem:[%s5192_s0] sm:$0xff] }
  0x95   : > { %4559 = vpow2.f32 %v1544_v23  ;;  %v1546_v39 = vmul.f32 1.442695, %v1528_v31  ;;  %v1548_v40 = vmul.f32 1.442695, %v1529_v32  ;;  %v5178_v42 = vmul.f32 %v5167_v36, %v5167_v36  ;;  %v1373_v7 = vld [vmem:[%s5192_s0 + $0x8] sm:$0xff]  ;;  %v5224_v13 = vld [vmem:[%s5108_s25 + $0x40] sm:$0xff] }
  0x96   : > { %4561 = vpow2.f32 %v1440_v28  ;;  %v5182_v43 = vmul.f32 %v5174_v41, %v5174_v41  ;;  %v1444_v44 = vmul.f32 1.442695, %v1360_v33  ;;  %v1446_v45 = vmul.f32 1.442695, %v1361_v34  ;;  %v1365_v22 = vld [vmem:[%s5108_s25 + $0x48] sm:$0xff]  ;;  %v1374_v31 = vld [vmem:[%s5192_s0 + $0x10] sm:$0xff] }
  0x97   : > { %4563 = vpow2.f32 %v1442_v29  ;;  %v1424_v46 = vsub.f32 %v5169_v37, %v5178_v42  ;;  %v1530_v47 = vmul.f32 0.5, %v1360_v33  ;;  %v1531_v48 = vmul.f32 0.5, %v1361_v34  ;;  %v1375_v32 = vld [vmem:[%s5192_s0 + $0x18] sm:$0xff]  ;;  %v5235_v33 = vld [vmem:[%s5102_s19 + $0x40] sm:$0xff] }
  0x98   : > { %4565 = vpow2.f32 %v1546_v39  ;;  %v1425_v51 = vsub.f32 %v5171_v38, %v5182_v43  ;;  %v5199_v53 = vadd.f32 1.0, %v1362_v49  ;;  %v5201_v54 = vadd.f32 1.0, %v1363_v50  ;;  %v4345_v25 = vld [vmem:[#allocation8 + $0x4] ss:$8 sps:$4 sm:$0xff]  }
  0x99   : > { %4567 = vpow2.f32 %v1548_v40  ;;  %v1550_v55 = vmul.f32 1.442695, %v1530_v47  ;;  %v1552_v56 = vmul.f32 1.442695, %v1531_v48  ;;  %v5208_v58 = vmul.f32 %v5197_v52, %v5197_v52  ;;  %2065 = vmatprep.subr.bf16.mxu1 %v4345_v25  ;;  %v4351_v42 = vld [vmem:[#allocation8 + $0x24] ss:$8 sps:$4 sm:$0xff]  }
  0x9a   : > { %4569 = vpow2.f32 %v1444_v44  ;;  %v5212_v60 = vmul.f32 %v5204_v57, %v5204_v57  ;;  %v1448_v61 = vmul.f32 1.442695, %v1362_v49  ;;  %v1450_v62 = vmul.f32 1.442695, %v1363_v50 }
  0x9b   : > { %v4554_v59 = vpop.eup %4553  ;;  %4571 = vpow2.f32 %v1446_v45  ;;  %v1426_v5 = vsub.f32 %v5199_v53, %v5208_v58  ;;  %v1532_v6 = vmul.f32 0.5, %v1362_v49  ;;  %v1533_v12 = vmul.f32 0.5, %v1363_v50  ;;  %v5244_v45 = vld [vmem:[%s5102_s19 + $0x48] sm:$0xff]  ;;  %v5292_v58 = vld [vmem:[%s5102_s19 + $0x50] sm:$0xff] }
  0x9c   : > { %v4556_v63 = vpop.eup %4555  ;;  %v1468_v2 = vsub.f32 %v1420_v17, %v4554_v59  ;;  %4573 = vpow2.f32 %v1550_v55  ;;  %v1427_v10 = vsub.f32 %v5201_v54, %v5212_v60  ;;  %v5228_v19 = vadd.f32 1.0, %v5224_v13 }
  0x9d   : > { %v1469_v9 = vsub.f32 %v1421_v18, %v4556_v63  ;;  %4575 = vpow2.f32 %v1552_v56  ;;  %v1554_v17 = vmul.f32 1.442695, %v1532_v6  ;;  %v1556_v20 = vmul.f32 1.442695, %v1533_v12 }
  0x9e   : > { %v4558_v14 = vpop.eup %4557  ;;  %v1485_v15 = vsel %vm1484_vm1, %v1468_v2, 0.0  ;;  %4577 = vpow2.f32 %v1448_v61  ;;  %v5237_v34 = vadd.f32 1.0, %v1365_v22  ;;  %v5248_v47 = vmul.f32 %v5235_v33, %v5235_v33 }
  0x9f   : > { %v4560_v8 = vpop.eup %4559  ;;  %v1486_v11 = vsel %vm1484_vm1, %v1469_v9, 0.0  ;;  %v1574_v18 = vmul.f32 %v4558_v14, %v1372_v1  ;;  %4579 = vpow2.f32 %v1450_v62  ;;  %v1452_v21 = vmul.f32 1.442695, %v5224_v13  ;;  %v4348_v1 = vld [vmem:[#allocation8 + $0x14] ss:$8 sps:$4 sm:$0xff]  }
  0xa0   : > { %v4562_v23 = vpop.eup %4561  ;;  %v1487_v28 = vadd.f32 %v1486_v11, %v1485_v15  ;;  %v1575_v29 = vmul.f32 %v4560_v8, %v1373_v7  ;;  %4581 = vpow2.f32 %v1554_v17  ;;  %v1454_v61 = vmul.f32 1.442695, %v1365_v22  ;;  %v1376_v7 = vld [vmem:[%s5192_s0 + $0x20] sm:$0xff]  ;;  %v4350_v14 = vld [vmem:[#allocation8 + $0x10] ss:$8 sps:$4 sm:$0xff]  }
  0xa1   : > { %v4564_v39 = vpop.eup %4563  ;;  %v1590_v40 = vadd.f32 %v1574_v18, %v5117_v3  ;;  %v1470_v44 = vsub.f32 %v1422_v30, %v4562_v23  ;;  %4583 = vpow2.f32 %v1556_v20  ;;  %v5256_v3 = vmul.f32 %v5244_v45, %v5244_v45  ;;  %v4347_v30 = vld [vmem:[#allocation8] ss:$8 sps:$4 sm:$0xff]  }
  0xa2   : > { %v4566_v48 = vpop.eup %4565  ;;  %v1591_v49 = vadd.f32 %v1575_v29, %v5120_v4  ;;  %v1471_v50 = vsub.f32 %v1423_v35, %v4564_v39  ;;  %v1428_v4 = vsub.f32 %v5228_v19, %v5248_v47  ;;  %4585 = vpow2.f32 %v1452_v21  ;;  %2066 = vmatpush1.bf16.msra.mxu1 %v4347_v30  ;;  %v1366_v29 = vld [vmem:[%s5108_s25 + $0x50] sm:$0xff] }
  0xa3   : > { %v4568_v55 = vpop.eup %4567  ;;  %v1488_v56 = vsel %vm1484_vm1, %v1470_v44, 0.0  ;;  %v1576_v59 = vmul.f32 %v4566_v48, %v1374_v31  ;;  %v1429_v12 = vsub.f32 %v5237_v34, %v5256_v3  ;;  %4587 = vpow2.f32 %v1454_v61  ;;  %2067 = vmatprep.subr.bf16.mxu1 %v4348_v1  ;;  %v1367_v31 = vld [vmem:[%s5108_s25 + $0x58] sm:$0xff]  ;;  %v559_v1 = vld [vmem:[%s5080_s23 + $0xf0] sm:$0xff] }
  0xa4   : > { %v4570_v62 = vpop.eup %4569  ;;  %v1606_v26 = vpack.c.bf16 %v1591_v49, %v1590_v40  ;;  %v1489_v27 = vadd.f32 %v1488_v56, %v1487_v28  ;;  %v1490_v35 = vsel %vm1484_vm1, %v1471_v50, 0.0  ;;  %v1577_v63 = vmul.f32 %v4568_v55, %v1375_v32  ;;  %v4353_v40 = vld [vmem:[#allocation8 + $0x20] ss:$8 sps:$4 sm:$0xff]   ;;  %v4354_v50 = vld [vmem:[#allocation8 + $0x34] ss:$8 sps:$4 sm:$0xff]  }
  0xa5   : > { %v4572_v2 = vpop.eup %4571  ;;  %v1592_v6 = vadd.f32 %v1576_v59, %v5137_v16  ;;  %v1472_v9 = vsub.f32 %v1424_v46, %v4570_v62  ;;  %v1377_v16 = vld [vmem:[%s5192_s0 + $0x28] sm:$0xff]  ;;  %v1534_v18 = vmul.f32 0.5, %v5224_v13  ;;  %v1535_v20 = vmul.f32 0.5, %v1365_v22  ;;  %v5301_v55 = vld [vmem:[%s5102_s19 + $0x58] sm:$0xff] }
  0xa6   : > { %v4574_v15 = vpop.eup %4573  ;;  %4007 = vmatmul.mubr.msk.bf16.vlgmr.msra.gmra.mrb[0].mxu0 %vm1484_vm1, %v1606_v26  ;;  %v1491_v17 = vadd.f32 %v1490_v35, %v1489_v27  ;;  %v1593_v8 = vadd.f32 %v1577_v63, %v5150_v24  ;;  %v1473_v37 = vsub.f32 %v1425_v51, %v4572_v2  ;;  %2068 = vmatpush1.bf16.msra.mxu1 %v4350_v14  ;;  %v5296_v25 = vadd.f32 1.0, %v1367_v31  ;;  %v4357_v62 = vld [vmem:[#allocation8 + $0x44] ss:$8 sps:$4 sm:$0xff]   ;;  %v1378_v27 = vld [vmem:[%s5192_s0 + $0x30] sm:$0xff]  ;;  %v1379_v35 = vld [vmem:[%s5192_s0 + $0x38] sm:$0xff] }
  0xa7   : > { %v4576_v46 = vpop.eup %4575  ;;  %1709 = vmatprep.mubr.bf16.mxu0 %v4814_v0  ;;  %v1492_v11 = vsel %vm1484_vm1, %v1472_v9, 0.0  ;;  %v1578_v38 = vmul.f32 %v4574_v15, %v1376_v7  ;;  %v1558_v51 = vmul.f32 1.442695, %v1534_v18  ;;  %v1560_v39 = vmul.f32 1.442695, %v1535_v20  ;;  %2069 = vmatprep.subr.bf16.mxu1 %v4351_v42  ;;  %v1368_v7 = vld [vmem:[%s5108_s25 + $0x60] sm:$0xff] }
  0xa8   : > { %v4578_v23 = vpop.eup %4577  ;;  %v1493_v28 = vadd.f32 %v1492_v11, %v1491_v17  ;;  %v1494_v24 = vsel %vm1484_vm1, %v1473_v37, 0.0  ;;  %v1607_v22 = vpack.c.bf16 %v1593_v8, %v1592_v6  ;;  %v1579_v48 = vmul.f32 %v4576_v46, %v1377_v16  ;;  %7124 = vst [vmem:[#allocation22_spill] sm:$0xff] %v5296_v25  ;;  %v4359_v15 = vld [vmem:[#allocation8 + $0x40] ss:$8 sps:$4 sm:$0xff]   ;;  %v4360_v19 = vld [vmem:[#allocation8 + $0x54] ss:$8 sps:$4 sm:$0xff]  }
  0xa9   : > { %v4580_v32 = vpop.eup %4579  ;;  %v1474_v43 = vsub.f32 %v1426_v5, %v4578_v23  ;;  %v5294_v5 = vadd.f32 1.0, %v1366_v29  ;;  %4589 = vpow2.f32 %v1558_v51  ;;  %v5305_v54 = vmul.f32 %v5292_v58, %v5292_v58  ;;  %v1369_v37 = vld [vmem:[%s5108_s25 + $0x68] sm:$0xff]  ;;  %v4362_v34 = vld [vmem:[#allocation8 + $0x50] ss:$8 sps:$4 sm:$0xff]   ;;  %v673_v63 = vld [vmem:[%s5073_s22 + $0x80] sm:$0xff] }
  0xaa   : > { %v4582_v13 = vpop.eup %4581  ;;  %v1495_v44 = vadd.f32 %v1494_v24, %v1493_v28  ;;  %v5288_v49 = vsub.f32 %v1427_v10, %v4580_v32  ;;  %4591 = vpow2.f32 %v1560_v39  ;;  %v5309_v60 = vmul.f32 %v5301_v55, %v5301_v55  ;;  %2070 = vmatpush1.bf16.msra.mxu1 %v4353_v40  ;;  %v4356_v10 = vld [vmem:[#allocation8 + $0x30] ss:$8 sps:$4 sm:$0xff]   ;;  %v1381_v11 = vld [vmem:[%s5192_s0 + $0x48] sm:$0xff] }
  0xab   : > { %v4584_v21 = vpop.eup %4583  ;;  %v1496_v53 = vsel %vm1484_vm1, %v1474_v43, 0.0  ;;  %7123 = vst [vmem:[#allocation21_spill] sm:$0xff] %v5294_v5  ;;  %7126 = vst [vmem:[#allocation24_spill] sm:$0xff] %v5305_v54  ;;  %v1594_v56 = vadd.f32 %v1578_v38, %v5167_v36  ;;  %v1595_v59 = vadd.f32 %v1579_v48, %v5174_v41  ;;  %v1536_v61 = vmul.f32 0.5, %v1366_v29  ;;  %2071 = vmatprep.subr.bf16.mxu1 %v4354_v50  ;;  %v4363_v18 = vld [vmem:[#allocation8 + $0x64] ss:$8 sps:$4 sm:$0xff]  }
  0xac   : > { %7122 = vst [vmem:[#allocation20_spill] sm:$0xff] %v5288_v49  ;;  %v5298_v30 = vadd.f32 %v1496_v53, %v1495_v44  ;;  %7127 = vst [vmem:[#allocation25_spill] sm:$0xff] %v5309_v60  ;;  %v4586_v26 = vpop.eup %4585  ;;  %v1537_v2 = vmul.f32 0.5, %v1367_v31  ;;  %v1580_v8 = vmul.f32 %v4582_v13, %v1378_v27  ;;  %v1581_v16 = vmul.f32 %v4584_v21, %v1379_v35  ;;  %v1370_v23 = vld [vmem:[%s5108_s25 + $0x70] sm:$0xff]  ;;  %v4365_v28 = vld [vmem:[#allocation8 + $0x60] ss:$8 sps:$4 sm:$0xff]  }
  0xad   : > { %v4588_v6 = vpop.eup %4587  ;;  %v5324_v36 = vsub.f32 %v1428_v4, %v4586_v26  ;;  %v1562_v41 = vmul.f32 1.442695, %v1536_v61  ;;  %v1608_v17 = vpack.c.bf16 %v1595_v59, %v1594_v56  ;;  %v1538_v47 = vmul.f32 0.5, %v1368_v7  ;;  %v1380_v4 = vld [vmem:[%s5192_s0 + $0x40] sm:$0xff]  ;;  %v1371_v29 = vld [vmem:[%s5108_s25 + $0x78] sm:$0xff]  ;;  %v1382_v40 = vld [vmem:[%s5192_s0 + $0x50] sm:$0xff] }
  0xae   : > { %7125 = vst [vmem:[#allocation23_spill] sm:$0xff] %v5298_v30  ;;  %4008 = vmatmul.mubr.msk.bf16.gmra.mrb[4].mxu0 %vm1484_vm1, %v1607_v22  ;;  %v5330_v9 = vsub.f32 %v1429_v12, %v4588_v6  ;;  %v1564_v14 = vmul.f32 1.442695, %v1537_v2  ;;  %2072 = vmatpush1.bf16.msra.mxu1 %v4356_v10  ;;  %v1539_v42 = vmul.f32 0.5, %v1369_v37  ;;  %v1596_v12 = vadd.f32 %v1580_v8, %v5197_v52  ;;  %v4366_v31 = vld [vmem:[#allocation8 + $0x74] ss:$8 sps:$4 sm:$0xff]  }
  0xaf   : > { %1719 = vmatprep.mubr.bf16.mxu0 %v4814_v0  ;;  %7128 = vst [vmem:[#allocation26_spill] sm:$0xff] %v5324_v36  ;;  %2073 = vmatprep.subr.bf16.mxu1 %v4357_v62  ;;  %4593 = vpow2.f32 %v1562_v41  ;;  %v1597_v46 = vadd.f32 %v1581_v16, %v5204_v57  ;;  %v1566_v24 = vmul.f32 1.442695, %v1538_v47  ;;  %v4368_v57 = vld [vmem:[#allocation8 + $0x70] ss:$8 sps:$4 sm:$0xff]   ;;  %v1540_v51 = vmul.f32 0.5, %v1370_v23 }
  0xb0   : > { %7129 = vst [vmem:[#allocation27_spill] sm:$0xff] %v5330_v9  ;;  %4595 = vpow2.f32 %v1564_v14  ;;  %v1568_v32 = vmul.f32 1.442695, %v1539_v42  ;;  %v4369_v39 = vld [vmem:[#allocation8 + $0x84] ss:$8 sps:$4 sm:$0xff]   ;;  %v1383_v13 = vld [vmem:[%s5192_s0 + $0x58] sm:$0xff] }
  0xb1   : > { %v1609_v38 = vpack.c.bf16 %v1597_v46, %v1596_v12  ;;  %4597 = vpow2.f32 %v1566_v24  ;;  %v1541_v22 = vmul.f32 0.5, %v1371_v29  ;;  %v4371_v53 = vld [vmem:[#allocation8 + $0x80] ss:$8 sps:$4 sm:$0xff]   ;;  %v1570_v10 = vmul.f32 1.442695, %v1540_v51  ;;  %v564_v9 = vld [vmem:[%s5080_s23 + $0x118] sm:$0xff] }
  0xb2   : > { %2074 = vmatpush1.bf16.msra.mxu1 %v4359_v15  ;;  %4599 = vpow2.f32 %v1568_v32  ;;  %v4372_v56 = vld [vmem:[#allocation8 + $0x94] ss:$8 sps:$4 sm:$0xff]   ;;  %v4374_v27 = vld [vmem:[#allocation8 + $0x90] ss:$8 sps:$4 sm:$0xff]   ;;  %v1385_v35 = vld [vmem:[%s5192_s0 + $0x68] sm:$0xff] }
  0xb3   : > { %v4590_v3 = vpop.eup %4589  ;;  %2075 = vmatprep.subr.bf16.mxu1 %v4360_v19  ;;  %v1572_v59 = vmul.f32 1.442695, %v1541_v22  ;;  %4601 = vpow2.f32 %v1570_v10  ;;  %v4377_v14 = vld [vmem:[#allocation8 + $0xa0] ss:$8 sps:$4 sm:$0xff]   ;;  %v4378_v15 = vld [vmem:[#allocation8 + $0xb4] ss:$8 sps:$4 sm:$0xff]  }
  0xb4   : > { %v4592_v20 = vpop.eup %4591  ;;  %v1582_v43 = vmul.f32 %v4590_v3, %v1380_v4  ;;  %v1353_v8 = vld [vmem:[%s5102_s19 + $0x68] sm:$0xff]  ;;  %v1386_v4 = vld [vmem:[%s5192_s0 + $0x70] sm:$0xff]  ;;  %v680_v36 = vld [vmem:[%s5073_s22 + $0xb8] sm:$0xff] }
  0xb5   : > { %v1583_v52 = vmul.f32 %v4592_v20, %v1381_v11  ;;  %4603 = vpow2.f32 %v1572_v59  ;;  %v4381_v47 = vld [vmem:[#allocation8 + $0xc4] ss:$8 sps:$4 sm:$0xff]   ;;  %v4383_v46 = vld [vmem:[#allocation8 + $0xc0] ss:$8 sps:$4 sm:$0xff]   ;;  %v1354_v11 = vld [vmem:[%s5102_s19 + $0x70] sm:$0xff] }
  0xb6   : > { %4009 = vmatmul.mubr.msk.bf16.gmra.mrb[8].mxu0 %vm1484_vm1, %v1608_v17  ;;  %2076 = vmatpush1.bf16.msra.mxu1 %v4362_v34  ;;  %v1598_v48 = vadd.f32 %v1582_v43, %v5235_v33  ;;  %v4375_v33 = vld [vmem:[#allocation8 + $0xa4] ss:$8 sps:$4 sm:$0xff]   ;;  %v4384_v32 = vld [vmem:[#allocation8 + $0xd4] ss:$8 sps:$4 sm:$0xff]   ;;  %v4392_v51 = vld [vmem:[#allocation8 + $0xf0] ss:$8 sps:$4 sm:$0xff]  }
  0xb7   : > { %1729 = vmatprep.mubr.bf16.mxu0 %v4814_v0  ;;  %2077 = vmatprep.subr.bf16.mxu1 %v4363_v18  ;;  %v1599_v50 = vadd.f32 %v1583_v52, %v5244_v45  ;;  %v1384_v45 = vld [vmem:[%s5192_s0 + $0x60] sm:$0xff]  ;;  %v1355_v18 = vld [vmem:[%s5102_s19 + $0x78] sm:$0xff]  ;;  %v683_v30 = vld [vmem:[%s5073_s22 + $0xd0] sm:$0xff] }
  0xb8   : > { %v1352_v17 = vld [vmem:[%s5102_s19 + $0x60] sm:$0xff]  ;;  %v4410_v10 = vld [vmem:[#allocation8 + $0x154] ss:$8 sps:$4 sm:$0xff]   ;;  %v574_v49 = vld [vmem:[%s5080_s23 + $0x168] sm:$0xff] }
  0xb9   : > { %v4594_v44 = vpop.eup %4593  ;;  %v1610_v61 = vpack.c.bf16 %v1599_v50, %v1598_v48  ;;  %v4387_v43 = vld [vmem:[#allocation8 + $0xe4] ss:$8 sps:$4 sm:$0xff]   ;;  %v4389_v52 = vld [vmem:[#allocation8 + $0xe0] ss:$8 sps:$4 sm:$0xff]   ;;  %v4404_v48 = vld [vmem:[#allocation8 + $0x134] ss:$8 sps:$4 sm:$0xff]  }
  0xba   : > { %2078 = vmatpush1.bf16.msra.mxu1 %v4365_v28  ;;  %v4596_v21 = vpop.eup %4595  ;;  %v1584_v62 = vmul.f32 %v4594_v44, %v1382_v40  ;;  %v4395_v40 = vld [vmem:[#allocation8 + $0x104] ss:$8 sps:$4 sm:$0xff]   ;;  %v4399_v44 = vld [vmem:[#allocation8 + $0x120] ss:$8 sps:$4 sm:$0xff]   ;;  %v4402_v50 = vld [vmem:[#allocation8 + $0x130] ss:$8 sps:$4 sm:$0xff]  }
  0xbb   : > { %2079 = vmatprep.subr.bf16.mxu1 %v4366_v31  ;;  %v1585_v26 = vmul.f32 %v4596_v21, %v1383_v13  ;;  %v4598_v2 = vpop.eup %4597  ;;  %v4398_v13 = vld [vmem:[#allocation8 + $0x114] ss:$8 sps:$4 sm:$0xff]   ;;  %2464 = vmatprep.subr.bf16.mxu0 %v4395_v40  ;;  %v4401_v22 = vld [vmem:[#allocation8 + $0x124] ss:$8 sps:$4 sm:$0xff]  }
  0xbc   : > { %v1600_v6 = vadd.f32 %v1584_v62, %v5292_v58  ;;  %v4600_v7 = vpop.eup %4599  ;;  %v1586_v37 = vmul.f32 %v4598_v2, %v1384_v45  ;;  %v4380_v58 = vld [vmem:[#allocation8 + $0xb0] ss:$8 sps:$4 sm:$0xff]   ;;  %v4407_v21 = vld [vmem:[#allocation8 + $0x144] ss:$8 sps:$4 sm:$0xff]   ;;  %v4416_v62 = vld [vmem:[#allocation8 + $0x174] ss:$8 sps:$4 sm:$0xff]  }
  0xbd   : > { %v1601_v41 = vadd.f32 %v1585_v26, %v5301_v55  ;;  %v1587_v19 = vmul.f32 %v4600_v7, %v1385_v35  ;;  %v1387_v55 = vld [vmem:[%s5192_s0 + $0x78] sm:$0xff]  ;;  %v4602_v42 = vpop.eup %4601  ;;  %v4413_v59 = vld [vmem:[#allocation8 + $0x164] ss:$8 sps:$4 sm:$0xff]   ;;  %s4719_s0 = sshll.u32 %s4817_s13, 4  ;;  %s4720_s0 = int_to_ptr.vmem [resolvable:$false] %s4719_s0 }
  0xbe   : > { %4010 = vmatmul.mubr.msk.bf16.gmra.mrb[12].mxu0 %vm1484_vm1, %v1609_v38  ;;  %2080 = vmatpush1.bf16.msra.mxu1 %v4368_v57  ;;  %v1602_v34 = vadd.f32 %v1586_v37, %v1352_v17  ;;  %v1588_v23 = vmul.f32 %v4602_v42, %v1386_v4  ;;  %v4386_v38 = vld [vmem:[#allocation8 + $0xd0] ss:$8 sps:$4 sm:$0xff]   ;;  %v4390_v57 = vld [vmem:[#allocation8 + $0xf4] ss:$8 sps:$4 sm:$0xff]   ;;  %v4425_v2 = vld [vmem:[#allocation8 + $0x1a4] ss:$8 sps:$4 sm:$0xff]   ;;  %p4722_p7 = scmp.lt.s32.totalorder %s7004_s12, %s4720_s0 }
  0xbf   : > { %1739 = vmatprep.mubr.bf16.mxu0 %v4814_v0  ;;  %2081 = vmatprep.subr.bf16.mxu1 %v4369_v39  ;;  %v1611_v16 = vpack.c.bf16 %v1601_v41, %v1600_v6  ;;  %v1603_v3 = vadd.f32 %v1587_v19, %v1353_v8  ;;  %v4604_v12 = vpop.eup %4603  ;;  %v4393_v39 = vld [vmem:[#allocation8 + $0x100] ss:$8 sps:$4 sm:$0xff]   ;;  %v4414_v26 = vld [vmem:[#allocation8 + $0x170] ss:$8 sps:$4 sm:$0xff]   ;;  %v4422_v45 = vld [vmem:[#allocation8 + $0x194] ss:$8 sps:$4 sm:$0xff]  }
  0xc0   : > { %v1589_v28 = vmul.f32 %v4604_v12, %v1387_v55  ;;  %v1604_v24 = vadd.f32 %v1588_v23, %v1354_v11  ;;  %2465 = vmatpush1.bf16.msra.mxu0 %v4393_v39  ;;  %v4420_v35 = vld [vmem:[#allocation8 + $0x190] ss:$8 sps:$4 sm:$0xff]   ;;  %v4423_v6 = vld [vmem:[#allocation8 + $0x1a0] ss:$8 sps:$4 sm:$0xff]   ;;  %v4428_v41 = vld [vmem:[#allocation8 + $0x1b4] ss:$8 sps:$4 sm:$0xff]  }
  0xc1   : > { %v1612_v20 = vpack.c.bf16 %v1603_v3, %v1602_v34  ;;  %2466 = vmatprep.subr.bf16.mxu0 %v4398_v13  ;;  %v4426_v7 = vld [vmem:[#allocation8 + $0x1b0] ss:$8 sps:$4 sm:$0xff]   ;;  %v4429_v17 = vld [vmem:[#allocation8 + $0x1c0] ss:$8 sps:$4 sm:$0xff]   ;;  %s4721_s10 = scalar_lea.vmem %s4720_s0, 32 }
  0xc2   : > { %2082 = vmatpush1.bf16.msra.mxu1 %v4371_v53  ;;  %v1605_v29 = vadd.f32 %v1589_v28, %v1355_v18  ;;  %v4405_v53 = vld [vmem:[#allocation8 + $0x140] ss:$8 sps:$4 sm:$0xff]   ;;  %v572_v5 = vld [vmem:[%s5080_s23 + $0x158] sm:$0xff]  ;;  %p4723_p4 = scmp.lt.s32.totalorder %s4721_s10, %s4715_s6 }
  0xc3   : > { %2083 = vmatprep.subr.bf16.mxu1 %v4372_v56  ;;  %v4408_v56 = vld [vmem:[#allocation8 + $0x150] ss:$8 sps:$4 sm:$0xff]   ;;  %v1616_v37 = vld [vmem:[%s7058_s7] sm:$0x3] }
  0xc4   : > { %v1613_v31 = vpack.c.bf16 %v1605_v29, %v1604_v24  ;;  %p4724_p8 = por %p4723_p4, %p4722_p7 }
  0xc6   : > { %4011 = vmatmul.mubr.msk.bf16.gmra.mrb[16].mxu0 %vm1484_vm1, %v1610_v61  ;;  %2084 = vmatpush1.bf16.msra.mxu1 %v4374_v27  ;;  %v4411_v61 = vld [vmem:[#allocation8 + $0x160] ss:$8 sps:$4 sm:$0xff]   ;;  %v4419_v27 = vld [vmem:[#allocation8 + $0x184] ss:$8 sps:$4 sm:$0xff]   ;;  %p4725_p12 = pnand %p4724_p8, %p4718_p2 }
  0xc7   : > { %1749 = vmatprep.mubr.bf16.mxu0 %v4814_v0  ;;  %2085 = vmatprep.subr.bf16.mxu1 %v4375_v33  ;;  %v4417_v33 = vld [vmem:[#allocation8 + $0x180] ss:$8 sps:$4 sm:$0xff]  }
  0xca   : > { %2086 = vmatpush1.bf16.msra.mxu1 %v4377_v14  ;;  %v7073_v14 = vlaneseq }
  0xcb   : > { %2087 = vmatprep.subr.bf16.mxu1 %v4378_v15  ;;  %v4431_v15 = vld [vmem:[#allocation8 + $0x1c4] ss:$8 sps:$4 sm:$0xff]  }
  0xcc   : > { %v5365_v8 = vshrl.u32 %v7073_v14, 7  ;;  %v558_v14 = vld [vmem:[%s5080_s23 + $0xe8] sm:$0xff] }
  0xce   : > { %4012 = vmatmul.mubr.msk.bf16.gmra.mrb[20].mxu0 %vm1484_vm1, %v1611_v16  ;;  %2088 = vmatpush1.bf16.msra.mxu1 %v4380_v58  ;;  %7130 = vst [vmem:[#allocation28_spill] sm:$0xff] %v5365_v8  ;;  %v5368_v16 = vsub.s32 0, %v5365_v8  ;;  %v5374_v19 = vsub.s32 1, %v5365_v8 }
  0xcf   : > { %1759 = vmatprep.mubr.bf16.mxu0 %v4814_v0  ;;  %2089 = vmatprep.subr.bf16.mxu1 %v4381_v47 }
  0xd0   : > { %7131 = vst [vmem:[#allocation29_spill] sm:$0xff] %v5368_v16  ;;  %7132 = vst [vmem:[#allocation30_spill] sm:$0xff] %v5374_v19  ;;  %v5377_v58 = vrot.slane %v1616_v37, %v5368_v16  ;;  %v5380_v47 = vrot.slane %v1616_v37, %v5374_v19 }
  0xd2   : > { %2090 = vmatpush1.bf16.msra.mxu1 %v4383_v46 }
  0xd3   : > { %2091 = vmatprep.subr.bf16.mxu1 %v4384_v32 }
  0xd6   : > { %4013 = vmatmul.mubr.msk.bf16.gmra.mrb[24].mxu0 %vm1484_vm1, %v1612_v20  ;;  %2092 = vmatpush1.bf16.msra.mxu1 %v4386_v38 }
  0xd7   : > { %1769 = vmatprep.mubr.bf16.mxu0 %v4814_v0  ;;  %2093 = vmatprep.subr.bf16.mxu1 %v4387_v43  ;;  %v4396_v0 = vld [vmem:[#allocation8 + $0x110] ss:$8 sps:$4 sm:$0xff]  }
  0xd8   : > { %2467 = vmatpush1.bf16.msra.mxu0 %v4396_v0 }
  0xd9   : > { %2468 = vmatprep.subr.bf16.mxu0 %v4401_v22 }
  0xda   : > { %2094 = vmatpush1.bf16.msra.mxu1 %v4389_v52 }
  0xdb   : > { %2095 = vmatprep.subr.bf16.mxu1 %v4390_v57 }
  0xdc   : > { %2469 = vmatpush1.bf16.msra.mxu0 %v4399_v44 }
  0xdd   : > { %2470 = vmatprep.subr.bf16.mxu0 %v4404_v48 }
  0xde   : > { %4014 = vmatmul.mubr.msk.bf16.gmra.mrb[28].mxu0 %vm1484_vm1, %v1613_v31  ;;  %2096 = vmatpush1.bf16.msra.mxu1 %v4392_v51 }
  0xe0   : > { %2471 = vmatpush1.bf16.msra.mxu0 %v4402_v50 }
  0xe1   : > { %2472 = vmatprep.subr.bf16.mxu0 %v4407_v21 }
  0xe4   : > { %2473 = vmatpush1.bf16.msra.mxu0 %v4405_v53 }
  0xe5   : > { %2474 = vmatprep.subr.bf16.mxu0 %v4410_v10 }
  0xe8   : > { %2475 = vmatpush1.bf16.msra.mxu0 %v4408_v56 }
  0xe9   : > { %2476 = vmatprep.subr.bf16.mxu0 %v4413_v59 }
  0xec   : > { %2477 = vmatpush1.bf16.msra.mxu0 %v4411_v61 }
  0xed   : > { %2478 = vmatprep.subr.bf16.mxu0 %v4416_v62 }
  0xf0   : > { %2479 = vmatpush1.bf16.msra.mxu0 %v4414_v26 }
  0xf1   : > { %2480 = vmatprep.subr.bf16.mxu0 %v4419_v27 }
  0xf4   : > { %2481 = vmatpush1.bf16.msra.mxu0 %v4417_v33 }
  0xf5   : > { %2482 = vmatprep.subr.bf16.mxu0 %v4422_v45 }
  0xf8   : > { %2483 = vmatpush1.bf16.msra.mxu0 %v4420_v35 }
  0xf9   : > { %2484 = vmatprep.subr.bf16.mxu0 %v4425_v2 }
  0xfc   : > { %2485 = vmatpush1.bf16.msra.mxu0 %v4423_v6 }
  0xfd   : > { %2486 = vmatprep.subr.bf16.mxu0 %v4428_v41 }
 0x100   : > { %2487 = vmatpush1.bf16.msra.mxu0 %v4426_v7 }
 0x101   : > { %2488 = vmatprep.subr.bf16.mxu0 %v4431_v15 }
 0x104   : > { %2489 = vmatpush1.bf16.msra.mxu0 %v4429_v17 }
 0x179   : > { %v1701_v4 = vpop.f32.mrb[0].mxu0 }
 0x17a   : > { %v1702_v55 = vadd.f32 %v1701_v4, %v5377_v58  ;;  %v1703_v42 = vpop.f32.mrb[1].mxu0 }
 0x17b   : > { %v1704_v34 = vadd.f32 %v1703_v42, %v5380_v47  ;;  %v1705_v3 = vpop.f32.mrb[2].mxu0 }
 0x17c   : > { %v1780_v12 = vmul.f32 0.2, %v1702_v55  ;;  %v1706_v46 = vadd.f32 %v1705_v3, %v5377_v58  ;;  %v1707_v11 = vpop.f32.mrb[3].mxu0 }
 0x17d   : > { %v1781_v18 = vmul.f32 0.2, %v1704_v34  ;;  %v1708_v20 = vadd.f32 %v1707_v11, %v5380_v47 }
 0x17e   : > { %v1782_v23 = vmul.f32 0.2, %v1706_v46  ;;  %v1812_v24 = vmax.f32 %v1702_v55, %v1780_v12 }
 0x17f   : > { %v1783_v28 = vmul.f32 0.2, %v1708_v20  ;;  %v1813_v32 = vmax.f32 %v1704_v34, %v1781_v18 }
 0x180   : > { %v1814_v29 = vmax.f32 %v1706_v46, %v1782_v23 }
 0x181   : > { %v1711_v31 = vpop.f32.mrb[4].mxu0  ;;  %v1815_v38 = vmax.f32 %v1708_v20, %v1783_v28 }
 0x182   : > { %v1712_v43 = vadd.f32 %v1711_v31, %v5377_v58  ;;  %v1713_v52 = vpop.f32.mrb[5].mxu0  ;;  %v1844_v57 = vpack.c.bf16 %v1814_v29, %v1812_v24 }
 0x183   : > { %v1714_v51 = vadd.f32 %v1713_v52, %v5380_v47  ;;  %v1715_v39 = vpop.f32.mrb[6].mxu0  ;;  %v1845_v40 = vpack.c.bf16 %v1815_v38, %v1813_v32 }
 0x184   : > { %v1784_v13 = vmul.f32 0.2, %v1712_v43  ;;  %v1716_v0 = vadd.f32 %v1715_v39, %v5377_v58  ;;  %v1717_v22 = vpop.f32.mrb[7].mxu0 }
 0x185   : > { %v1785_v44 = vmul.f32 0.2, %v1714_v51  ;;  %v1718_v48 = vadd.f32 %v1717_v22, %v5380_v47  ;;  %2097 = vmatprep.mubr.bf16.mxu1 %v1845_v40 }
 0x186   : > { %v1786_v50 = vmul.f32 0.2, %v1716_v0  ;;  %2098 = vmatmul.mubr.bf16.vlgmr.msra.gmra.mrb[0].mxu1 %v1844_v57  ;;  %v1816_v53 = vmax.f32 %v1712_v43, %v1784_v13 }
 0x187   : > { %v1787_v21 = vmul.f32 0.2, %v1718_v48  ;;  %v1817_v56 = vmax.f32 %v1714_v51, %v1785_v44 }
 0x188   : > { %v1818_v10 = vmax.f32 %v1716_v0, %v1786_v50 }
 0x189   : > { %v1819_v59 = vmax.f32 %v1718_v48, %v1787_v21  ;;  %v1721_v61 = vpop.f32.mrb[8].mxu0 }
 0x18a   : > { %v1722_v62 = vadd.f32 %v1721_v61, %v5377_v58  ;;  %v1723_v26 = vpop.f32.mrb[9].mxu0  ;;  %v1846_v27 = vpack.c.bf16 %v1818_v10, %v1816_v53 }
 0x18b   : > { %v1724_v33 = vadd.f32 %v1723_v26, %v5380_v47  ;;  %v1725_v45 = vpop.f32.mrb[10].mxu0  ;;  %v1847_v35 = vpack.c.bf16 %v1819_v59, %v1817_v56 }
 0x18c   : > { %v1788_v2 = vmul.f32 0.2, %v1722_v62  ;;  %v1726_v6 = vadd.f32 %v1725_v45, %v5377_v58  ;;  %v1727_v41 = vpop.f32.mrb[11].mxu0 }
 0x18d   : > { %v1789_v7 = vmul.f32 0.2, %v1724_v33  ;;  %v1728_v15 = vadd.f32 %v1727_v41, %v5380_v47  ;;  %2107 = vmatprep.mubr.bf16.mxu1 %v1847_v35 }
 0x18e   : > { %v1790_v17 = vmul.f32 0.2, %v1726_v6  ;;  %2108 = vmatmul.mubr.bf16.gmra.mrb[4].mxu1 %v1846_v27  ;;  %v1820_v4 = vmax.f32 %v1722_v62, %v1788_v2 }
 0x18f   : > { %v1791_v37 = vmul.f32 0.2, %v1728_v15  ;;  %v1821_v42 = vmax.f32 %v1724_v33, %v1789_v7 }
 0x190   : > { %v1822_v55 = vmax.f32 %v1726_v6, %v1790_v17 }
 0x191   : > { %v1823_v34 = vmax.f32 %v1728_v15, %v1791_v37  ;;  %v1731_v3 = vpop.f32.mrb[12].mxu0 }
 0x192   : > { %v1732_v12 = vadd.f32 %v1731_v3, %v5377_v58  ;;  %v1733_v46 = vpop.f32.mrb[13].mxu0  ;;  %v1848_v11 = vpack.c.bf16 %v1822_v55, %v1820_v4 }
 0x193   : > { %v1734_v18 = vadd.f32 %v1733_v46, %v5380_v47  ;;  %v1735_v20 = vpop.f32.mrb[14].mxu0  ;;  %v1849_v23 = vpack.c.bf16 %v1823_v34, %v1821_v42 }
 0x194   : > { %v1792_v28 = vmul.f32 0.2, %v1732_v12  ;;  %v1736_v24 = vadd.f32 %v1735_v20, %v5377_v58  ;;  %v1737_v29 = vpop.f32.mrb[15].mxu0 }
 0x195   : > { %v1793_v31 = vmul.f32 0.2, %v1734_v18  ;;  %v1738_v32 = vadd.f32 %v1737_v29, %v5380_v47  ;;  %2117 = vmatprep.mubr.bf16.mxu1 %v1849_v23 }
 0x196   : > { %v1794_v38 = vmul.f32 0.2, %v1736_v24  ;;  %2118 = vmatmul.mubr.bf16.gmra.mrb[8].mxu1 %v1848_v11  ;;  %v1824_v52 = vmax.f32 %v1732_v12, %v1792_v28 }
 0x197   : > { %v1795_v43 = vmul.f32 0.2, %v1738_v32  ;;  %v1825_v51 = vmax.f32 %v1734_v18, %v1793_v31 }
 0x198   : > { %v1826_v57 = vmax.f32 %v1736_v24, %v1794_v38 }
 0x199   : > { %v1827_v39 = vmax.f32 %v1738_v32, %v1795_v43  ;;  %v1741_v40 = vpop.f32.mrb[16].mxu0 }
 0x19a   : > { %v1742_v13 = vadd.f32 %v1741_v40, %v5377_v58  ;;  %v1743_v0 = vpop.f32.mrb[17].mxu0  ;;  %v1850_v22 = vpack.c.bf16 %v1826_v57, %v1824_v52 }
 0x19b   : > { %v1744_v44 = vadd.f32 %v1743_v0, %v5380_v47  ;;  %v1745_v48 = vpop.f32.mrb[18].mxu0  ;;  %v1851_v50 = vpack.c.bf16 %v1827_v39, %v1825_v51 }
 0x19c   : > { %v1796_v21 = vmul.f32 0.2, %v1742_v13  ;;  %v1746_v53 = vadd.f32 %v1745_v48, %v5377_v58  ;;  %v1747_v10 = vpop.f32.mrb[19].mxu0 }
 0x19d   : > { %v1797_v56 = vmul.f32 0.2, %v1744_v44  ;;  %v1748_v59 = vadd.f32 %v1747_v10, %v5380_v47  ;;  %2127 = vmatprep.mubr.bf16.mxu1 %v1851_v50 }
 0x19e   : > { %v1798_v61 = vmul.f32 0.2, %v1746_v53  ;;  %2128 = vmatmul.mubr.bf16.gmra.mrb[12].mxu1 %v1850_v22  ;;  %v1828_v26 = vmax.f32 %v1742_v13, %v1796_v21 }
 0x19f   : > { %v1799_v62 = vmul.f32 0.2, %v1748_v59  ;;  %v1829_v33 = vmax.f32 %v1744_v44, %v1797_v56 }
 0x1a0   : > { %v1830_v27 = vmax.f32 %v1746_v53, %v1798_v61 }
 0x1a1   : > { %v1831_v45 = vmax.f32 %v1748_v59, %v1799_v62  ;;  %v1751_v35 = vpop.f32.mrb[20].mxu0 }
 0x1a2   : > { %v1752_v2 = vadd.f32 %v1751_v35, %v5377_v58  ;;  %v1753_v6 = vpop.f32.mrb[21].mxu0  ;;  %v1852_v41 = vpack.c.bf16 %v1830_v27, %v1828_v26 }
 0x1a3   : > { %v1754_v7 = vadd.f32 %v1753_v6, %v5380_v47  ;;  %v1755_v15 = vpop.f32.mrb[22].mxu0  ;;  %v1853_v17 = vpack.c.bf16 %v1831_v45, %v1829_v33 }
 0x1a4   : > { %v1800_v37 = vmul.f32 0.2, %v1752_v2  ;;  %v1756_v4 = vadd.f32 %v1755_v15, %v5377_v58  ;;  %v1757_v55 = vpop.f32.mrb[23].mxu0 }
 0x1a5   : > { %v1801_v42 = vmul.f32 0.2, %v1754_v7  ;;  %v1758_v34 = vadd.f32 %v1757_v55, %v5380_v47  ;;  %2137 = vmatprep.mubr.bf16.mxu1 %v1853_v17  ;;  %v4432_v55 = vld [vmem:[#allocation8 + $0x1d0] ss:$8 sps:$4 sm:$0xff]  }
 0x1a6   : > { %v1802_v3 = vmul.f32 0.2, %v1756_v4  ;;  %2138 = vmatmul.mubr.bf16.gmra.mrb[16].mxu1 %v1852_v41  ;;  %v1832_v46 = vmax.f32 %v1752_v2, %v1800_v37 }
 0x1a7   : > { %v1803_v12 = vmul.f32 0.2, %v1758_v34  ;;  %v1833_v18 = vmax.f32 %v1754_v7, %v1801_v42  ;;  %v4435_v42 = vld [vmem:[#allocation8 + $0x1e0] ss:$8 sps:$4 sm:$0xff]  }
 0x1a8   : > { %v1834_v11 = vmax.f32 %v1756_v4, %v1802_v3  ;;  %v4434_v4 = vld [vmem:[#allocation8 + $0x1d4] ss:$8 sps:$4 sm:$0xff]   ;;  %v4441_v3 = vld [vmem:[#allocation8 + $0x200] ss:$8 sps:$4 sm:$0xff]  }
 0x1a9   : > { %v1835_v20 = vmax.f32 %v1758_v34, %v1803_v12  ;;  %v1761_v23 = vpop.f32.mrb[24].mxu0  ;;  %2490 = vmatprep.subr.bf16.mxu0 %v4434_v4  ;;  %v4438_v34 = vld [vmem:[#allocation8 + $0x1f0] ss:$8 sps:$4 sm:$0xff]   ;;  %v4443_v12 = vld [vmem:[#allocation8 + $0x204] ss:$8 sps:$4 sm:$0xff]  }
 0x1aa   : > { %v1762_v28 = vadd.f32 %v1761_v23, %v5377_v58  ;;  %v1763_v24 = vpop.f32.mrb[25].mxu0  ;;  %v1854_v29 = vpack.c.bf16 %v1834_v11, %v1832_v46  ;;  %2491 = vmatpush1.bf16.msra.mxu0 %v4432_v55  ;;  %v4446_v46 = vld [vmem:[#allocation8 + $0x214] ss:$8 sps:$4 sm:$0xff]   ;;  %2863 = vmatprep.subr.bf16.mxu1 %v4443_v12  ;;  %v4444_v11 = vld [vmem:[#allocation8 + $0x210] ss:$8 sps:$4 sm:$0xff]  }
 0x1ab   : > { %v1764_v31 = vadd.f32 %v1763_v24, %v5380_v47  ;;  %v1765_v32 = vpop.f32.mrb[26].mxu0  ;;  %v1855_v38 = vpack.c.bf16 %v1835_v20, %v1833_v18  ;;  %2864 = vmatpush1.bf16.msra.mxu1 %v4441_v3  ;;  %v4449_v18 = vld [vmem:[#allocation8 + $0x224] ss:$8 sps:$4 sm:$0xff]   ;;  %v4447_v20 = vld [vmem:[#allocation8 + $0x220] ss:$8 sps:$4 sm:$0xff]  }
 0x1ac   : > { %v1804_v43 = vmul.f32 0.2, %v1762_v28  ;;  %v1766_v52 = vadd.f32 %v1765_v32, %v5377_v58  ;;  %v1767_v57 = vpop.f32.mrb[27].mxu0  ;;  %2865 = vmatprep.subr.bf16.mxu1 %v4446_v46  ;;  %v4452_v23 = vld [vmem:[#allocation8 + $0x234] ss:$8 sps:$4 sm:$0xff]  }
 0x1ad   : > { %v1805_v51 = vmul.f32 0.2, %v1764_v31  ;;  %v1768_v39 = vadd.f32 %v1767_v57, %v5380_v47  ;;  %2147 = vmatprep.mubr.bf16.mxu1 %v1855_v38  ;;  %v4455_v24 = vld [vmem:[#allocation8 + $0x244] ss:$8 sps:$4 sm:$0xff]   ;;  %v4456_v32 = vld [vmem:[#allocation8 + $0x250] ss:$8 sps:$4 sm:$0xff]  }
 0x1ae   : > { %v1806_v40 = vmul.f32 0.2, %v1766_v52  ;;  %2148 = vmatmul.mubr.bf16.gmra.mrb[20].mxu1 %v1854_v29  ;;  %v1836_v0 = vmax.f32 %v1762_v28, %v1804_v43  ;;  %v4450_v28 = vld [vmem:[#allocation8 + $0x230] ss:$8 sps:$4 sm:$0xff]   ;;  %v4453_v29 = vld [vmem:[#allocation8 + $0x240] ss:$8 sps:$4 sm:$0xff]  }
 0x1af   : > { %v1807_v13 = vmul.f32 0.2, %v1768_v39  ;;  %v1837_v44 = vmax.f32 %v1764_v31, %v1805_v51  ;;  %2866 = vmatpush1.bf16.msra.mxu1 %v4444_v11  ;;  %v4458_v31 = vld [vmem:[#allocation8 + $0x254] ss:$8 sps:$4 sm:$0xff]   ;;  %v4461_v38 = vld [vmem:[#allocation8 + $0x264] ss:$8 sps:$4 sm:$0xff]  }
 0x1b0   : > { %v1838_v22 = vmax.f32 %v1766_v52, %v1806_v40  ;;  %2867 = vmatprep.subr.bf16.mxu1 %v4449_v18  ;;  %v4459_v43 = vld [vmem:[#allocation8 + $0x260] ss:$8 sps:$4 sm:$0xff]   ;;  %v4464_v52 = vld [vmem:[#allocation8 + $0x274] ss:$8 sps:$4 sm:$0xff]   ;;  %v4462_v57 = vld [vmem:[#allocation8 + $0x270] ss:$8 sps:$4 sm:$0xff]  }
 0x1b1   : > { %v1839_v48 = vmax.f32 %v1768_v39, %v1807_v13  ;;  %v1771_v50 = vpop.f32.mrb[28].mxu0  ;;  %v4467_v51 = vld [vmem:[#allocation8 + $0x284] ss:$8 sps:$4 sm:$0xff]   ;;  %v4465_v39 = vld [vmem:[#allocation8 + $0x280] ss:$8 sps:$4 sm:$0xff]  }
 0x1b2   : > { %v1772_v21 = vadd.f32 %v1771_v50, %v5377_v58  ;;  %v1773_v53 = vpop.f32.mrb[29].mxu0  ;;  %v1856_v10 = vpack.c.bf16 %v1838_v22, %v1836_v0  ;;  %v4470_v40 = vld [vmem:[#allocation8 + $0x294] ss:$8 sps:$4 sm:$0xff]   ;;  %v4468_v13 = vld [vmem:[#allocation8 + $0x290] ss:$8 sps:$4 sm:$0xff]  }
 0x1b3   : > { %v1774_v56 = vadd.f32 %v1773_v53, %v5380_v47  ;;  %v1775_v59 = vpop.f32.mrb[30].mxu0  ;;  %v1857_v61 = vpack.c.bf16 %v1839_v48, %v1837_v44  ;;  %2868 = vmatpush1.bf16.msra.mxu1 %v4447_v20  ;;  %v4473_v0 = vld [vmem:[#allocation8 + $0x2a4] ss:$8 sps:$4 sm:$0xff]   ;;  %v4471_v22 = vld [vmem:[#allocation8 + $0x2a0] ss:$8 sps:$4 sm:$0xff]  }
 0x1b4   : > { %v1808_v62 = vmul.f32 0.2, %v1772_v21  ;;  %v1776_v26 = vadd.f32 %v1775_v59, %v5377_v58  ;;  %v1777_v27 = vpop.f32.mrb[31].mxu0  ;;  %v4437_v58 = vld [vmem:[#allocation8 + $0x1e4] ss:$8 sps:$4 sm:$0xff]   ;;  %2869 = vmatprep.subr.bf16.mxu1 %v4452_v23 }
 0x1b5   : > { %v1809_v33 = vmul.f32 0.2, %v1774_v56  ;;  %v1778_v45 = vadd.f32 %v1777_v27, %v5380_v47  ;;  %2157 = vmatprep.mubr.bf16.mxu1 %v1857_v61  ;;  %2492 = vmatprep.subr.bf16.mxu0 %v4437_v58  ;;  %v4440_v47 = vld [vmem:[#allocation8 + $0x1f4] ss:$8 sps:$4 sm:$0xff]   ;;  %v4474_v48 = vld [vmem:[#allocation8 + $0x2b0] ss:$8 sps:$4 sm:$0xff]  }
 0x1b6   : > { %v1810_v35 = vmul.f32 0.2, %v1776_v26  ;;  %2158 = vmatmul.mubr.bf16.gmra.mrb[24].mxu1 %v1856_v10  ;;  %v1840_v6 = vmax.f32 %v1772_v21, %v1808_v62  ;;  %2493 = vmatpush1.bf16.msra.mxu0 %v4435_v42  ;;  %v4476_v44 = vld [vmem:[#allocation8 + $0x2b4] ss:$8 sps:$4 sm:$0xff]   ;;  %v4479_v50 = vld [vmem:[#allocation8 + $0x2c4] ss:$8 sps:$4 sm:$0xff]  }
 0x1b7   : > { %v1811_v2 = vmul.f32 0.2, %v1778_v45  ;;  %v1841_v7 = vmax.f32 %v1774_v56, %v1809_v33  ;;  %2494 = vmatprep.subr.bf16.mxu0 %v4440_v47  ;;  %2870 = vmatpush1.bf16.msra.mxu1 %v4450_v28  ;;  %v4477_v21 = vld [vmem:[#allocation8 + $0x2c0] ss:$8 sps:$4 sm:$0xff]  }
 0x1b8   : > { %v1842_v41 = vmax.f32 %v1776_v26, %v1810_v35  ;;  %2871 = vmatprep.subr.bf16.mxu1 %v4455_v24  ;;  %v4015_v53 = vld [vmem:[%s7058_s7 + $0x2] sm:$0x3] }
 0x1b9   : > { %v1843_v15 = vmax.f32 %v1778_v45, %v1811_v2  ;;  %v5418_v10 = vrot.slane %v4015_v53, %v5368_v16  ;;  %v5421_v56 = vrot.slane %v4015_v53, %v5374_v19 }
 0x1ba   : > { %v1858_v17 = vpack.c.bf16 %v1842_v41, %v1840_v6  ;;  %2495 = vmatpush1.bf16.msra.mxu0 %v4438_v34 }
 0x1bb   : > { %v1859_v37 = vpack.c.bf16 %v1843_v15, %v1841_v7  ;;  %2872 = vmatpush1.bf16.msra.mxu1 %v4453_v29 }
 0x1bc   : > { %2873 = vmatprep.subr.bf16.mxu1 %v4458_v31 }
 0x1bd   : > { %2167 = vmatprep.mubr.bf16.mxu1 %v1859_v37 }
 0x1be   : > { %2168 = vmatmul.mubr.bf16.gmra.mrb[28].mxu1 %v1858_v17 }
 0x1bf   : > { %2874 = vmatpush1.bf16.msra.mxu1 %v4456_v32 }
 0x1c0   : > { %2875 = vmatprep.subr.bf16.mxu1 %v4461_v38 }
 0x1c3   : > { %2876 = vmatpush1.bf16.msra.mxu1 %v4459_v43 }
 0x1c4   : > { %2877 = vmatprep.subr.bf16.mxu1 %v4464_v52 }
 0x1c7   : > { %2878 = vmatpush1.bf16.msra.mxu1 %v4462_v57 }
 0x1c8   : > { %2879 = vmatprep.subr.bf16.mxu1 %v4467_v51 }
 0x1cb   : > { %2880 = vmatpush1.bf16.msra.mxu1 %v4465_v39 }
 0x1cc   : > { %2881 = vmatprep.subr.bf16.mxu1 %v4470_v40 }
 0x1cf   : > { %2882 = vmatpush1.bf16.msra.mxu1 %v4468_v13 }
 0x1d0   : > { %2883 = vmatprep.subr.bf16.mxu1 %v4473_v0 }
 0x1d3   : > { %2884 = vmatpush1.bf16.msra.mxu1 %v4471_v22 }
 0x1d4   : > { %2885 = vmatprep.subr.bf16.mxu1 %v4476_v44 }
 0x1d7   : > { %2886 = vmatpush1.bf16.msra.mxu1 %v4474_v48 }
 0x1d8   : > { %2887 = vmatprep.subr.bf16.mxu1 %v4479_v50 }
 0x1db   : > { %2888 = vmatpush1.bf16.msra.mxu1 %v4477_v21 }
 0x259   : > { %v2099_v59 = vpop.f32.mrb[0].mxu1 }
 0x25a   : > { %v2100_v61 = vadd.f32 %v2099_v59, %v5418_v10  ;;  %v2101_v62 = vpop.f32.mrb[1].mxu1 }
 0x25b   : > { %v2102_v26 = vadd.f32 %v2101_v62, %v5421_v56  ;;  %v2103_v27 = vpop.f32.mrb[2].mxu1 }
 0x25c   : > { %v2178_v33 = vmul.f32 0.2, %v2100_v61  ;;  %v2104_v45 = vadd.f32 %v2103_v27, %v5418_v10  ;;  %v2105_v35 = vpop.f32.mrb[3].mxu1 }
 0x25d   : > { %v2179_v2 = vmul.f32 0.2, %v2102_v26  ;;  %v2106_v6 = vadd.f32 %v2105_v35, %v5421_v56 }
 0x25e   : > { %v2180_v41 = vmul.f32 0.2, %v2104_v45  ;;  %v2210_v15 = vmax.f32 %v2100_v61, %v2178_v33 }
 0x25f   : > { %v2181_v7 = vmul.f32 0.2, %v2106_v6  ;;  %v2211_v37 = vmax.f32 %v2102_v26, %v2179_v2 }
 0x260   : > { %v2212_v17 = vmax.f32 %v2104_v45, %v2180_v41 }
 0x261   : > { %v2213_v4 = vmax.f32 %v2106_v6, %v2181_v7  ;;  %v2109_v55 = vpop.f32.mrb[4].mxu1 }
 0x262   : > { %v2242_v58 = vpack.c.bf16 %v2212_v17, %v2210_v15  ;;  %v2110_v42 = vadd.f32 %v2109_v55, %v5418_v10  ;;  %v2111_v47 = vpop.f32.mrb[5].mxu1 }
 0x263   : > { %v2112_v34 = vadd.f32 %v2111_v47, %v5421_v56  ;;  %v2113_v3 = vpop.f32.mrb[6].mxu1  ;;  %v2243_v12 = vpack.c.bf16 %v2213_v4, %v2211_v37 }
 0x264   : > { %v2182_v46 = vmul.f32 0.2, %v2110_v42  ;;  %v2114_v11 = vadd.f32 %v2113_v3, %v5418_v10  ;;  %v2115_v18 = vpop.f32.mrb[7].mxu1 }
 0x265   : > { %v2183_v20 = vmul.f32 0.2, %v2112_v34  ;;  %v2116_v23 = vadd.f32 %v2115_v18, %v5421_v56  ;;  %2496 = vmatprep.mubr.bf16.mxu0 %v2243_v12 }
 0x266   : > { %v2184_v28 = vmul.f32 0.2, %v2114_v11  ;;  %2497 = vmatmul.mubr.bf16.vlgmr.msra.gmra.mrb[32].mxu0 %v2242_v58  ;;  %v2214_v29 = vmax.f32 %v2110_v42, %v2182_v46 }
 0x267   : > { %v2185_v24 = vmul.f32 0.2, %v2116_v23  ;;  %v2215_v32 = vmax.f32 %v2112_v34, %v2183_v20 }
 0x268   : > { %v2216_v31 = vmax.f32 %v2114_v11, %v2184_v28 }
 0x269   : > { %v2217_v38 = vmax.f32 %v2116_v23, %v2185_v24  ;;  %v2119_v43 = vpop.f32.mrb[8].mxu1 }
 0x26a   : > { %v2120_v52 = vadd.f32 %v2119_v43, %v5418_v10  ;;  %v2121_v57 = vpop.f32.mrb[9].mxu1  ;;  %v2244_v51 = vpack.c.bf16 %v2216_v31, %v2214_v29 }
 0x26b   : > { %v2122_v39 = vadd.f32 %v2121_v57, %v5421_v56  ;;  %v2123_v40 = vpop.f32.mrb[10].mxu1  ;;  %v2245_v13 = vpack.c.bf16 %v2217_v38, %v2215_v32 }
 0x26c   : > { %v2186_v0 = vmul.f32 0.2, %v2120_v52  ;;  %v2124_v22 = vadd.f32 %v2123_v40, %v5418_v10  ;;  %v2125_v44 = vpop.f32.mrb[11].mxu1 }
 0x26d   : > { %v2187_v48 = vmul.f32 0.2, %v2122_v39  ;;  %v2126_v50 = vadd.f32 %v2125_v44, %v5421_v56  ;;  %2506 = vmatprep.mubr.bf16.mxu0 %v2245_v13 }
 0x26e   : > { %v2188_v21 = vmul.f32 0.2, %v2124_v22  ;;  %2507 = vmatmul.mubr.bf16.gmra.mrb[36].mxu0 %v2244_v51  ;;  %v2218_v59 = vmax.f32 %v2120_v52, %v2186_v0 }
 0x26f   : > { %v2189_v53 = vmul.f32 0.2, %v2126_v50  ;;  %v2219_v62 = vmax.f32 %v2122_v39, %v2187_v48 }
 0x270   : > { %v2220_v61 = vmax.f32 %v2124_v22, %v2188_v21 }
 0x271   : > { %v2221_v26 = vmax.f32 %v2126_v50, %v2189_v53  ;;  %v2129_v27 = vpop.f32.mrb[12].mxu1 }
 0x272   : > { %v2130_v33 = vadd.f32 %v2129_v27, %v5418_v10  ;;  %v2131_v45 = vpop.f32.mrb[13].mxu1  ;;  %v2246_v35 = vpack.c.bf16 %v2220_v61, %v2218_v59 }
 0x273   : > { %v2132_v2 = vadd.f32 %v2131_v45, %v5421_v56  ;;  %v2133_v6 = vpop.f32.mrb[14].mxu1  ;;  %v2247_v41 = vpack.c.bf16 %v2221_v26, %v2219_v62 }
 0x274   : > { %v2190_v7 = vmul.f32 0.2, %v2130_v33  ;;  %v2134_v15 = vadd.f32 %v2133_v6, %v5418_v10  ;;  %v2135_v17 = vpop.f32.mrb[15].mxu1 }
 0x275   : > { %v2191_v37 = vmul.f32 0.2, %v2132_v2  ;;  %v2136_v4 = vadd.f32 %v2135_v17, %v5421_v56  ;;  %2516 = vmatprep.mubr.bf16.mxu0 %v2247_v41 }
 0x276   : > { %v2192_v55 = vmul.f32 0.2, %v2134_v15  ;;  %2517 = vmatmul.mubr.bf16.gmra.mrb[40].mxu0 %v2246_v35  ;;  %v2222_v42 = vmax.f32 %v2130_v33, %v2190_v7 }
 0x277   : > { %v2193_v58 = vmul.f32 0.2, %v2136_v4  ;;  %v2223_v34 = vmax.f32 %v2132_v2, %v2191_v37 }
 0x278   : > { %v2224_v47 = vmax.f32 %v2134_v15, %v2192_v55 }
 0x279   : > { %v2225_v3 = vmax.f32 %v2136_v4, %v2193_v58  ;;  %v2139_v12 = vpop.f32.mrb[16].mxu1 }
 0x27a   : > { %v2140_v46 = vadd.f32 %v2139_v12, %v5418_v10  ;;  %v2141_v11 = vpop.f32.mrb[17].mxu1  ;;  %v2248_v18 = vpack.c.bf16 %v2224_v47, %v2222_v42 }
 0x27b   : > { %v2142_v20 = vadd.f32 %v2141_v11, %v5421_v56  ;;  %v2143_v23 = vpop.f32.mrb[18].mxu1  ;;  %v2249_v28 = vpack.c.bf16 %v2225_v3, %v2223_v34 }
 0x27c   : > { %v2194_v24 = vmul.f32 0.2, %v2140_v46  ;;  %v2144_v29 = vadd.f32 %v2143_v23, %v5418_v10  ;;  %v2145_v31 = vpop.f32.mrb[19].mxu1 }
 0x27d   : > { %v2195_v32 = vmul.f32 0.2, %v2142_v20  ;;  %v2146_v38 = vadd.f32 %v2145_v31, %v5421_v56  ;;  %2526 = vmatprep.mubr.bf16.mxu0 %v2249_v28 }
 0x27e   : > { %v2196_v43 = vmul.f32 0.2, %v2144_v29  ;;  %2527 = vmatmul.mubr.bf16.gmra.mrb[44].mxu0 %v2248_v18  ;;  %v2226_v57 = vmax.f32 %v2140_v46, %v2194_v24 }
 0x27f   : > { %v2197_v52 = vmul.f32 0.2, %v2146_v38  ;;  %v2227_v39 = vmax.f32 %v2142_v20, %v2195_v32 }
 0x280   : > { %v2228_v51 = vmax.f32 %v2144_v29, %v2196_v43 }
 0x281   : > { %v2229_v40 = vmax.f32 %v2146_v38, %v2197_v52  ;;  %v2149_v13 = vpop.f32.mrb[20].mxu1 }
 0x282   : > { %v2150_v0 = vadd.f32 %v2149_v13, %v5418_v10  ;;  %v2151_v22 = vpop.f32.mrb[21].mxu1  ;;  %v2250_v44 = vpack.c.bf16 %v2228_v51, %v2226_v57 }
 0x283   : > { %v2152_v48 = vadd.f32 %v2151_v22, %v5421_v56  ;;  %v2153_v50 = vpop.f32.mrb[22].mxu1  ;;  %v2251_v21 = vpack.c.bf16 %v2229_v40, %v2227_v39 }
 0x284   : > { %v2198_v53 = vmul.f32 0.2, %v2150_v0  ;;  %v2154_v59 = vadd.f32 %v2153_v50, %v5418_v10  ;;  %v2155_v61 = vpop.f32.mrb[23].mxu1 }
 0x285   : > { %v2199_v62 = vmul.f32 0.2, %v2152_v48  ;;  %v2156_v26 = vadd.f32 %v2155_v61, %v5421_v56  ;;  %2536 = vmatprep.mubr.bf16.mxu0 %v2251_v21  ;;  %v4480_v61 = vld [vmem:[#allocation8 + $0x2d0] ss:$8 sps:$4 sm:$0xff]  }
 0x286   : > { %v2200_v27 = vmul.f32 0.2, %v2154_v59  ;;  %2537 = vmatmul.mubr.bf16.gmra.mrb[48].mxu0 %v2250_v44  ;;  %v2230_v45 = vmax.f32 %v2150_v0, %v2198_v53 }
 0x287   : > { %v2201_v33 = vmul.f32 0.2, %v2156_v26  ;;  %v2231_v2 = vmax.f32 %v2152_v48, %v2199_v62  ;;  %v4483_v62 = vld [vmem:[#allocation8 + $0x2e0] ss:$8 sps:$4 sm:$0xff]  }
 0x288   : > { %v2232_v35 = vmax.f32 %v2154_v59, %v2200_v27  ;;  %v4482_v59 = vld [vmem:[#allocation8 + $0x2d4] ss:$8 sps:$4 sm:$0xff]   ;;  %v4489_v27 = vld [vmem:[#allocation8 + $0x300] ss:$8 sps:$4 sm:$0xff]  }
 0x289   : > { %v2233_v6 = vmax.f32 %v2156_v26, %v2201_v33  ;;  %v2159_v41 = vpop.f32.mrb[24].mxu1  ;;  %2889 = vmatprep.subr.bf16.mxu1 %v4482_v59  ;;  %v4486_v26 = vld [vmem:[#allocation8 + $0x2f0] ss:$8 sps:$4 sm:$0xff]   ;;  %v4491_v33 = vld [vmem:[#allocation8 + $0x304] ss:$8 sps:$4 sm:$0xff]  }
 0x28a   : > { %v2160_v7 = vadd.f32 %v2159_v41, %v5418_v10  ;;  %v2161_v15 = vpop.f32.mrb[25].mxu1  ;;  %v2252_v17 = vpack.c.bf16 %v2232_v35, %v2230_v45  ;;  %2890 = vmatpush1.bf16.msra.mxu1 %v4480_v61  ;;  %v4494_v45 = vld [vmem:[#allocation8 + $0x314] ss:$8 sps:$4 sm:$0xff]   ;;  %3262 = vmatprep.subr.bf16.mxu0 %v4491_v33  ;;  %v4492_v35 = vld [vmem:[#allocation8 + $0x310] ss:$8 sps:$4 sm:$0xff]  }
 0x28b   : > { %v2162_v37 = vadd.f32 %v2161_v15, %v5421_v56  ;;  %v2163_v4 = vpop.f32.mrb[26].mxu1  ;;  %v2253_v55 = vpack.c.bf16 %v2233_v6, %v2231_v2  ;;  %3263 = vmatpush1.bf16.msra.mxu0 %v4489_v27  ;;  %v4497_v2 = vld [vmem:[#allocation8 + $0x324] ss:$8 sps:$4 sm:$0xff]   ;;  %v4495_v6 = vld [vmem:[#allocation8 + $0x320] ss:$8 sps:$4 sm:$0xff]  }
 0x28c   : > { %v2202_v58 = vmul.f32 0.2, %v2160_v7  ;;  %v2164_v42 = vadd.f32 %v2163_v4, %v5418_v10  ;;  %v2165_v47 = vpop.f32.mrb[27].mxu1  ;;  %3264 = vmatprep.subr.bf16.mxu0 %v4494_v45  ;;  %v4500_v41 = vld [vmem:[#allocation8 + $0x334] ss:$8 sps:$4 sm:$0xff]  }
 0x28d   : > { %v2203_v34 = vmul.f32 0.2, %v2162_v37  ;;  %v2166_v3 = vadd.f32 %v2165_v47, %v5421_v56  ;;  %2546 = vmatprep.mubr.bf16.mxu0 %v2253_v55  ;;  %v4503_v15 = vld [vmem:[#allocation8 + $0x344] ss:$8 sps:$4 sm:$0xff]   ;;  %v4504_v4 = vld [vmem:[#allocation8 + $0x350] ss:$8 sps:$4 sm:$0xff]  }
 0x28e   : > { %v2204_v12 = vmul.f32 0.2, %v2164_v42  ;;  %2547 = vmatmul.mubr.bf16.gmra.mrb[52].mxu0 %v2252_v17  ;;  %v2234_v11 = vmax.f32 %v2160_v7, %v2202_v58  ;;  %v4498_v7 = vld [vmem:[#allocation8 + $0x330] ss:$8 sps:$4 sm:$0xff]   ;;  %v4501_v17 = vld [vmem:[#allocation8 + $0x340] ss:$8 sps:$4 sm:$0xff]  }
 0x28f   : > { %v2205_v46 = vmul.f32 0.2, %v2166_v3  ;;  %v2235_v20 = vmax.f32 %v2162_v37, %v2203_v34  ;;  %3265 = vmatpush1.bf16.msra.mxu0 %v4492_v35  ;;  %v4506_v37 = vld [vmem:[#allocation8 + $0x354] ss:$8 sps:$4 sm:$0xff]   ;;  %v4509_v55 = vld [vmem:[#allocation8 + $0x364] ss:$8 sps:$4 sm:$0xff]  }
 0x290   : > { %v2236_v18 = vmax.f32 %v2164_v42, %v2204_v12  ;;  %3266 = vmatprep.subr.bf16.mxu0 %v4497_v2  ;;  %v4507_v58 = vld [vmem:[#allocation8 + $0x360] ss:$8 sps:$4 sm:$0xff]   ;;  %v4512_v42 = vld [vmem:[#allocation8 + $0x374] ss:$8 sps:$4 sm:$0xff]   ;;  %v4510_v47 = vld [vmem:[#allocation8 + $0x370] ss:$8 sps:$4 sm:$0xff]  }
 0x291   : > { %v2237_v23 = vmax.f32 %v2166_v3, %v2205_v46  ;;  %v2169_v28 = vpop.f32.mrb[28].mxu1  ;;  %v4515_v34 = vld [vmem:[#allocation8 + $0x384] ss:$8 sps:$4 sm:$0xff]   ;;  %v4513_v3 = vld [vmem:[#allocation8 + $0x380] ss:$8 sps:$4 sm:$0xff]  }
 0x292   : > { %v2170_v24 = vadd.f32 %v2169_v28, %v5418_v10  ;;  %v2171_v29 = vpop.f32.mrb[29].mxu1  ;;  %v2254_v31 = vpack.c.bf16 %v2236_v18, %v2234_v11  ;;  %v4518_v12 = vld [vmem:[#allocation8 + $0x394] ss:$8 sps:$4 sm:$0xff]   ;;  %v4516_v46 = vld [vmem:[#allocation8 + $0x390] ss:$8 sps:$4 sm:$0xff]  }
 0x293   : > { %v2172_v32 = vadd.f32 %v2171_v29, %v5421_v56  ;;  %v2173_v38 = vpop.f32.mrb[30].mxu1  ;;  %v2255_v43 = vpack.c.bf16 %v2237_v23, %v2235_v20  ;;  %3267 = vmatpush1.bf16.msra.mxu0 %v4495_v6  ;;  %v4521_v11 = vld [vmem:[#allocation8 + $0x3a4] ss:$8 sps:$4 sm:$0xff]   ;;  %v4519_v18 = vld [vmem:[#allocation8 + $0x3a0] ss:$8 sps:$4 sm:$0xff]  }
 0x294   : > { %v2206_v52 = vmul.f32 0.2, %v2170_v24  ;;  %v2174_v57 = vadd.f32 %v2173_v38, %v5418_v10  ;;  %v2175_v51 = vpop.f32.mrb[31].mxu1  ;;  %v4485_v10 = vld [vmem:[#allocation8 + $0x2e4] ss:$8 sps:$4 sm:$0xff]   ;;  %3268 = vmatprep.subr.bf16.mxu0 %v4500_v41 }
 0x295   : > { %v2207_v39 = vmul.f32 0.2, %v2172_v32  ;;  %v2176_v40 = vadd.f32 %v2175_v51, %v5421_v56  ;;  %2556 = vmatprep.mubr.bf16.mxu0 %v2255_v43  ;;  %2891 = vmatprep.subr.bf16.mxu1 %v4485_v10  ;;  %v4488_v56 = vld [vmem:[#allocation8 + $0x2f4] ss:$8 sps:$4 sm:$0xff]   ;;  %v4522_v23 = vld [vmem:[#allocation8 + $0x3b0] ss:$8 sps:$4 sm:$0xff]  }
 0x296   : > { %v2208_v13 = vmul.f32 0.2, %v2174_v57  ;;  %2557 = vmatmul.mubr.bf16.gmra.mrb[56].mxu0 %v2254_v31  ;;  %v2238_v22 = vmax.f32 %v2170_v24, %v2206_v52  ;;  %2892 = vmatpush1.bf16.msra.mxu1 %v4483_v62  ;;  %v4524_v20 = vld [vmem:[#allocation8 + $0x3b4] ss:$8 sps:$4 sm:$0xff]   ;;  %v4527_v28 = vld [vmem:[#allocation8 + $0x3c4] ss:$8 sps:$4 sm:$0xff]  }
 0x297   : > { %v2209_v0 = vmul.f32 0.2, %v2176_v40  ;;  %v2239_v48 = vmax.f32 %v2172_v32, %v2207_v39  ;;  %2893 = vmatprep.subr.bf16.mxu1 %v4488_v56  ;;  %3269 = vmatpush1.bf16.msra.mxu0 %v4498_v7  ;;  %v4525_v24 = vld [vmem:[#allocation8 + $0x3c0] ss:$8 sps:$4 sm:$0xff]   ;;  %v4048_v29 = vld [vmem:[%s7058_s7 + $0x4] sm:$0x3] }
 0x298   : > { %v2240_v44 = vmax.f32 %v2174_v57, %v2208_v13  ;;  %3270 = vmatprep.subr.bf16.mxu0 %v4503_v15  ;;  %v5459_v31 = vrot.slane %v4048_v29, %v5368_v16  ;;  %v5462_v32 = vrot.slane %v4048_v29, %v5374_v19 }
 0x299   : > { %v2241_v50 = vmax.f32 %v2176_v40, %v2209_v0 }
 0x29a   : > { %v2256_v21 = vpack.c.bf16 %v2240_v44, %v2238_v22  ;;  %2894 = vmatpush1.bf16.msra.mxu1 %v4486_v26 }
 0x29b   : > { %v2257_v53 = vpack.c.bf16 %v2241_v50, %v2239_v48  ;;  %3271 = vmatpush1.bf16.msra.mxu0 %v4501_v17 }
 0x29c   : > { %3272 = vmatprep.subr.bf16.mxu0 %v4506_v37 }
 0x29d   : > { %2566 = vmatprep.mubr.bf16.mxu0 %v2257_v53 }
 0x29e   : > { %2567 = vmatmul.mubr.bf16.gmra.mrb[60].mxu0 %v2256_v21 }
 0x29f   : > { %3273 = vmatpush1.bf16.msra.mxu0 %v4504_v4 }
 0x2a0   : > { %3274 = vmatprep.subr.bf16.mxu0 %v4509_v55 }
 0x2a3   : > { %3275 = vmatpush1.bf16.msra.mxu0 %v4507_v58 }
 0x2a4   : > { %3276 = vmatprep.subr.bf16.mxu0 %v4512_v42 }
 0x2a7   : > { %3277 = vmatpush1.bf16.msra.mxu0 %v4510_v47 }
 0x2a8   : > { %3278 = vmatprep.subr.bf16.mxu0 %v4515_v34 }
 0x2ab   : > { %3279 = vmatpush1.bf16.msra.mxu0 %v4513_v3 }
 0x2ac   : > { %3280 = vmatprep.subr.bf16.mxu0 %v4518_v12 }
 0x2af   : > { %3281 = vmatpush1.bf16.msra.mxu0 %v4516_v46 }
 0x2b0   : > { %3282 = vmatprep.subr.bf16.mxu0 %v4521_v11 }
 0x2b3   : > { %3283 = vmatpush1.bf16.msra.mxu0 %v4519_v18 }
 0x2b4   : > { %3284 = vmatprep.subr.bf16.mxu0 %v4524_v20 }
 0x2b7   : > { %3285 = vmatpush1.bf16.msra.mxu0 %v4522_v23 }
 0x2b8   : > { %3286 = vmatprep.subr.bf16.mxu0 %v4527_v28 }
 0x2bb   : > { %3287 = vmatpush1.bf16.msra.mxu0 %v4525_v24 }
 0x339   : > { %v2498_v38 = vpop.f32.mrb[32].mxu0 }
 0x33a   : > { %v2499_v43 = vadd.f32 %v2498_v38, %v5459_v31  ;;  %v2500_v52 = vpop.f32.mrb[33].mxu0 }
 0x33b   : > { %v2501_v57 = vadd.f32 %v2500_v52, %v5462_v32  ;;  %v2502_v51 = vpop.f32.mrb[34].mxu0 }
 0x33c   : > { %v2577_v39 = vmul.f32 0.2, %v2499_v43  ;;  %v2503_v40 = vadd.f32 %v2502_v51, %v5459_v31  ;;  %v2504_v13 = vpop.f32.mrb[35].mxu0 }
 0x33d   : > { %v2578_v0 = vmul.f32 0.2, %v2501_v57  ;;  %v2505_v22 = vadd.f32 %v2504_v13, %v5462_v32 }
 0x33e   : > { %v2579_v44 = vmul.f32 0.2, %v2503_v40  ;;  %v2609_v50 = vmax.f32 %v2499_v43, %v2577_v39 }
 0x33f   : > { %v2580_v48 = vmul.f32 0.2, %v2505_v22  ;;  %v2610_v53 = vmax.f32 %v2501_v57, %v2578_v0 }
 0x340   : > { %v2611_v21 = vmax.f32 %v2503_v40, %v2579_v44 }
 0x341   : > { %v2612_v59 = vmax.f32 %v2505_v22, %v2580_v48  ;;  %v2508_v61 = vpop.f32.mrb[36].mxu0 }
 0x342   : > { %v2641_v10 = vpack.c.bf16 %v2611_v21, %v2609_v50  ;;  %v2509_v62 = vadd.f32 %v2508_v61, %v5459_v31  ;;  %v2510_v56 = vpop.f32.mrb[37].mxu0 }
 0x343   : > { %v2511_v26 = vadd.f32 %v2510_v56, %v5462_v32  ;;  %v2512_v27 = vpop.f32.mrb[38].mxu0  ;;  %v2642_v33 = vpack.c.bf16 %v2612_v59, %v2610_v53 }
 0x344   : > { %v2581_v45 = vmul.f32 0.2, %v2509_v62  ;;  %v2513_v35 = vadd.f32 %v2512_v27, %v5459_v31  ;;  %v2514_v2 = vpop.f32.mrb[39].mxu0 }
 0x345   : > { %v2582_v6 = vmul.f32 0.2, %v2511_v26  ;;  %v2515_v41 = vadd.f32 %v2514_v2, %v5462_v32  ;;  %2895 = vmatprep.mubr.bf16.mxu1 %v2642_v33 }
 0x346   : > { %v2583_v7 = vmul.f32 0.2, %v2513_v35  ;;  %2896 = vmatmul.mubr.bf16.vlgmr.msra.gmra.mrb[32].mxu1 %v2641_v10  ;;  %v2613_v17 = vmax.f32 %v2509_v62, %v2581_v45 }
 0x347   : > { %v2584_v15 = vmul.f32 0.2, %v2515_v41  ;;  %v2614_v4 = vmax.f32 %v2511_v26, %v2582_v6 }
 0x348   : > { %v2615_v37 = vmax.f32 %v2513_v35, %v2583_v7 }
 0x349   : > { %v2616_v55 = vmax.f32 %v2515_v41, %v2584_v15  ;;  %v2518_v58 = vpop.f32.mrb[40].mxu0 }
 0x34a   : > { %v2519_v42 = vadd.f32 %v2518_v58, %v5459_v31  ;;  %v2520_v47 = vpop.f32.mrb[41].mxu0  ;;  %v2643_v34 = vpack.c.bf16 %v2615_v37, %v2613_v17 }
 0x34b   : > { %v2521_v3 = vadd.f32 %v2520_v47, %v5462_v32  ;;  %v2522_v12 = vpop.f32.mrb[42].mxu0  ;;  %v2644_v46 = vpack.c.bf16 %v2616_v55, %v2614_v4 }
 0x34c   : > { %v2585_v11 = vmul.f32 0.2, %v2519_v42  ;;  %v2523_v18 = vadd.f32 %v2522_v12, %v5459_v31  ;;  %v2524_v20 = vpop.f32.mrb[43].mxu0 }
 0x34d   : > { %v2586_v23 = vmul.f32 0.2, %v2521_v3  ;;  %v2525_v28 = vadd.f32 %v2524_v20, %v5462_v32  ;;  %2905 = vmatprep.mubr.bf16.mxu1 %v2644_v46 }
 0x34e   : > { %v2587_v24 = vmul.f32 0.2, %v2523_v18  ;;  %2906 = vmatmul.mubr.bf16.gmra.mrb[36].mxu1 %v2643_v34  ;;  %v2617_v38 = vmax.f32 %v2519_v42, %v2585_v11 }
 0x34f   : > { %v2588_v29 = vmul.f32 0.2, %v2525_v28  ;;  %v2618_v52 = vmax.f32 %v2521_v3, %v2586_v23 }
 0x350   : > { %v2619_v43 = vmax.f32 %v2523_v18, %v2587_v24 }
 0x351   : > { %v2620_v57 = vmax.f32 %v2525_v28, %v2588_v29  ;;  %v2528_v51 = vpop.f32.mrb[44].mxu0 }
 0x352   : > { %v2529_v39 = vadd.f32 %v2528_v51, %v5459_v31  ;;  %v2530_v40 = vpop.f32.mrb[45].mxu0  ;;  %v2645_v13 = vpack.c.bf16 %v2619_v43, %v2617_v38 }
 0x353   : > { %v2531_v0 = vadd.f32 %v2530_v40, %v5462_v32  ;;  %v2532_v22 = vpop.f32.mrb[46].mxu0  ;;  %v2646_v44 = vpack.c.bf16 %v2620_v57, %v2618_v52 }
 0x354   : > { %v2589_v48 = vmul.f32 0.2, %v2529_v39  ;;  %v2533_v50 = vadd.f32 %v2532_v22, %v5459_v31  ;;  %v2534_v21 = vpop.f32.mrb[47].mxu0 }
 0x355   : > { %v2590_v53 = vmul.f32 0.2, %v2531_v0  ;;  %v2535_v59 = vadd.f32 %v2534_v21, %v5462_v32  ;;  %2915 = vmatprep.mubr.bf16.mxu1 %v2646_v44 }
 0x356   : > { %v2591_v61 = vmul.f32 0.2, %v2533_v50  ;;  %2916 = vmatmul.mubr.bf16.gmra.mrb[40].mxu1 %v2645_v13  ;;  %v2621_v62 = vmax.f32 %v2529_v39, %v2589_v48 }
 0x357   : > { %v2592_v10 = vmul.f32 0.2, %v2535_v59  ;;  %v2622_v26 = vmax.f32 %v2531_v0, %v2590_v53 }
 0x358   : > { %v2623_v56 = vmax.f32 %v2533_v50, %v2591_v61 }
 0x359   : > { %v2624_v27 = vmax.f32 %v2535_v59, %v2592_v10  ;;  %v2538_v33 = vpop.f32.mrb[48].mxu0 }
 0x35a   : > { %v2539_v45 = vadd.f32 %v2538_v33, %v5459_v31  ;;  %v2540_v35 = vpop.f32.mrb[49].mxu0  ;;  %v2647_v2 = vpack.c.bf16 %v2623_v56, %v2621_v62 }
 0x35b   : > { %v2541_v6 = vadd.f32 %v2540_v35, %v5462_v32  ;;  %v2542_v41 = vpop.f32.mrb[50].mxu0  ;;  %v2648_v7 = vpack.c.bf16 %v2624_v27, %v2622_v26 }
 0x35c   : > { %v2593_v15 = vmul.f32 0.2, %v2539_v45  ;;  %v2543_v17 = vadd.f32 %v2542_v41, %v5459_v31  ;;  %v2544_v37 = vpop.f32.mrb[51].mxu0 }
 0x35d   : > { %v2594_v4 = vmul.f32 0.2, %v2541_v6  ;;  %v2545_v55 = vadd.f32 %v2544_v37, %v5462_v32  ;;  %2925 = vmatprep.mubr.bf16.mxu1 %v2648_v7 }
 0x35e   : > { %v2595_v58 = vmul.f32 0.2, %v2543_v17  ;;  %2926 = vmatmul.mubr.bf16.gmra.mrb[44].mxu1 %v2647_v2  ;;  %v2625_v47 = vmax.f32 %v2539_v45, %v2593_v15 }
 0x35f   : > { %v2596_v42 = vmul.f32 0.2, %v2545_v55  ;;  %v2626_v3 = vmax.f32 %v2541_v6, %v2594_v4 }
 0x360   : > { %v2627_v34 = vmax.f32 %v2543_v17, %v2595_v58 }
 0x361   : > { %v2628_v12 = vmax.f32 %v2545_v55, %v2596_v42  ;;  %v2548_v46 = vpop.f32.mrb[52].mxu0 }
 0x362   : > { %v2549_v11 = vadd.f32 %v2548_v46, %v5459_v31  ;;  %v2550_v18 = vpop.f32.mrb[53].mxu0  ;;  %v2649_v20 = vpack.c.bf16 %v2627_v34, %v2625_v47 }
 0x363   : > { %v2551_v23 = vadd.f32 %v2550_v18, %v5462_v32  ;;  %v2552_v28 = vpop.f32.mrb[54].mxu0  ;;  %v2650_v24 = vpack.c.bf16 %v2628_v12, %v2626_v3 }
 0x364   : > { %v2597_v29 = vmul.f32 0.2, %v2549_v11  ;;  %v2553_v38 = vadd.f32 %v2552_v28, %v5459_v31  ;;  %v2554_v43 = vpop.f32.mrb[55].mxu0 }
 0x365   : > { %v2598_v52 = vmul.f32 0.2, %v2551_v23  ;;  %v2555_v57 = vadd.f32 %v2554_v43, %v5462_v32  ;;  %2935 = vmatprep.mubr.bf16.mxu1 %v2650_v24  ;;  %v4528_v43 = vld [vmem:[#allocation8 + $0x3d0] ss:$8 sps:$4 sm:$0xff]  }
 0x366   : > { %v2599_v51 = vmul.f32 0.2, %v2553_v38  ;;  %2936 = vmatmul.mubr.bf16.gmra.mrb[48].mxu1 %v2649_v20  ;;  %v2629_v40 = vmax.f32 %v2549_v11, %v2597_v29 }
 0x367   : > { %v2600_v39 = vmul.f32 0.2, %v2555_v57  ;;  %v2630_v0 = vmax.f32 %v2551_v23, %v2598_v52  ;;  %v4531_v52 = vld [vmem:[#allocation8 + $0x3e0] ss:$8 sps:$4 sm:$0xff]  }
 0x368   : > { %v2631_v13 = vmax.f32 %v2553_v38, %v2599_v51  ;;  %v4530_v38 = vld [vmem:[#allocation8 + $0x3d4] ss:$8 sps:$4 sm:$0xff]   ;;  %v4537_v51 = vld [vmem:[%s7059_s8 + $0x40] sm:$0xff]  }
 0x369   : > { %v2632_v22 = vmax.f32 %v2555_v57, %v2600_v39  ;;  %v2558_v44 = vpop.f32.mrb[56].mxu0  ;;  %3288 = vmatprep.subr.bf16.mxu0 %v4530_v38  ;;  %v4534_v57 = vld [vmem:[#allocation8 + $0x3f0] ss:$8 sps:$4 sm:$0xff]   ;;  %v4538_v39 = vld [vmem:[%s7059_s8] sm:$0xff]   ;;  %4235 = vmatprep.subr.bf16.mxu1 %v4537_v51 }
 0x36a   : > { %v2559_v48 = vadd.f32 %v2558_v44, %v5459_v31  ;;  %v2560_v50 = vpop.f32.mrb[57].mxu0  ;;  %v2651_v21 = vpack.c.bf16 %v2631_v13, %v2629_v40  ;;  %3289 = vmatpush1.bf16.msra.mxu0 %v4528_v43  ;;  %v4539_v40 = vld [vmem:[%s7059_s8 + $0x48] sm:$0xff]   ;;  %4243 = vmatpush3.bf16.msra.mxu1 %v4538_v39  ;;  %v5522_v44 = vld [vmem:[%s7059_s8 + $0x58] sm:$0xff]  }
 0x36b   : > { %v2561_v53 = vadd.f32 %v2560_v50, %v5462_v32  ;;  %v2562_v59 = vpop.f32.mrb[58].mxu0  ;;  %v2652_v61 = vpack.c.bf16 %v2632_v22, %v2630_v0  ;;  %4236 = vmatprep.subr.bf16.mxu1 %v4539_v40  ;;  %v4540_v13 = vld [vmem:[%s7059_s8 + $0x8] sm:$0xff]   ;;  %v5511_v0 = vld [vmem:[%s7059_s8 + $0x50] sm:$0xff]   ;;  %v5534_v50 = vld [vmem:[%s7059_s8 + $0x60] sm:$0xff]  }
 0x36c   : > { %v2601_v10 = vmul.f32 0.2, %v2559_v48  ;;  %v2563_v62 = vadd.f32 %v2562_v59, %v5459_v31  ;;  %v2564_v56 = vpop.f32.mrb[59].mxu0  ;;  %v5517_v22 = vld [vmem:[%s7059_s8 + $0x10] sm:$0xff]  }
 0x36d   : > { %v2602_v26 = vmul.f32 0.2, %v2561_v53  ;;  %v2565_v27 = vadd.f32 %v2564_v56, %v5462_v32  ;;  %2945 = vmatprep.mubr.bf16.mxu1 %v2652_v61 }
 0x36e   : > { %v2603_v33 = vmul.f32 0.2, %v2563_v62  ;;  %2946 = vmatmul.mubr.bf16.gmra.mrb[52].mxu1 %v2651_v21  ;;  %v2633_v35 = vmax.f32 %v2559_v48, %v2601_v10  ;;  %v5529_v48 = vld [vmem:[%s7059_s8 + $0x18] sm:$0xff]   ;;  %v5541_v21 = vld [vmem:[%s7059_s8 + $0x20] sm:$0xff]  }
 0x36f   : > { %v2604_v45 = vmul.f32 0.2, %v2565_v27  ;;  %v2634_v6 = vmax.f32 %v2561_v53, %v2602_v26  ;;  %4244 = vmatpush3.bf16.msra.mxu1 %v4540_v13  ;;  %v4081_v53 = vld [vmem:[%s7058_s7 + $0x6] sm:$0x3] }
 0x370   : > { %v2635_v2 = vmax.f32 %v2563_v62, %v2603_v33  ;;  %4237 = vmatprep.subr.bf16.mxu1 %v5511_v0  ;;  %v5548_v59 = vrot.slane %v4081_v53, %v5368_v16  ;;  %v5551_v61 = vrot.slane %v4081_v53, %v5374_v19 }
 0x371   : > { %v2636_v41 = vmax.f32 %v2565_v27, %v2604_v45  ;;  %v2568_v7 = vpop.f32.mrb[60].mxu0 }
 0x372   : > { %v2569_v15 = vadd.f32 %v2568_v7, %v5459_v31  ;;  %v2570_v17 = vpop.f32.mrb[61].mxu0  ;;  %v2653_v37 = vpack.c.bf16 %v2635_v2, %v2633_v35 }
 0x373   : > { %v2571_v4 = vadd.f32 %v2570_v17, %v5462_v32  ;;  %v2572_v55 = vpop.f32.mrb[62].mxu0  ;;  %v2654_v58 = vpack.c.bf16 %v2636_v41, %v2634_v6  ;;  %4245 = vmatpush3.bf16.msra.mxu1 %v5517_v22 }
 0x374   : > { %v2605_v42 = vmul.f32 0.2, %v2569_v15  ;;  %v2573_v47 = vadd.f32 %v2572_v55, %v5459_v31  ;;  %v2574_v34 = vpop.f32.mrb[63].mxu0  ;;  %v4533_v31 = vld [vmem:[#allocation8 + $0x3e4] ss:$8 sps:$4 sm:$0xff]   ;;  %4238 = vmatprep.subr.bf16.mxu1 %v5522_v44 }
 0x375   : > { %v2606_v3 = vmul.f32 0.2, %v2571_v4  ;;  %v2575_v12 = vadd.f32 %v2574_v34, %v5462_v32  ;;  %2955 = vmatprep.mubr.bf16.mxu1 %v2654_v58  ;;  %3290 = vmatprep.subr.bf16.mxu0 %v4533_v31  ;;  %v4536_v32 = vld [vmem:[#allocation8 + $0x3f4] ss:$8 sps:$4 sm:$0xff]  }
 0x376   : > { %v2607_v46 = vmul.f32 0.2, %v2573_v47  ;;  %2956 = vmatmul.mubr.bf16.gmra.mrb[56].mxu1 %v2653_v37  ;;  %v2637_v18 = vmax.f32 %v2569_v15, %v2605_v42  ;;  %3291 = vmatpush1.bf16.msra.mxu0 %v4531_v52 }
 0x377   : > { %v2608_v11 = vmul.f32 0.2, %v2575_v12  ;;  %v2638_v23 = vmax.f32 %v2571_v4, %v2606_v3  ;;  %3292 = vmatprep.subr.bf16.mxu0 %v4536_v32  ;;  %4246 = vmatpush3.bf16.msra.mxu1 %v5529_v48 }
 0x378   : > { %v2639_v20 = vmax.f32 %v2573_v47, %v2607_v46  ;;  %4239 = vmatprep.subr.bf16.mxu1 %v5534_v50 }
 0x379   : > { %v2640_v28 = vmax.f32 %v2575_v12, %v2608_v11 }
 0x37a   : > { %v2655_v24 = vpack.c.bf16 %v2639_v20, %v2637_v18  ;;  %3293 = vmatpush1.bf16.msra.mxu0 %v4534_v57 }
 0x37b   : > { %v2656_v29 = vpack.c.bf16 %v2640_v28, %v2638_v23  ;;  %4171 = vmatprep.subr.bf16.mxu0 %v4537_v51  ;;  %4247 = vmatpush3.bf16.msra.mxu1 %v5541_v21 }
 0x37d   : > { %2965 = vmatprep.mubr.bf16.mxu1 %v2656_v29 }
 0x37e   : > { %2966 = vmatmul.mubr.bf16.gmra.mrb[60].mxu1 %v2655_v24 }
 0x419   : > { %v2897_v10 = vpop.f32.mrb[32].mxu1 }
 0x41a   : > { %v2898_v62 = vadd.f32 %v2897_v10, %v5548_v59  ;;  %v2899_v56 = vpop.f32.mrb[33].mxu1 }
 0x41b   : > { %v2900_v26 = vadd.f32 %v2899_v56, %v5551_v61  ;;  %v2901_v27 = vpop.f32.mrb[34].mxu1 }
 0x41c   : > { %v2976_v33 = vmul.f32 0.2, %v2898_v62  ;;  %v2902_v45 = vadd.f32 %v2901_v27, %v5548_v59  ;;  %v2903_v35 = vpop.f32.mrb[35].mxu1 }
 0x41d   : > { %v2977_v2 = vmul.f32 0.2, %v2900_v26  ;;  %v2904_v6 = vadd.f32 %v2903_v35, %v5551_v61 }
 0x41e   : > { %v2978_v41 = vmul.f32 0.2, %v2902_v45  ;;  %v3008_v15 = vmax.f32 %v2898_v62, %v2976_v33 }
 0x41f   : > { %v2979_v7 = vmul.f32 0.2, %v2904_v6  ;;  %v3009_v37 = vmax.f32 %v2900_v26, %v2977_v2 }
 0x420   : > { %v3010_v17 = vmax.f32 %v2902_v45, %v2978_v41 }
 0x421   : > { %v3011_v4 = vmax.f32 %v2904_v6, %v2979_v7  ;;  %v2907_v55 = vpop.f32.mrb[36].mxu1 }
 0x422   : > { %v3040_v58 = vpack.c.bf16 %v3010_v17, %v3008_v15  ;;  %v2908_v42 = vadd.f32 %v2907_v55, %v5548_v59  ;;  %v2909_v47 = vpop.f32.mrb[37].mxu1 }
 0x423   : > { %v2910_v34 = vadd.f32 %v2909_v47, %v5551_v61  ;;  %v2911_v3 = vpop.f32.mrb[38].mxu1  ;;  %v3041_v12 = vpack.c.bf16 %v3011_v4, %v3009_v37 }
 0x424   : > { %v2980_v46 = vmul.f32 0.2, %v2908_v42  ;;  %v2912_v11 = vadd.f32 %v2911_v3, %v5548_v59  ;;  %v2913_v18 = vpop.f32.mrb[39].mxu1 }
 0x425   : > { %v2981_v20 = vmul.f32 0.2, %v2910_v34  ;;  %v2914_v23 = vadd.f32 %v2913_v18, %v5551_v61  ;;  %3294 = vmatprep.mubr.bf16.mxu0 %v3041_v12 }
 0x426   : > { %v2982_v28 = vmul.f32 0.2, %v2912_v11  ;;  %3295 = vmatmul.mubr.bf16.vlgmr.msra.gmra.mrb[64].mxu0 %v3040_v58  ;;  %v3012_v29 = vmax.f32 %v2908_v42, %v2980_v46 }
 0x427   : > { %v2983_v24 = vmul.f32 0.2, %v2914_v23  ;;  %4172 = vmatpush3.bf16.msra.mxu0 %v4538_v39  ;;  %v3013_v43 = vmax.f32 %v2910_v34, %v2981_v20 }
 0x428   : > { %v3014_v38 = vmax.f32 %v2912_v11, %v2982_v28  ;;  %4173 = vmatprep.subr.bf16.mxu0 %v4539_v40 }
 0x429   : > { %v3015_v31 = vmax.f32 %v2914_v23, %v2983_v24  ;;  %v2917_v52 = vpop.f32.mrb[40].mxu1 }
 0x42a   : > { %v2918_v32 = vadd.f32 %v2917_v52, %v5548_v59  ;;  %v2919_v57 = vpop.f32.mrb[41].mxu1  ;;  %v3042_v51 = vpack.c.bf16 %v3014_v38, %v3012_v29 }
 0x42b   : > { %v2920_v53 = vadd.f32 %v2919_v57, %v5551_v61  ;;  %v2921_v10 = vpop.f32.mrb[42].mxu1  ;;  %v3043_v62 = vpack.c.bf16 %v3015_v31, %v3013_v43  ;;  %4174 = vmatpush3.bf16.msra.mxu0 %v4540_v13 }
 0x42c   : > { %v2984_v56 = vmul.f32 0.2, %v2918_v32  ;;  %v2922_v26 = vadd.f32 %v2921_v10, %v5548_v59  ;;  %v2923_v27 = vpop.f32.mrb[43].mxu1  ;;  %4175 = vmatprep.subr.bf16.mxu0 %v5511_v0 }
 0x42d   : > { %v2985_v39 = vmul.f32 0.2, %v2920_v53  ;;  %v2924_v40 = vadd.f32 %v2923_v27, %v5551_v61  ;;  %3304 = vmatprep.mubr.bf16.mxu0 %v3043_v62 }
 0x42e   : > { %v2986_v33 = vmul.f32 0.2, %v2922_v26  ;;  %3305 = vmatmul.mubr.bf16.gmra.mrb[68].mxu0 %v3042_v51  ;;  %v3016_v35 = vmax.f32 %v2918_v32, %v2984_v56 }
 0x42f   : > { %v2987_v45 = vmul.f32 0.2, %v2924_v40  ;;  %4176 = vmatpush3.bf16.msra.mxu0 %v5517_v22  ;;  %v3017_v13 = vmax.f32 %v2920_v53, %v2985_v39 }
 0x430   : > { %v3018_v2 = vmax.f32 %v2922_v26, %v2986_v33  ;;  %4177 = vmatprep.subr.bf16.mxu0 %v5522_v44 }
 0x431   : > { %v3019_v6 = vmax.f32 %v2924_v40, %v2987_v45  ;;  %v2927_v41 = vpop.f32.mrb[44].mxu1 }
 0x432   : > { %v2928_v7 = vadd.f32 %v2927_v41, %v5548_v59  ;;  %v2929_v15 = vpop.f32.mrb[45].mxu1  ;;  %v3044_v0 = vpack.c.bf16 %v3018_v2, %v3016_v35 }
 0x433   : > { %v2930_v17 = vadd.f32 %v2929_v15, %v5551_v61  ;;  %v2931_v37 = vpop.f32.mrb[46].mxu1  ;;  %v3045_v4 = vpack.c.bf16 %v3019_v6, %v3017_v13  ;;  %4178 = vmatpush3.bf16.msra.mxu0 %v5529_v48 }
 0x434   : > { %v2988_v55 = vmul.f32 0.2, %v2928_v7  ;;  %v2932_v22 = vadd.f32 %v2931_v37, %v5548_v59  ;;  %v2933_v58 = vpop.f32.mrb[47].mxu1  ;;  %4179 = vmatprep.subr.bf16.mxu0 %v5534_v50 }
 0x435   : > { %v2989_v44 = vmul.f32 0.2, %v2930_v17  ;;  %v2934_v42 = vadd.f32 %v2933_v58, %v5551_v61  ;;  %3314 = vmatprep.mubr.bf16.mxu0 %v3045_v4 }
 0x436   : > { %v2990_v47 = vmul.f32 0.2, %v2932_v22  ;;  %3315 = vmatmul.mubr.bf16.gmra.mrb[72].mxu0 %v3044_v0  ;;  %v3020_v3 = vmax.f32 %v2928_v7, %v2988_v55 }
 0x437   : > { %v2991_v34 = vmul.f32 0.2, %v2934_v42  ;;  %4180 = vmatpush3.bf16.msra.mxu0 %v5541_v21  ;;  %v3021_v46 = vmax.f32 %v2930_v17, %v2989_v44 }
 0x438   : > { %v3022_v12 = vmax.f32 %v2932_v22, %v2990_v47 }
 0x439   : > { %v3023_v11 = vmax.f32 %v2934_v42, %v2991_v34  ;;  %v2937_v48 = vpop.f32.mrb[48].mxu1 }
 0x43a   : > { %v2938_v18 = vadd.f32 %v2937_v48, %v5548_v59  ;;  %v2939_v20 = vpop.f32.mrb[49].mxu1  ;;  %v3046_v23 = vpack.c.bf16 %v3022_v12, %v3020_v3 }
 0x43b   : > { %v2940_v50 = vadd.f32 %v2939_v20, %v5551_v61  ;;  %v2941_v28 = vpop.f32.mrb[50].mxu1  ;;  %v3047_v24 = vpack.c.bf16 %v3023_v11, %v3021_v46 }
 0x43c   : > { %v2992_v29 = vmul.f32 0.2, %v2938_v18  ;;  %v2942_v38 = vadd.f32 %v2941_v28, %v5548_v59  ;;  %v2943_v43 = vpop.f32.mrb[51].mxu1 }
 0x43d   : > { %v2993_v31 = vmul.f32 0.2, %v2940_v50  ;;  %v2944_v21 = vadd.f32 %v2943_v43, %v5551_v61  ;;  %3324 = vmatprep.mubr.bf16.mxu0 %v3047_v24 }
 0x43e   : > { %v2994_v52 = vmul.f32 0.2, %v2942_v38  ;;  %3325 = vmatmul.mubr.bf16.gmra.mrb[76].mxu0 %v3046_v23  ;;  %v3024_v57 = vmax.f32 %v2938_v18, %v2992_v29 }
 0x43f   : > { %v2995_v32 = vmul.f32 0.2, %v2944_v21  ;;  %v3025_v53 = vmax.f32 %v2940_v50, %v2993_v31 }
 0x440   : > { %v3026_v51 = vmax.f32 %v2942_v38, %v2994_v52 }
 0x441   : > { %v3027_v10 = vmax.f32 %v2944_v21, %v2995_v32  ;;  %v2947_v62 = vpop.f32.mrb[52].mxu1 }
 0x442   : > { %v2948_v56 = vadd.f32 %v2947_v62, %v5548_v59  ;;  %v2949_v26 = vpop.f32.mrb[53].mxu1  ;;  %v3048_v27 = vpack.c.bf16 %v3026_v51, %v3024_v57 }
 0x443   : > { %v2950_v39 = vadd.f32 %v2949_v26, %v5551_v61  ;;  %v2951_v40 = vpop.f32.mrb[54].mxu1  ;;  %v3049_v33 = vpack.c.bf16 %v3027_v10, %v3025_v53 }
 0x444   : > { %v2996_v45 = vmul.f32 0.2, %v2948_v56  ;;  %v2952_v35 = vadd.f32 %v2951_v40, %v5548_v59  ;;  %v2953_v2 = vpop.f32.mrb[55].mxu1 }
 0x445   : > { %v2997_v13 = vmul.f32 0.2, %v2950_v39  ;;  %v2954_v6 = vadd.f32 %v2953_v2, %v5551_v61  ;;  %3334 = vmatprep.mubr.bf16.mxu0 %v3049_v33  ;;  %v4550_v2 = vld [vmem:[%s7059_s8 + $0x30] sm:$0xff]  }
 0x446   : > { %v2998_v41 = vmul.f32 0.2, %v2952_v35  ;;  %3335 = vmatmul.mubr.bf16.gmra.mrb[80].mxu0 %v3048_v27  ;;  %v3028_v15 = vmax.f32 %v2948_v56, %v2996_v45 }
 0x447   : > { %v2999_v7 = vmul.f32 0.2, %v2954_v6  ;;  %v3029_v17 = vmax.f32 %v2950_v39, %v2997_v13  ;;  %v4551_v13 = vld [vmem:[%s7059_s8 + $0x78] sm:$0xff]  }
 0x448   : > { %v3030_v0 = vmax.f32 %v2952_v35, %v2998_v41  ;;  %v4549_v35 = vld [vmem:[%s7059_s8 + $0x70] sm:$0xff]   ;;  %v4114_v41 = vld [vmem:[%s7058_s7 + $0x8] sm:$0x3] }
 0x449   : > { %v3031_v37 = vmax.f32 %v2954_v6, %v2999_v7  ;;  %v2957_v4 = vpop.f32.mrb[56].mxu1  ;;  %v4552_v6 = vld [vmem:[%s7059_s8 + $0x38] sm:$0xff]   ;;  %v5613_v7 = vrot.slane %v4114_v41, %v5368_v16 }
 0x44a   : > { %v2958_v55 = vadd.f32 %v2957_v4, %v5548_v59  ;;  %v2959_v22 = vpop.f32.mrb[57].mxu1  ;;  %v3050_v58 = vpack.c.bf16 %v3030_v0, %v3028_v15  ;;  %v5616_v15 = vrot.slane %v4114_v41, %v5374_v19 }
 0x44b   : > { %v2960_v44 = vadd.f32 %v2959_v22, %v5551_v61  ;;  %v2961_v42 = vpop.f32.mrb[58].mxu1  ;;  %v3051_v47 = vpack.c.bf16 %v3031_v37, %v3029_v17 }
 0x44c   : > { %v3000_v34 = vmul.f32 0.2, %v2958_v55  ;;  %v2962_v3 = vadd.f32 %v2961_v42, %v5548_v59  ;;  %v2963_v12 = vpop.f32.mrb[59].mxu1 }
 0x44d   : > { %v3001_v46 = vmul.f32 0.2, %v2960_v44  ;;  %v2964_v11 = vadd.f32 %v2963_v12, %v5551_v61  ;;  %3344 = vmatprep.mubr.bf16.mxu0 %v3051_v47 }
 0x44e   : > { %v3002_v48 = vmul.f32 0.2, %v2962_v3  ;;  %3345 = vmatmul.mubr.bf16.gmra.mrb[84].mxu0 %v3050_v58  ;;  %v3032_v20 = vmax.f32 %v2958_v55, %v3000_v34 }
 0x44f   : > { %v3003_v18 = vmul.f32 0.2, %v2964_v11  ;;  %v3033_v50 = vmax.f32 %v2960_v44, %v3001_v46 }
 0x450   : > { %v3034_v23 = vmax.f32 %v2962_v3, %v3002_v48 }
 0x451   : > { %v3035_v28 = vmax.f32 %v2964_v11, %v3003_v18  ;;  %v2967_v24 = vpop.f32.mrb[60].mxu1 }
 0x452   : > { %v2968_v29 = vadd.f32 %v2967_v24, %v5548_v59  ;;  %v2969_v38 = vpop.f32.mrb[61].mxu1  ;;  %v3052_v43 = vpack.c.bf16 %v3034_v23, %v3032_v20 }
 0x453   : > { %v2970_v31 = vadd.f32 %v2969_v38, %v5551_v61  ;;  %v2971_v21 = vpop.f32.mrb[62].mxu1  ;;  %v3053_v52 = vpack.c.bf16 %v3035_v28, %v3033_v50 }
 0x454   : > { %v3004_v32 = vmul.f32 0.2, %v2968_v29  ;;  %v2972_v57 = vadd.f32 %v2971_v21, %v5548_v59  ;;  %v2973_v51 = vpop.f32.mrb[63].mxu1  ;;  %v4547_v59 = vld [vmem:[%s7059_s8 + $0x68] sm:$0xff]  }
 0x455   : > { %v3005_v53 = vmul.f32 0.2, %v2970_v31  ;;  %v2974_v10 = vadd.f32 %v2973_v51, %v5551_v61  ;;  %3354 = vmatprep.mubr.bf16.mxu0 %v3053_v52  ;;  %v4548_v61 = vld [vmem:[%s7059_s8 + $0x28] sm:$0xff]   ;;  %4181 = vmatprep.subr.bf16.mxu0 %v4547_v59 }
 0x456   : > { %v3006_v62 = vmul.f32 0.2, %v2972_v57  ;;  %3355 = vmatmul.mubr.bf16.gmra.mrb[88].mxu0 %v3052_v43  ;;  %v3036_v26 = vmax.f32 %v2968_v29, %v3004_v32  ;;  %4240 = vmatprep.subr.bf16.mxu1 %v4547_v59 }
 0x457   : > { %v3007_v56 = vmul.f32 0.2, %v2974_v10  ;;  %v3037_v39 = vmax.f32 %v2970_v31, %v3005_v53  ;;  %4182 = vmatpush3.bf16.msra.mxu0 %v4548_v61  ;;  %4248 = vmatpush3.bf16.msra.mxu1 %v4548_v61 }
 0x458   : > { %v3038_v27 = vmax.f32 %v2972_v57, %v3006_v62  ;;  %4183 = vmatprep.subr.bf16.mxu0 %v4549_v35  ;;  %4241 = vmatprep.subr.bf16.mxu1 %v4549_v35 }
 0x459   : > { %v3039_v40 = vmax.f32 %v2974_v10, %v3007_v56 }
 0x45a   : > { %v3054_v33 = vpack.c.bf16 %v3038_v27, %v3036_v26 }
 0x45b   : > { %v3055_v45 = vpack.c.bf16 %v3039_v40, %v3037_v39  ;;  %4184 = vmatpush3.bf16.msra.mxu0 %v4550_v2  ;;  %4249 = vmatpush3.bf16.msra.mxu1 %v4550_v2 }
 0x45c   : > { %4185 = vmatprep.subr.bf16.mxu0 %v4551_v13  ;;  %4242 = vmatprep.subr.bf16.mxu1 %v4551_v13 }
 0x45d   : > { %3364 = vmatprep.mubr.bf16.mxu0 %v3055_v45 }
 0x45e   : > { %3365 = vmatmul.mubr.bf16.gmra.mrb[92].mxu0 %v3054_v33 }
 0x45f   : > { %4186 = vmatpush3.bf16.msra.mxu0 %v4552_v6  ;;  %4250 = vmatpush3.bf16.msra.mxu1 %v4552_v6 }
 0x4f9   : > { %v3296_v0 = vpop.f32.mrb[64].mxu0 }
 0x4fa   : > { %v3297_v17 = vadd.f32 %v3296_v0, %v5613_v7  ;;  %v3298_v37 = vpop.f32.mrb[65].mxu0 }
 0x4fb   : > { %v3299_v4 = vadd.f32 %v3298_v37, %v5616_v15  ;;  %v3300_v55 = vpop.f32.mrb[66].mxu0 }
 0x4fc   : > { %v3375_v22 = vmul.f32 0.2, %v3297_v17  ;;  %v3301_v58 = vadd.f32 %v3300_v55, %v5613_v7  ;;  %v3302_v44 = vpop.f32.mrb[67].mxu0 }
 0x4fd   : > { %v3376_v42 = vmul.f32 0.2, %v3299_v4  ;;  %v3303_v47 = vadd.f32 %v3302_v44, %v5616_v15 }
 0x4fe   : > { %v3377_v34 = vmul.f32 0.2, %v3301_v58  ;;  %v3407_v12 = vmax.f32 %v3297_v17, %v3375_v22 }
 0x4ff   : > { %v3378_v3 = vmul.f32 0.2, %v3303_v47  ;;  %v3408_v11 = vmax.f32 %v3299_v4, %v3376_v42 }
 0x500   : > { %v3409_v46 = vmax.f32 %v3301_v58, %v3377_v34 }
 0x501   : > { %v3410_v48 = vmax.f32 %v3303_v47, %v3378_v3  ;;  %v3306_v18 = vpop.f32.mrb[68].mxu0 }
 0x502   : > { %v3439_v20 = vpack.c.bf16 %v3409_v46, %v3407_v12  ;;  %v3307_v23 = vadd.f32 %v3306_v18, %v5613_v7  ;;  %v3308_v50 = vpop.f32.mrb[69].mxu0 }
 0x503   : > { %v3309_v28 = vadd.f32 %v3308_v50, %v5616_v15  ;;  %v3310_v24 = vpop.f32.mrb[70].mxu0  ;;  %v3440_v29 = vpack.c.bf16 %v3410_v48, %v3408_v11 }
 0x504   : > { %v3379_v38 = vmul.f32 0.2, %v3307_v23  ;;  %v3311_v43 = vadd.f32 %v3310_v24, %v5613_v7  ;;  %v3312_v31 = vpop.f32.mrb[71].mxu0 }
 0x505   : > { %v3380_v21 = vmul.f32 0.2, %v3309_v28  ;;  %v3313_v52 = vadd.f32 %v3312_v31, %v5616_v15  ;;  %3622 = vmatprep.mubr.bf16.mxu0 %v3440_v29 }
 0x506   : > { %v3381_v32 = vmul.f32 0.2, %v3311_v43  ;;  %3623 = vmatmul.mubr.bf16.vlgmr.msra.gmra.mrb[96].mxu0 %v3439_v20  ;;  %v3411_v51 = vmax.f32 %v3307_v23, %v3379_v38 }
 0x507   : > { %v3382_v57 = vmul.f32 0.2, %v3313_v52  ;;  %v3412_v10 = vmax.f32 %v3309_v28, %v3380_v21 }
 0x508   : > { %v3413_v53 = vmax.f32 %v3311_v43, %v3381_v32 }
 0x509   : > { %v3414_v62 = vmax.f32 %v3313_v52, %v3382_v57  ;;  %v3316_v56 = vpop.f32.mrb[72].mxu0 }
 0x50a   : > { %v3317_v26 = vadd.f32 %v3316_v56, %v5613_v7  ;;  %v3318_v27 = vpop.f32.mrb[73].mxu0  ;;  %v3441_v39 = vpack.c.bf16 %v3413_v53, %v3411_v51 }
 0x50b   : > { %v3319_v40 = vadd.f32 %v3318_v27, %v5616_v15  ;;  %v3320_v33 = vpop.f32.mrb[74].mxu0  ;;  %v3442_v45 = vpack.c.bf16 %v3414_v62, %v3412_v10 }
 0x50c   : > { %v3383_v59 = vmul.f32 0.2, %v3317_v26  ;;  %v3321_v61 = vadd.f32 %v3320_v33, %v5613_v7  ;;  %v3322_v35 = vpop.f32.mrb[75].mxu0 }
 0x50d   : > { %v3384_v2 = vmul.f32 0.2, %v3319_v40  ;;  %v3323_v13 = vadd.f32 %v3322_v35, %v5616_v15  ;;  %3630 = vmatprep.mubr.bf16.mxu0 %v3442_v45 }
 0x50e   : > { %v3385_v6 = vmul.f32 0.2, %v3321_v61  ;;  %3631 = vmatmul.mubr.bf16.gmra.mrb[100].mxu0 %v3441_v39  ;;  %v3415_v0 = vmax.f32 %v3317_v26, %v3383_v59 }
 0x50f   : > { %v3386_v41 = vmul.f32 0.2, %v3323_v13  ;;  %v3416_v37 = vmax.f32 %v3319_v40, %v3384_v2 }
 0x510   : > { %v3417_v17 = vmax.f32 %v3321_v61, %v3385_v6 }
 0x511   : > { %v3418_v4 = vmax.f32 %v3323_v13, %v3386_v41  ;;  %v3326_v55 = vpop.f32.mrb[76].mxu0 }
 0x512   : > { %v3327_v22 = vadd.f32 %v3326_v55, %v5613_v7  ;;  %v3328_v58 = vpop.f32.mrb[77].mxu0  ;;  %v3443_v44 = vpack.c.bf16 %v3417_v17, %v3415_v0 }
 0x513   : > { %v3329_v42 = vadd.f32 %v3328_v58, %v5616_v15  ;;  %v3330_v47 = vpop.f32.mrb[78].mxu0  ;;  %v3444_v34 = vpack.c.bf16 %v3418_v4, %v3416_v37 }
 0x514   : > { %v3387_v3 = vmul.f32 0.2, %v3327_v22  ;;  %v3331_v12 = vadd.f32 %v3330_v47, %v5613_v7  ;;  %v3332_v46 = vpop.f32.mrb[79].mxu0 }
 0x515   : > { %v3388_v11 = vmul.f32 0.2, %v3329_v42  ;;  %v3333_v48 = vadd.f32 %v3332_v46, %v5616_v15  ;;  %3638 = vmatprep.mubr.bf16.mxu0 %v3444_v34 }
 0x516   : > { %v3389_v18 = vmul.f32 0.2, %v3331_v12  ;;  %3639 = vmatmul.mubr.bf16.gmra.mrb[104].mxu0 %v3443_v44  ;;  %v3419_v23 = vmax.f32 %v3327_v22, %v3387_v3 }
 0x517   : > { %v3390_v20 = vmul.f32 0.2, %v3333_v48  ;;  %v3420_v28 = vmax.f32 %v3329_v42, %v3388_v11 }
 0x518   : > { %v3421_v50 = vmax.f32 %v3331_v12, %v3389_v18 }
 0x519   : > { %v3422_v24 = vmax.f32 %v3333_v48, %v3390_v20  ;;  %v3336_v29 = vpop.f32.mrb[80].mxu0 }
 0x51a   : > { %v3445_v38 = vpack.c.bf16 %v3421_v50, %v3419_v23  ;;  %v3337_v43 = vadd.f32 %v3336_v29, %v5613_v7  ;;  %v3338_v31 = vpop.f32.mrb[81].mxu0 }
 0x51b   : > { %v3339_v21 = vadd.f32 %v3338_v31, %v5616_v15  ;;  %v3340_v52 = vpop.f32.mrb[82].mxu0  ;;  %v3446_v32 = vpack.c.bf16 %v3422_v24, %v3420_v28 }
 0x51c   : > { %v3391_v57 = vmul.f32 0.2, %v3337_v43  ;;  %v3341_v51 = vadd.f32 %v3340_v52, %v5613_v7  ;;  %v3342_v53 = vpop.f32.mrb[83].mxu0 }
 0x51d   : > { %v3392_v10 = vmul.f32 0.2, %v3339_v21  ;;  %v3343_v62 = vadd.f32 %v3342_v53, %v5616_v15  ;;  %3646 = vmatprep.mubr.bf16.mxu1 %v3446_v32 }
 0x51e   : > { %v3393_v56 = vmul.f32 0.2, %v3341_v51  ;;  %3647 = vmatmul.mubr.bf16.vlgmr.msra.gmra.mrb[64].mxu1 %v3445_v38  ;;  %v3423_v27 = vmax.f32 %v3337_v43, %v3391_v57 }
 0x51f   : > { %v3394_v26 = vmul.f32 0.2, %v3343_v62  ;;  %v3424_v40 = vmax.f32 %v3339_v21, %v3392_v10 }
 0x520   : > { %v3425_v39 = vmax.f32 %v3341_v51, %v3393_v56 }
 0x521   : > { %v3426_v33 = vmax.f32 %v3343_v62, %v3394_v26  ;;  %v3346_v45 = vpop.f32.mrb[84].mxu0 }
 0x522   : > { %v3347_v59 = vadd.f32 %v3346_v45, %v5613_v7  ;;  %v3348_v61 = vpop.f32.mrb[85].mxu0  ;;  %v3447_v35 = vpack.c.bf16 %v3425_v39, %v3423_v27 }
 0x523   : > { %v3349_v2 = vadd.f32 %v3348_v61, %v5616_v15  ;;  %v3350_v13 = vpop.f32.mrb[86].mxu0  ;;  %v3448_v6 = vpack.c.bf16 %v3426_v33, %v3424_v40 }
 0x524   : > { %v3395_v41 = vmul.f32 0.2, %v3347_v59  ;;  %v3351_v0 = vadd.f32 %v3350_v13, %v5613_v7  ;;  %v3352_v17 = vpop.f32.mrb[87].mxu0 }
 0x525   : > { %v3396_v37 = vmul.f32 0.2, %v3349_v2  ;;  %v3353_v4 = vadd.f32 %v3352_v17, %v5616_v15  ;;  %3654 = vmatprep.mubr.bf16.mxu1 %v3448_v6 }
 0x526   : > { %v3397_v55 = vmul.f32 0.2, %v3351_v0  ;;  %3655 = vmatmul.mubr.bf16.gmra.mrb[68].mxu1 %v3447_v35  ;;  %v3427_v58 = vmax.f32 %v3347_v59, %v3395_v41 }
 0x527   : > { %v3398_v22 = vmul.f32 0.2, %v3353_v4  ;;  %v3428_v42 = vmax.f32 %v3349_v2, %v3396_v37 }
 0x528   : > { %v3429_v44 = vmax.f32 %v3351_v0, %v3397_v55 }
 0x529   : > { %v3430_v47 = vmax.f32 %v3353_v4, %v3398_v22  ;;  %v3356_v34 = vpop.f32.mrb[88].mxu0 }
 0x52a   : > { %v3357_v3 = vadd.f32 %v3356_v34, %v5613_v7  ;;  %v3358_v12 = vpop.f32.mrb[89].mxu0  ;;  %v3449_v46 = vpack.c.bf16 %v3429_v44, %v3427_v58 }
 0x52b   : > { %v3359_v11 = vadd.f32 %v3358_v12, %v5616_v15  ;;  %v3360_v48 = vpop.f32.mrb[90].mxu0  ;;  %v3450_v18 = vpack.c.bf16 %v3430_v47, %v3428_v42 }
 0x52c   : > { %v3399_v20 = vmul.f32 0.2, %v3357_v3  ;;  %v3361_v23 = vadd.f32 %v3360_v48, %v5613_v7  ;;  %v3362_v50 = vpop.f32.mrb[91].mxu0  ;;  %v532_v48 = vld [vmem:[%s5080_s23 + $0x18] sm:$0xff] }
 0x52d   : > { %v3400_v28 = vmul.f32 0.2, %v3359_v11  ;;  %v3363_v24 = vadd.f32 %v3362_v50, %v5616_v15  ;;  %3662 = vmatprep.mubr.bf16.mxu1 %v3450_v18  ;;  %v534_v50 = vld [vmem:[%s5080_s23 + $0x28] sm:$0xff] }
 0x52e   : > { %v3401_v29 = vmul.f32 0.2, %v3361_v23  ;;  %3663 = vmatmul.mubr.bf16.gmra.mrb[72].mxu1 %v3449_v46  ;;  %v3431_v43 = vmax.f32 %v3357_v3, %v3399_v20  ;;  %v529_v3 = vld [vmem:[%s5080_s23] sm:$0xff]  ;;  %v530_v46 = vld [vmem:[%s5080_s23 + $0x8] sm:$0xff] }
 0x52f   : > { %v3402_v38 = vmul.f32 0.2, %v3363_v24  ;;  %v3432_v21 = vmax.f32 %v3359_v11, %v3400_v28  ;;  %v531_v11 = vld [vmem:[%s5080_s23 + $0x10] sm:$0xff] }
 0x530   : > { %v3433_v31 = vmax.f32 %v3361_v23, %v3401_v29  ;;  %v533_v23 = vld [vmem:[%s5080_s23 + $0x20] sm:$0xff]  ;;  %v535_v28 = vld [vmem:[%s5080_s23 + $0x30] sm:$0xff] }
 0x531   : > { %v3434_v52 = vmax.f32 %v3363_v24, %v3402_v38  ;;  %v3366_v32 = vpop.f32.mrb[92].mxu0  ;;  %v536_v24 = vld [vmem:[%s5080_s23 + $0x38] sm:$0xff]  ;;  %v537_v29 = vld [vmem:[%s5080_s23 + $0x40] sm:$0xff]  ;;  %v538_v38 = vld [vmem:[%s5080_s23 + $0x48] sm:$0xff] }
 0x532   : > { %v3367_v57 = vadd.f32 %v3366_v32, %v5613_v7  ;;  %v3368_v51 = vpop.f32.mrb[93].mxu0  ;;  %v3451_v53 = vpack.c.bf16 %v3433_v31, %v3431_v43  ;;  %v539_v43 = vld [vmem:[%s5080_s23 + $0x50] sm:$0xff]  ;;  %v540_v31 = vld [vmem:[%s5080_s23 + $0x58] sm:$0xff] }
 0x533   : > { %v3369_v10 = vadd.f32 %v3368_v51, %v5616_v15  ;;  %v3370_v62 = vpop.f32.mrb[94].mxu0  ;;  %v3452_v56 = vpack.c.bf16 %v3434_v52, %v3432_v21  ;;  %v541_v21 = vld [vmem:[%s5080_s23 + $0x60] sm:$0xff]  ;;  %v4617_v32 = vld [vmem:[%s5108_s25 + $0x50] sm:$0xff]  ;;  %v542_v51 = vld [vmem:[%s5080_s23 + $0x68] sm:$0xff] }
 0x534   : > { %v3403_v26 = vmul.f32 0.2, %v3367_v57  ;;  %v3371_v27 = vadd.f32 %v3370_v62, %v5613_v7  ;;  %v3372_v39 = vpop.f32.mrb[95].mxu0  ;;  %v5653_v7 = vld [vmem:[%s7060_s9] ss:$0 sm:$0xff]  ;;  %v659_v62 = vld [vmem:[%s5073_s22 + $0x10] sm:$0xff] }
 0x535   : > { %v3404_v40 = vmul.f32 0.2, %v3369_v10  ;;  %v3373_v33 = vadd.f32 %v3372_v39, %v5616_v15  ;;  %3670 = vmatprep.mubr.bf16.mxu1 %v3452_v56  ;;  %v657_v52 = vld [vmem:[%s5073_s22] sm:$0xff]  ;;  %v660_v56 = vld [vmem:[%s5073_s22 + $0x18] sm:$0xff] }
 0x536   : > { %v3405_v45 = vmul.f32 0.2, %v3371_v27  ;;  %3671 = vmatmul.mubr.bf16.gmra.mrb[76].mxu1 %v3451_v53  ;;  %v3435_v61 = vmax.f32 %v3367_v57, %v3403_v26  ;;  %v5685_v57 = vmul.f32 1.442695, %v4617_v32  ;;  %v543_v53 = vld [vmem:[%s5080_s23 + $0x70] sm:$0xff]  ;;  %v785_v26 = vsub.f32 %v529_v3, %v657_v52  ;;  %v669_v52 = vld [vmem:[%s5073_s22 + $0x60] sm:$0xff] }
 0x537   : > { %v3406_v59 = vmul.f32 0.2, %v3373_v33  ;;  %v3436_v2 = vmax.f32 %v3369_v10, %v3404_v40  ;;  %v658_v10 = vld [vmem:[%s5073_s22 + $0x8] sm:$0xff]  ;;  %v544_v40 = vld [vmem:[%s5080_s23 + $0x78] sm:$0xff] }
 0x538   : > { %v3437_v35 = vmax.f32 %v3371_v27, %v3405_v45  ;;  %7136 = vst [vmem:[#allocation34_spill] sm:$0xff] %v5685_v57  ;;  %v546_v45 = vld [vmem:[%s5080_s23 + $0x88] sm:$0xff]  ;;  %v5718_v3 = vmul.f32 %v785_v26, %v785_v26  ;;  %v555_v26 = vld [vmem:[%s5080_s23 + $0xd0] sm:$0xff]  ;;  %v692_v57 = vld [vmem:[%s5073_s22 + $0x118] sm:$0xff] }
 0x539   : > { %v3438_v13 = vmax.f32 %v3373_v33, %v3406_v59  ;;  %v545_v33 = vld [vmem:[%s5080_s23 + $0x80] sm:$0xff]  ;;  %v547_v59 = vld [vmem:[%s5080_s23 + $0x90] sm:$0xff] }
 0x53a   : > { %v3453_v6 = vpack.c.bf16 %v3437_v35, %v3435_v61  ;;  %v661_v61 = vld [vmem:[%s5073_s22 + $0x20] sm:$0xff]  ;;  %v662_v35 = vld [vmem:[%s5073_s22 + $0x28] sm:$0xff]  ;;  %7138 = vst [vmem:[#allocation36_spill] sm:$0xff] %v5718_v3  ;;  %v5769_v16 = vsub.f32 %v545_v33, %v673_v63 }
 0x53b   : > { %v3454_v41 = vpack.c.bf16 %v3438_v13, %v3436_v2  ;;  %v663_v2 = vld [vmem:[%s5073_s22 + $0x30] sm:$0xff]  ;;  %v786_v13 = vsub.f32 %v530_v46, %v658_v10  ;;  %v681_v63 = vld [vmem:[%s5073_s22 + $0xc0] sm:$0xff] }
 0x53c   : > { %v581_v3 = vld [vmem:[%s5080_s23 + $0x1a0] sm:$0xff] }
 0x53d   : > { %3678 = vmatprep.mubr.bf16.mxu1 %v3454_v41  ;;  %v5704_v41 = vsub.f32 %v532_v48, %v660_v56  ;;  %v552_v48 = vld [vmem:[%s5080_s23 + $0xb8] sm:$0xff]  ;;  %v554_v56 = vld [vmem:[%s5080_s23 + $0xc8] sm:$0xff] }
 0x53e   : > { %3679 = vmatmul.mubr.bf16.gmra.mrb[80].mxu1 %v3453_v6  ;;  %v5702_v6 = vsub.f32 %v531_v11, %v659_v62  ;;  %v551_v11 = vld [vmem:[%s5080_s23 + $0xb0] sm:$0xff] }
 0x5d9   : > { %v4187_v0 = vpop.f32.mrb[96].mxu0 }
 0x5da   : > { %v4188_v17 = vpop.f32.mrb[97].mxu0 }
 0x5db   : > { %v4189_v15 = vadd.f32 %v4188_v17, %v4187_v0  ;;  %v4190_v37 = vpop.f32.mrb[98].mxu0  ;;  %v548_v17 = vld [vmem:[%s5080_s23 + $0x98] sm:$0xff] }
 0x5dc   : > { %v4191_v4 = vpop.f32.mrb[99].mxu0 }
 0x5dd   : > { %v4192_v55 = vadd.f32 %v4191_v4, %v4190_v37  ;;  %v5656_v22 = vadd.f32 %v4189_v15, %v5653_v7  ;;  %v549_v15 = vld [vmem:[%s5080_s23 + $0xa0] sm:$0xff]  ;;  %v550_v37 = vld [vmem:[%s5080_s23 + $0xa8] sm:$0xff]  ;;  %v664_v4 = vld [vmem:[%s5073_s22 + $0x38] sm:$0xff] }
 0x5df   : > { %7133 = vst [vmem:[#allocation31_spill] sm:$0xff] %v5656_v22  ;;  %3703 = vrot.lane.b32.xlu0 %v5656_v22, %s4815_s30  ;;  %v5661_v58 = vadd.f32 %v4192_v55, %v5653_v7  ;;  %v665_v55 = vld [vmem:[%s5073_s22 + $0x40] sm:$0xff]  ;;  %v575_v22 = vld [vmem:[%s5080_s23 + $0x170] sm:$0xff] }
 0x5e0   : > { %v5730_v32 = vsub.f32 %v537_v29, %v665_v55 }
 0x5e1   : > { %7134 = vst [vmem:[#allocation32_spill] sm:$0xff] %v5661_v58  ;;  %v4193_v44 = vpop.f32.mrb[100].mxu0 }
 0x5e2   : > { %v4194_v42 = vpop.f32.mrb[101].mxu0 }
 0x5e3   : > { %v4195_v47 = vadd.f32 %v4194_v42, %v4193_v44  ;;  %v4196_v34 = vpop.f32.mrb[102].mxu0  ;;  %3705 = vrot.lane.b32.xlu0 %v5661_v58, %s4815_s30  ;;  %v666_v44 = vld [vmem:[%s5073_s22 + $0x48] sm:$0xff]  ;;  %v5712_v42 = vsub.f32 %v533_v23, %v661_v61  ;;  %v667_v23 = vld [vmem:[%s5073_s22 + $0x50] sm:$0xff]  ;;  %v576_v58 = vld [vmem:[%s5080_s23 + $0x178] sm:$0xff] }
 0x5e4   : > { %v4197_v12 = vpop.f32.mrb[103].mxu0  ;;  %v5732_v10 = vsub.f32 %v538_v38, %v666_v44  ;;  %v670_v61 = vld [vmem:[%s5073_s22 + $0x68] sm:$0xff]  ;;  %v5744_v38 = vsub.f32 %v541_v21, %v669_v52  ;;  %v557_v44 = vld [vmem:[%s5080_s23 + $0xe0] sm:$0xff] }
 0x5e5   : > { %v4198_v18 = vadd.f32 %v4197_v12, %v4196_v34  ;;  %v5670_v20 = vadd.f32 %v4195_v47, %v5653_v7  ;;  %v5714_v47 = vsub.f32 %v534_v50, %v662_v35  ;;  %v5716_v34 = vsub.f32 %v535_v28, %v663_v2  ;;  %v668_v50 = vld [vmem:[%s5073_s22 + $0x58] sm:$0xff]  ;;  %v671_v35 = vld [vmem:[%s5073_s22 + $0x70] sm:$0xff]  ;;  %v677_v52 = vld [vmem:[%s5073_s22 + $0xa0] sm:$0xff] }
 0x5e6   : > { %v5728_v28 = vsub.f32 %v536_v24, %v664_v4  ;;  %v672_v2 = vld [vmem:[%s5073_s22 + $0x78] sm:$0xff]  ;;  %v5740_v24 = vsub.f32 %v539_v43, %v667_v23  ;;  %v5742_v29 = vsub.f32 %v540_v31, %v668_v50  ;;  %v674_v43 = vld [vmem:[%s5073_s22 + $0x88] sm:$0xff]  ;;  %v675_v23 = vld [vmem:[%s5073_s22 + $0x90] sm:$0xff]  ;;  %v5757_v31 = vsub.f32 %v542_v51, %v670_v61 }
 0x5e7   : > { %7135 = vst [vmem:[#allocation33_spill] sm:$0xff] %v5670_v20  ;;  %3707 = vrot.lane.b32.xlu1 %v5670_v20, %s4815_s30  ;;  %v5693_v27 = vadd.f32 %v4198_v18, %v5653_v7  ;;  %v553_v18 = vld [vmem:[%s5080_s23 + $0xc0] sm:$0xff]  ;;  %v5759_v21 = vsub.f32 %v543_v53, %v671_v35  ;;  %v5767_v19 = vsub.f32 %v544_v40, %v672_v2  ;;  %v563_v35 = vld [vmem:[%s5080_s23 + $0x110] sm:$0xff] }
 0x5e8   : > { %v561_v50 = vld [vmem:[%s5080_s23 + $0x100] sm:$0xff]  ;;  %v5771_v51 = vsub.f32 %v546_v45, %v674_v43  ;;  %v5773_v53 = vsub.f32 %v547_v59, %v675_v23  ;;  %v679_v2 = vld [vmem:[%s5073_s22 + $0xb0] sm:$0xff]  ;;  %v5788_v45 = vsub.f32 %v549_v15, %v677_v52  ;;  %v682_v23 = vld [vmem:[%s5073_s22 + $0xc8] sm:$0xff]  ;;  %v5809_v15 = vmul.f32 %v5702_v6, %v5702_v6 }
 0x5e9   : > { %7137 = vst [vmem:[#allocation35_spill] sm:$0xff] %v5693_v27  ;;  %v4199_v39 = vpop.f32.mrb[104].mxu0  ;;  %v565_v40 = vld [vmem:[%s5080_s23 + $0x120] sm:$0xff]  ;;  %v5796_v43 = vld [vmem:[%s5080_s23 + $0x130] sm:$0xff]  ;;  %v5801_v60 = vsub.f32 %v551_v11, %v679_v2  ;;  %v568_v52 = vld [vmem:[%s5080_s23 + $0x138] sm:$0xff]  ;;  %v5822_v6 = vsub.f32 %v555_v26, %v683_v30 }
 0x5ea   : > { %v4200_v0 = vpop.f32.mrb[105].mxu0  ;;  %7142 = vst [vmem:[#allocation40_spill] sm:$0xff] %v5809_v15  ;;  %v569_v11 = vld [vmem:[%s5080_s23 + $0x140] sm:$0xff]  ;;  %v687_v2 = vld [vmem:[%s5073_s22 + $0xf0] sm:$0xff]  ;;  %v690_v30 = vld [vmem:[%s5073_s22 + $0x108] sm:$0xff] }
 0x5eb   : > { %v4201_v12 = vadd.f32 %v4200_v0, %v4199_v39  ;;  %v4202_v46 = vpop.f32.mrb[106].mxu0  ;;  %3709 = vrot.lane.b32.xlu1 %v5693_v27, %s4815_s30  ;;  %v556_v39 = vld [vmem:[%s5080_s23 + $0xd8] sm:$0xff]  ;;  %v5746_v0 = vmul.f32 %v786_v13, %v786_v13  ;;  %v573_v27 = vld [vmem:[%s5080_s23 + $0x160] sm:$0xff]  ;;  %v695_v15 = vld [vmem:[%s5073_s22 + $0x130] sm:$0xff] }
 0x5ec   : > { %v4203_v62 = vpop.f32.mrb[107].mxu0  ;;  %v560_v13 = vld [vmem:[%s5080_s23 + $0xf8] sm:$0xff] }
 0x5ed   : > { %7139 = vst [vmem:[#allocation37_spill] sm:$0xff] %v5746_v0  ;;  %v5749_v4 = vadd.f32 %v4201_v12, %v5653_v7  ;;  %v4204_v55 = vadd.f32 %v4203_v62, %v4202_v46  ;;  %v562_v12 = vld [vmem:[%s5080_s23 + $0x108] sm:$0xff]  ;;  %v676_v46 = vld [vmem:[%s5073_s22 + $0x98] sm:$0xff] }
 0x5ee   : > { %v678_v62 = vld [vmem:[%s5073_s22 + $0xa8] sm:$0xff]  ;;  %v5786_v33 = vsub.f32 %v548_v17, %v676_v46  ;;  %v5803_v17 = vsub.f32 %v552_v48, %v680_v36  ;;  %v5805_v46 = vsub.f32 %v553_v18, %v681_v63  ;;  %v571_v48 = vld [vmem:[%s5080_s23 + $0x150] sm:$0xff]  ;;  %v685_v18 = vld [vmem:[%s5073_s22 + $0xe0] sm:$0xff]  ;;  %v5820_v63 = vsub.f32 %v554_v56, %v682_v23 }
 0x5ef   : > { %7140 = vst [vmem:[#allocation38_spill] sm:$0xff] %v5749_v4  ;;  %v5776_v61 = vadd.f32 %v4204_v55, %v5653_v7  ;;  %3711 = vrot.lane.b32.xlu0 %v5749_v4, %s4815_s30  ;;  %v5790_v59 = vsub.f32 %v550_v37, %v678_v62  ;;  %v5793_v55 = vld [vmem:[%s5080_s23 + $0x128] sm:$0xff]  ;;  %v684_v4 = vld [vmem:[%s5073_s22 + $0xd8] sm:$0xff]  ;;  %v689_v23 = vld [vmem:[%s5073_s22 + $0x100] sm:$0xff]  ;;  %v5836_v26 = vsub.f32 %v557_v44, %v685_v18 }
 0x5f0   : > { %v570_v36 = vld [vmem:[%s5080_s23 + $0x148] sm:$0xff]  ;;  %v5824_v25 = vsub.f32 %v556_v39, %v684_v4  ;;  %v688_v56 = vld [vmem:[%s5073_s22 + $0xf8] sm:$0xff]  ;;  %v5840_v4 = vsub.f32 %v559_v1, %v687_v2  ;;  %v577_v44 = vld [vmem:[%s5080_s23 + $0x180] sm:$0xff]  ;;  %v5854_v1 = vsub.f32 %v561_v50, %v689_v23  ;;  %v5856_v2 = vsub.f32 %v562_v12, %v690_v30 }
 0x5f1   : > { %7141 = vst [vmem:[#allocation39_spill] sm:$0xff] %v5776_v61  ;;  %v4205_v37 = vpop.f32.mrb[64].mxu1  ;;  %3713 = vrot.lane.b32.xlu1 %v5776_v61, %s4815_s30  ;;  %v686_v62 = vld [vmem:[%s5073_s22 + $0xe8] sm:$0xff]  ;;  %v5828_v61 = vmul.f32 %v5704_v41, %v5704_v41  ;;  %v5844_v41 = vmul.f32 %v5712_v42, %v5712_v42  ;;  %v691_v18 = vld [vmem:[%s5073_s22 + $0x110] sm:$0xff]  ;;  %v696_v0 = vld [vmem:[%s5073_s22 + $0x138] sm:$0xff]  ;;  %v5866_v50 = vsub.f32 %v564_v9, %v692_v57 }
 0x5f2   : > { %v4206_v54 = vpop.f32.mrb[65].mxu1  ;;  %v5838_v39 = vsub.f32 %v558_v14, %v686_v62  ;;  %v693_v14 = vld [vmem:[%s5073_s22 + $0x120] sm:$0xff]  ;;  %v5852_v62 = vsub.f32 %v560_v13, %v688_v56  ;;  %7145 = vst [vmem:[#allocation43_spill] sm:$0xff] %v5856_v2  ;;  %v5864_v13 = vsub.f32 %v563_v35, %v691_v18  ;;  %v5872_v56 = vmul.f32 %v5714_v47, %v5714_v47  ;;  %v582_v2 = vld [vmem:[%s5080_s23 + $0x1a8] sm:$0xff]  ;;  %v583_v35 = vld [vmem:[%s5080_s23 + $0x1b0] sm:$0xff] }
 0x5f3   : > { %7143 = vst [vmem:[#allocation41_spill] sm:$0xff] %v5828_v61  ;;  %7144 = vst [vmem:[#allocation42_spill] sm:$0xff] %v5844_v41  ;;  %v4207_v8 = vadd.f32 %v4206_v54, %v4205_v37  ;;  %v4208_v20 = vpop.f32.mrb[66].mxu1  ;;  %v578_v54 = vld [vmem:[%s5080_s23 + $0x188] sm:$0xff]  ;;  %v579_v37 = vld [vmem:[%s5080_s23 + $0x190] sm:$0xff]  ;;  %v5868_v12 = vsub.f32 %v565_v40, %v693_v14  ;;  %v5887_v47 = vsub.f32 %v5796_v43, %v695_v15 }
 0x5f4   : > { %v4209_v42 = vpop.f32.mrb[67].mxu1  ;;  %v580_v41 = vld [vmem:[%s5080_s23 + $0x198] sm:$0xff]  ;;  %v694_v61 = vld [vmem:[%s5073_s22 + $0x128] sm:$0xff]  ;;  %7146 = vst [vmem:[#allocation44_spill] sm:$0xff] %v5864_v13  ;;  %7147 = vst [vmem:[#allocation45_spill] sm:$0xff] %v5866_v50 }
 0x5f5   : > { %7148 = vst [vmem:[#allocation46_spill] sm:$0xff] %v5868_v12  ;;  %7149 = vst [vmem:[#allocation47_spill] sm:$0xff] %v5872_v56  ;;  %v5875_v23 = vadd.f32 %v4207_v8, %v5653_v7  ;;  %v4210_v30 = vadd.f32 %v4209_v42, %v4208_v20  ;;  %v697_v18 = vld [vmem:[%s5073_s22 + $0x140] sm:$0xff]  ;;  %v698_v13 = vld [vmem:[%s5073_s22 + $0x148] sm:$0xff]  ;;  %v5884_v57 = vsub.f32 %v5793_v55, %v694_v61 }
 0x5f6   : > { %v699_v9 = vld [vmem:[%s5073_s22 + $0x150] sm:$0xff]  ;;  %7151 = vst [vmem:[#allocation49_spill] sm:$0xff] %v5887_v47  ;;  %v584_v40 = vld [vmem:[%s5080_s23 + $0x1b8] sm:$0xff]  ;;  %v585_v8 = vld [vmem:[%s5080_s23 + $0x1c0] sm:$0xff]  ;;  %v5895_v12 = vsub.f32 %v568_v52, %v696_v0  ;;  %v5897_v50 = vsub.f32 %v569_v11, %v697_v18  ;;  %v5899_v61 = vsub.f32 %v570_v36, %v698_v13 }
 0x5f7   : > { %7150 = vst [vmem:[#allocation48_spill] sm:$0xff] %v5875_v23  ;;  %v586_v20 = vld [vmem:[%s5080_s23 + $0x1c8] sm:$0xff]  ;;  %v700_v14 = vld [vmem:[%s5073_s22 + $0x158] sm:$0xff]  ;;  %v701_v42 = vld [vmem:[%s5073_s22 + $0x160] sm:$0xff]  ;;  %v5901_v55 = vsub.f32 %v571_v48, %v699_v9  ;;  %v5904_v43 = vadd.f32 %v4210_v30, %v5653_v7  ;;  %3715 = vrot.lane.b32.xlu0 %v5875_v23, %s4815_s30 }
 0x5f8   : > { %v702_v56 = vld [vmem:[%s5073_s22 + $0x168] sm:$0xff]  ;;  %7152 = vst [vmem:[#allocation50_spill] sm:$0xff] %v5895_v12  ;;  %7153 = vst [vmem:[#allocation51_spill] sm:$0xff] %v5899_v61  ;;  %v587_v15 = vld [vmem:[%s5080_s23 + $0x1d0] sm:$0xff]  ;;  %v5914_v36 = vsub.f32 %v572_v5, %v700_v14  ;;  %v5916_v48 = vsub.f32 %v573_v27, %v701_v42 }
 0x5f9   : > { %7154 = vst [vmem:[#allocation52_spill] sm:$0xff] %v5901_v55  ;;  %7155 = vst [vmem:[#allocation53_spill] sm:$0xff] %v5904_v43  ;;  %v588_v47 = vld [vmem:[%s5080_s23 + $0x1d8] sm:$0xff]  ;;  %v589_v0 = vld [vmem:[%s5080_s23 + $0x1e0] sm:$0xff]  ;;  %v5918_v13 = vsub.f32 %v574_v49, %v702_v56  ;;  %v5937_v49 = vmul.f32 %v5716_v34, %v5716_v34  ;;  %v4211_v27 = vpop.f32.mrb[68].mxu1  ;;  %3717 = vrot.lane.b32.xlu1 %v5904_v43, %s4815_s30  ;;  %v5956_v43 = vmul.f32 %v5728_v28, %v5728_v28 }
 0x5fa   : > { %v703_v52 = vld [vmem:[%s5073_s22 + $0x170] sm:$0xff]  ;;  %v704_v12 = vld [vmem:[%s5073_s22 + $0x178] sm:$0xff]  ;;  %v705_v11 = vld [vmem:[%s5073_s22 + $0x180] sm:$0xff]  ;;  %7156 = vst [vmem:[#allocation54_spill] sm:$0xff] %v5916_v48  ;;  %v5972_v28 = vmul.f32 %v5730_v32, %v5730_v32 }
 0x5fb   : > { %7157 = vst [vmem:[#allocation55_spill] sm:$0xff] %v5918_v13  ;;  %v5921_v30 = vld [vmem:[%s5080_s23 + $0x1e8] sm:$0xff]  ;;  %v5924_v18 = vld [vmem:[%s5080_s23 + $0x1f0] sm:$0xff]  ;;  %v708_v55 = vld [vmem:[%s5073_s22 + $0x198] sm:$0xff]  ;;  %v5929_v61 = vsub.f32 %v575_v22, %v703_v52  ;;  %v5931_v5 = vsub.f32 %v576_v58, %v704_v12  ;;  %v5933_v14 = vsub.f32 %v577_v44, %v705_v11 }
 0x5fc   : > { %v706_v9 = vld [vmem:[%s5073_s22 + $0x188] sm:$0xff]  ;;  %v707_v23 = vld [vmem:[%s5073_s22 + $0x190] sm:$0xff]  ;;  %7161 = vst [vmem:[#allocation59_spill] sm:$0xff] %v5937_v49  ;;  %v592_v56 = vld [vmem:[%s5080_s23 + $0x1f8] sm:$0xff]  ;;  %v5952_v49 = vsub.f32 %v580_v41, %v708_v55 }
 0x5fd   : > { %7158 = vst [vmem:[#allocation56_spill] sm:$0xff] %v5929_v61  ;;  %7159 = vst [vmem:[#allocation57_spill] sm:$0xff] %v5931_v5  ;;  %v593_v22 = vld [vmem:[%s5080_s23 + $0x200] sm:$0xff]  ;;  %v594_v58 = vld [vmem:[%s5080_s23 + $0x208] sm:$0xff]  ;;  %v5948_v11 = vsub.f32 %v578_v54, %v706_v9  ;;  %v5950_v34 = vsub.f32 %v579_v37, %v707_v23 }
 0x5fe   : > { %7160 = vst [vmem:[#allocation58_spill] sm:$0xff] %v5933_v14  ;;  %v595_v12 = vld [vmem:[%s5080_s23 + $0x210] sm:$0xff]  ;;  %v709_v44 = vld [vmem:[%s5073_s22 + $0x1a0] sm:$0xff]  ;;  %v710_v42 = vld [vmem:[%s5073_s22 + $0x1a8] sm:$0xff]  ;;  %v4212_v14 = vpop.f32.mrb[69].mxu1 }
 0x5ff   : > { %v711_v52 = vld [vmem:[%s5073_s22 + $0x1b0] sm:$0xff]  ;;  %7162 = vst [vmem:[#allocation60_spill] sm:$0xff] %v5948_v11  ;;  %7163 = vst [vmem:[#allocation61_spill] sm:$0xff] %v5950_v34  ;;  %v596_v5 = vld [vmem:[%s5080_s23 + $0x218] sm:$0xff]  ;;  %v5964_v23 = vsub.f32 %v581_v3, %v709_v44  ;;  %v5966_v41 = vsub.f32 %v582_v2, %v710_v42 }
 0x600   : > { %7164 = vst [vmem:[#allocation62_spill] sm:$0xff] %v5952_v49  ;;  %7165 = vst [vmem:[#allocation63_spill] sm:$0xff] %v5956_v43  ;;  %v597_v61 = vld [vmem:[%s5080_s23 + $0x220] sm:$0xff]  ;;  %v598_v13 = vld [vmem:[%s5080_s23 + $0x228] sm:$0xff]  ;;  %v5968_v55 = vsub.f32 %v583_v35, %v711_v52  ;;  %v4213_v43 = vadd.f32 %v4212_v14, %v4211_v27  ;;  %v4214_v49 = vpop.f32.mrb[70].mxu1 }
 0x601   : > { %v712_v54 = vld [vmem:[%s5073_s22 + $0x1b8] sm:$0xff]  ;;  %v713_v9 = vld [vmem:[%s5073_s22 + $0x1c0] sm:$0xff]  ;;  %v714_v37 = vld [vmem:[%s5073_s22 + $0x1c8] sm:$0xff]  ;;  %7166 = vst [vmem:[#allocation64_spill] sm:$0xff] %v5964_v23  ;;  %v4215_v32 = vpop.f32.mrb[71].mxu1 }
 0x602   : > { %7167 = vst [vmem:[#allocation65_spill] sm:$0xff] %v5966_v41  ;;  %7168 = vst [vmem:[#allocation66_spill] sm:$0xff] %v5968_v55  ;;  %v599_v34 = vld [vmem:[%s5080_s23 + $0x230] sm:$0xff]  ;;  %v600_v11 = vld [vmem:[%s5080_s23 + $0x238] sm:$0xff]  ;;  %v5980_v42 = vsub.f32 %v584_v40, %v712_v54  ;;  %v5982_v35 = vsub.f32 %v585_v8, %v713_v9  ;;  %v5984_v52 = vsub.f32 %v586_v20, %v714_v37 }
 0x603   : > { %7169 = vst [vmem:[#allocation67_spill] sm:$0xff] %v5972_v28  ;;  %v601_v3 = vld [vmem:[%s5080_s23 + $0x240] sm:$0xff]  ;;  %v715_v44 = vld [vmem:[%s5073_s22 + $0x1d0] sm:$0xff]  ;;  %v716_v23 = vld [vmem:[%s5073_s22 + $0x1d8] sm:$0xff]  ;;  %v6000_v54 = vmul.f32 %v5732_v10, %v5732_v10  ;;  %v6003_v9 = vadd.f32 %v4213_v43, %v5653_v7  ;;  %v4216_v37 = vadd.f32 %v4215_v32, %v4214_v49 }
 0x604   : > { %v717_v2 = vld [vmem:[%s5073_s22 + $0x1e0] sm:$0xff]  ;;  %7170 = vst [vmem:[#allocation68_spill] sm:$0xff] %v5982_v35  ;;  %7171 = vst [vmem:[#allocation69_spill] sm:$0xff] %v5984_v52  ;;  %v602_v14 = vld [vmem:[%s5080_s23 + $0x248] sm:$0xff]  ;;  %v5992_v40 = vsub.f32 %v587_v15, %v715_v44  ;;  %v5994_v8 = vsub.f32 %v588_v47, %v716_v23 }
 0x605   : > { %v603_v27 = vld [vmem:[%s5080_s23 + $0x250] sm:$0xff]  ;;  %v604_v28 = vld [vmem:[%s5080_s23 + $0x258] sm:$0xff]  ;;  %v718_v55 = vld [vmem:[%s5073_s22 + $0x1e8] sm:$0xff]  ;;  %v5996_v20 = vsub.f32 %v589_v0, %v717_v2  ;;  %7175 = vst [vmem:[#allocation73_spill] sm:$0xff] %v6000_v54  ;;  %3719 = vrot.lane.b32.xlu0 %v6003_v9, %s4815_s30 }
 0x606   : > { %v719_v41 = vld [vmem:[%s5073_s22 + $0x1f0] sm:$0xff]  ;;  %v720_v48 = vld [vmem:[%s5073_s22 + $0x1f8] sm:$0xff]  ;;  %7172 = vst [vmem:[#allocation70_spill] sm:$0xff] %v5992_v40  ;;  %7173 = vst [vmem:[#allocation71_spill] sm:$0xff] %v5994_v8  ;;  %v6012_v0 = vsub.f32 %v5921_v30, %v718_v55 }
 0x607   : > { %7174 = vst [vmem:[#allocation72_spill] sm:$0xff] %v5996_v20  ;;  %7176 = vst [vmem:[#allocation74_spill] sm:$0xff] %v6003_v9  ;;  %v605_v52 = vld [vmem:[%s5080_s23 + $0x260] sm:$0xff]  ;;  %v606_v35 = vld [vmem:[%s5080_s23 + $0x268] sm:$0xff]  ;;  %v6015_v10 = vsub.f32 %v5924_v18, %v719_v41  ;;  %v6023_v20 = vsub.f32 %v592_v56, %v720_v48  ;;  %v6032_v41 = vadd.f32 %v4216_v37, %v5653_v7 }
 0x608   : > { %v607_v15 = vld [vmem:[%s5080_s23 + $0x270] sm:$0xff]  ;;  %v721_v44 = vld [vmem:[%s5073_s22 + $0x200] sm:$0xff]  ;;  %v722_v40 = vld [vmem:[%s5073_s22 + $0x208] sm:$0xff] }
 0x609   : > { %v723_v47 = vld [vmem:[%s5073_s22 + $0x210] sm:$0xff]  ;;  %7177 = vst [vmem:[#allocation75_spill] sm:$0xff] %v6015_v10  ;;  %v608_v23 = vld [vmem:[%s5080_s23 + $0x278] sm:$0xff]  ;;  %v609_v43 = vld [vmem:[%s5080_s23 + $0x280] sm:$0xff]  ;;  %v6025_v8 = vsub.f32 %v593_v22, %v721_v44  ;;  %v6027_v30 = vsub.f32 %v594_v58, %v722_v40  ;;  %3721 = vrot.lane.b32.xlu1 %v6032_v41, %s4815_s30 }
 0x60a   : > { %v610_v49 = vld [vmem:[%s5080_s23 + $0x288] sm:$0xff]  ;;  %v724_v2 = vld [vmem:[%s5073_s22 + $0x218] sm:$0xff]  ;;  %v725_v32 = vld [vmem:[%s5073_s22 + $0x220] sm:$0xff]  ;;  %7178 = vst [vmem:[#allocation76_spill] sm:$0xff] %v6023_v20  ;;  %v6029_v18 = vsub.f32 %v595_v12, %v723_v47 }
 0x60b   : > { %v726_v54 = vld [vmem:[%s5073_s22 + $0x228] sm:$0xff]  ;;  %7179 = vst [vmem:[#allocation77_spill] sm:$0xff] %v6027_v30  ;;  %7181 = vst [vmem:[#allocation79_spill] sm:$0xff] %v6032_v41  ;;  %v611_v55 = vld [vmem:[%s5080_s23 + $0x290] sm:$0xff]  ;;  %v6042_v58 = vsub.f32 %v596_v5, %v724_v2  ;;  %v6044_v12 = vsub.f32 %v597_v61, %v725_v32  ;;  %v6065_v61 = vmul.f32 %v5740_v24, %v5740_v24 }
 0x60c   : > { %7180 = vst [vmem:[#allocation78_spill] sm:$0xff] %v6029_v18  ;;  %v612_v10 = vld [vmem:[%s5080_s23 + $0x298] sm:$0xff]  ;;  %v613_v48 = vld [vmem:[%s5080_s23 + $0x2a0] sm:$0xff]  ;;  %v727_v56 = vld [vmem:[%s5073_s22 + $0x230] sm:$0xff]  ;;  %v6046_v40 = vsub.f32 %v598_v13, %v726_v54  ;;  %v4217_v13 = vpop.f32.mrb[72].mxu1  ;;  %v6084_v41 = vmul.f32 %v5742_v29, %v5742_v29  ;;  %v6100_v29 = vmul.f32 %v5744_v38, %v5744_v38 }
 0x60d   : > { %v728_v20 = vld [vmem:[%s5073_s22 + $0x238] sm:$0xff]  ;;  %v729_v22 = vld [vmem:[%s5073_s22 + $0x240] sm:$0xff]  ;;  %7182 = vst [vmem:[#allocation80_spill] sm:$0xff] %v6044_v12  ;;  %v6049_v37 = vld [vmem:[%s5080_s23 + $0x2a8] sm:$0xff]  ;;  %v6057_v30 = vsub.f32 %v599_v34, %v727_v56 }
 0x60e   : > { %7183 = vst [vmem:[#allocation81_spill] sm:$0xff] %v6046_v40  ;;  %v6052_v44 = vld [vmem:[%s5080_s23 + $0x2b0] sm:$0xff]  ;;  %v730_v47 = vld [vmem:[%s5073_s22 + $0x248] sm:$0xff]  ;;  %v732_v18 = vld [vmem:[%s5073_s22 + $0x258] sm:$0xff]  ;;  %v6059_v5 = vsub.f32 %v600_v11, %v728_v20  ;;  %v6061_v2 = vsub.f32 %v601_v3, %v729_v22 }
 0x60f   : > { %v731_v9 = vld [vmem:[%s5073_s22 + $0x250] sm:$0xff]  ;;  %7184 = vst [vmem:[#allocation82_spill] sm:$0xff] %v6057_v30  ;;  %7187 = vst [vmem:[#allocation85_spill] sm:$0xff] %v6065_v61  ;;  %v616_v54 = vld [vmem:[%s5080_s23 + $0x2b8] sm:$0xff]  ;;  %v6076_v22 = vsub.f32 %v602_v14, %v730_v47  ;;  %v6080_v61 = vsub.f32 %v604_v28, %v732_v18 }
 0x610   : > { %7185 = vst [vmem:[#allocation83_spill] sm:$0xff] %v6059_v5  ;;  %7186 = vst [vmem:[#allocation84_spill] sm:$0xff] %v6061_v2  ;;  %v617_v34 = vld [vmem:[%s5080_s23 + $0x2c0] sm:$0xff]  ;;  %v618_v11 = vld [vmem:[%s5080_s23 + $0x2c8] sm:$0xff]  ;;  %v6078_v24 = vsub.f32 %v603_v27, %v731_v9  ;;  %v4218_v2 = vpop.f32.mrb[73].mxu1 }
 0x611   : > { %v619_v20 = vld [vmem:[%s5080_s23 + $0x2d0] sm:$0xff]  ;;  %v733_v3 = vld [vmem:[%s5073_s22 + $0x260] sm:$0xff]  ;;  %v734_v32 = vld [vmem:[%s5073_s22 + $0x268] sm:$0xff]  ;;  %7188 = vst [vmem:[#allocation86_spill] sm:$0xff] %v6076_v22 }
 0x612   : > { %v735_v56 = vld [vmem:[%s5073_s22 + $0x270] sm:$0xff]  ;;  %7189 = vst [vmem:[#allocation87_spill] sm:$0xff] %v6078_v24  ;;  %7190 = vst [vmem:[#allocation88_spill] sm:$0xff] %v6080_v61  ;;  %v620_v5 = vld [vmem:[%s5080_s23 + $0x2d8] sm:$0xff]  ;;  %v6092_v9 = vsub.f32 %v605_v52, %v733_v3  ;;  %v6094_v28 = vsub.f32 %v606_v35, %v734_v32  ;;  %v4220_v61 = vpop.f32.mrb[74].mxu1 }
 0x613   : > { %7191 = vst [vmem:[#allocation89_spill] sm:$0xff] %v6084_v41  ;;  %v621_v30 = vld [vmem:[%s5080_s23 + $0x2e0] sm:$0xff]  ;;  %v622_v40 = vld [vmem:[%s5080_s23 + $0x2e8] sm:$0xff]  ;;  %v736_v14 = vld [vmem:[%s5073_s22 + $0x278] sm:$0xff]  ;;  %v6096_v18 = vsub.f32 %v607_v15, %v735_v56  ;;  %v4219_v41 = vadd.f32 %v4218_v2, %v4217_v13  ;;  %v4221_v38 = vpop.f32.mrb[75].mxu1 }
 0x614   : > { %v737_v47 = vld [vmem:[%s5073_s22 + $0x280] sm:$0xff]  ;;  %v738_v27 = vld [vmem:[%s5073_s22 + $0x288] sm:$0xff]  ;;  %7192 = vst [vmem:[#allocation90_spill] sm:$0xff] %v6092_v9  ;;  %7193 = vst [vmem:[#allocation91_spill] sm:$0xff] %v6094_v28  ;;  %v6108_v32 = vsub.f32 %v608_v23, %v736_v14  ;;  %v6128_v14 = vmul.f32 %v5757_v31, %v5757_v31 }
 0x615   : > { %7194 = vst [vmem:[#allocation92_spill] sm:$0xff] %v6096_v18  ;;  %7195 = vst [vmem:[#allocation93_spill] sm:$0xff] %v6100_v29  ;;  %v623_v24 = vld [vmem:[%s5080_s23 + $0x2f0] sm:$0xff]  ;;  %v624_v22 = vld [vmem:[%s5080_s23 + $0x2f8] sm:$0xff]  ;;  %v6110_v15 = vsub.f32 %v609_v43, %v737_v47  ;;  %v6112_v56 = vsub.f32 %v610_v49, %v738_v27  ;;  %v6131_v47 = vadd.f32 %v4219_v41, %v5653_v7 }
 0x616   : > { %v625_v52 = vld [vmem:[%s5080_s23 + $0x300] sm:$0xff]  ;;  %v739_v3 = vld [vmem:[%s5073_s22 + $0x290] sm:$0xff]  ;;  %v740_v9 = vld [vmem:[%s5073_s22 + $0x298] sm:$0xff]  ;;  %7201 = vst [vmem:[#allocation99_spill] sm:$0xff] %v6128_v14  ;;  %v4222_v27 = vadd.f32 %v4221_v38, %v4220_v61 }
 0x617   : > { %v741_v35 = vld [vmem:[%s5073_s22 + $0x2a0] sm:$0xff]  ;;  %7196 = vst [vmem:[#allocation94_spill] sm:$0xff] %v6110_v15  ;;  %7197 = vst [vmem:[#allocation95_spill] sm:$0xff] %v6112_v56  ;;  %v626_v2 = vld [vmem:[%s5080_s23 + $0x308] sm:$0xff]  ;;  %v6120_v23 = vsub.f32 %v611_v55, %v739_v3  ;;  %v6122_v43 = vsub.f32 %v612_v10, %v740_v9  ;;  %3723 = vrot.lane.b32.xlu0 %v6131_v47, %s4815_s30 }
 0x618   : > { %v627_v13 = vld [vmem:[%s5080_s23 + $0x310] sm:$0xff]  ;;  %v628_v29 = vld [vmem:[%s5080_s23 + $0x318] sm:$0xff]  ;;  %v742_v18 = vld [vmem:[%s5073_s22 + $0x2a8] sm:$0xff]  ;;  %v6124_v49 = vsub.f32 %v613_v48, %v741_v35  ;;  %7202 = vst [vmem:[#allocation100_spill] sm:$0xff] %v6131_v47 }
 0x619   : > { %v743_v28 = vld [vmem:[%s5073_s22 + $0x2b0] sm:$0xff]  ;;  %v744_v12 = vld [vmem:[%s5073_s22 + $0x2b8] sm:$0xff]  ;;  %7198 = vst [vmem:[#allocation96_spill] sm:$0xff] %v6120_v23  ;;  %7199 = vst [vmem:[#allocation97_spill] sm:$0xff] %v6122_v43  ;;  %v6140_v48 = vsub.f32 %v6049_v37, %v742_v18 }
 0x61a   : > { %7200 = vst [vmem:[#allocation98_spill] sm:$0xff] %v6124_v49  ;;  %v629_v56 = vld [vmem:[%s5080_s23 + $0x320] sm:$0xff]  ;;  %v630_v15 = vld [vmem:[%s5080_s23 + $0x328] sm:$0xff]  ;;  %v631_v55 = vld [vmem:[%s5080_s23 + $0x330] sm:$0xff]  ;;  %v6143_v31 = vsub.f32 %v6052_v44, %v743_v28  ;;  %v6151_v49 = vsub.f32 %v616_v54, %v744_v12  ;;  %v6160_v28 = vadd.f32 %v4222_v27, %v5653_v7 }
 0x61b   : > { %v745_v3 = vld [vmem:[%s5073_s22 + $0x2c0] sm:$0xff]  ;;  %v746_v23 = vld [vmem:[%s5073_s22 + $0x2c8] sm:$0xff]  ;;  %v747_v10 = vld [vmem:[%s5073_s22 + $0x2d0] sm:$0xff] }
 0x61c   : > { %7203 = vst [vmem:[#allocation101_spill] sm:$0xff] %v6143_v31  ;;  %v632_v9 = vld [vmem:[%s5080_s23 + $0x338] sm:$0xff]  ;;  %v633_v41 = vld [vmem:[%s5080_s23 + $0x340] sm:$0xff]  ;;  %v634_v61 = vld [vmem:[%s5080_s23 + $0x348] sm:$0xff]  ;;  %v6153_v43 = vsub.f32 %v617_v34, %v745_v3  ;;  %v6155_v37 = vsub.f32 %v618_v11, %v746_v23  ;;  %v6157_v44 = vsub.f32 %v619_v20, %v747_v10  ;;  %3725 = vrot.lane.b32.xlu1 %v6160_v28, %s4815_s30 }
 0x61d   : > { %v748_v35 = vld [vmem:[%s5073_s22 + $0x2d8] sm:$0xff]  ;;  %v749_v38 = vld [vmem:[%s5073_s22 + $0x2e0] sm:$0xff]  ;;  %v750_v14 = vld [vmem:[%s5073_s22 + $0x2e8] sm:$0xff]  ;;  %7204 = vst [vmem:[#allocation102_spill] sm:$0xff] %v6151_v49 }
 0x61e   : > { %7205 = vst [vmem:[#allocation103_spill] sm:$0xff] %v6155_v37  ;;  %7206 = vst [vmem:[#allocation104_spill] sm:$0xff] %v6157_v44  ;;  %v635_v18 = vld [vmem:[%s5080_s23 + $0x350] sm:$0xff]  ;;  %v636_v31 = vld [vmem:[%s5080_s23 + $0x358] sm:$0xff]  ;;  %v6170_v11 = vsub.f32 %v620_v5, %v748_v35  ;;  %v6172_v20 = vsub.f32 %v621_v30, %v749_v38  ;;  %v6174_v23 = vsub.f32 %v622_v40, %v750_v14  ;;  %v4223_v40 = vpop.f32.mrb[76].mxu1 }
 0x61f   : > { %7207 = vst [vmem:[#allocation105_spill] sm:$0xff] %v6160_v28  ;;  %v637_v12 = vld [vmem:[%s5080_s23 + $0x360] sm:$0xff]  ;;  %v751_v54 = vld [vmem:[%s5073_s22 + $0x2f0] sm:$0xff]  ;;  %v752_v49 = vld [vmem:[%s5073_s22 + $0x2f8] sm:$0xff]  ;;  %v6193_v30 = vmul.f32 %v5759_v21, %v5759_v21  ;;  %v6212_v28 = vmul.f32 %v5767_v19, %v5767_v19  ;;  %v6228_v19 = vmul.f32 %v5769_v16, %v5769_v16 }
 0x620   : > { %v753_v34 = vld [vmem:[%s5073_s22 + $0x300] sm:$0xff]  ;;  %7208 = vst [vmem:[#allocation106_spill] sm:$0xff] %v6172_v20  ;;  %7209 = vst [vmem:[#allocation107_spill] sm:$0xff] %v6174_v23  ;;  %v6177_v27 = vld [vmem:[%s5080_s23 + $0x368] sm:$0xff]  ;;  %v6185_v37 = vsub.f32 %v623_v24, %v751_v54  ;;  %v6187_v5 = vsub.f32 %v624_v22, %v752_v49 }
 0x621   : > { %v6180_v3 = vld [vmem:[%s5080_s23 + $0x370] sm:$0xff]  ;;  %v754_v10 = vld [vmem:[%s5073_s22 + $0x308] sm:$0xff]  ;;  %v756_v44 = vld [vmem:[%s5073_s22 + $0x318] sm:$0xff]  ;;  %v6189_v35 = vsub.f32 %v625_v52, %v753_v34  ;;  %7213 = vst [vmem:[#allocation111_spill] sm:$0xff] %v6193_v30 }
 0x622   : > { %v755_v47 = vld [vmem:[%s5073_s22 + $0x310] sm:$0xff]  ;;  %7210 = vst [vmem:[#allocation108_spill] sm:$0xff] %v6185_v37  ;;  %7211 = vst [vmem:[#allocation109_spill] sm:$0xff] %v6187_v5  ;;  %v640_v14 = vld [vmem:[%s5080_s23 + $0x378] sm:$0xff]  ;;  %v6204_v34 = vsub.f32 %v626_v2, %v754_v10  ;;  %v6208_v30 = vsub.f32 %v628_v29, %v756_v44 }
 0x623   : > { %7212 = vst [vmem:[#allocation110_spill] sm:$0xff] %v6189_v35  ;;  %v641_v24 = vld [vmem:[%s5080_s23 + $0x380] sm:$0xff]  ;;  %v642_v22 = vld [vmem:[%s5080_s23 + $0x388] sm:$0xff]  ;;  %v643_v49 = vld [vmem:[%s5080_s23 + $0x390] sm:$0xff]  ;;  %v6206_v21 = vsub.f32 %v627_v13, %v755_v47  ;;  %v4224_v35 = vpop.f32.mrb[77].mxu1 }
 0x624   : > { %v757_v52 = vld [vmem:[%s5073_s22 + $0x320] sm:$0xff]  ;;  %v758_v38 = vld [vmem:[%s5073_s22 + $0x328] sm:$0xff]  ;;  %v759_v54 = vld [vmem:[%s5073_s22 + $0x330] sm:$0xff]  ;;  %7214 = vst [vmem:[#allocation112_spill] sm:$0xff] %v6204_v34 }
 0x625   : > { %7215 = vst [vmem:[#allocation113_spill] sm:$0xff] %v6206_v21  ;;  %7216 = vst [vmem:[#allocation114_spill] sm:$0xff] %v6208_v30  ;;  %v644_v5 = vld [vmem:[%s5080_s23 + $0x398] sm:$0xff]  ;;  %v645_v37 = vld [vmem:[%s5080_s23 + $0x3a0] sm:$0xff]  ;;  %v6220_v47 = vsub.f32 %v629_v56, %v757_v52  ;;  %v6222_v29 = vsub.f32 %v630_v15, %v758_v38  ;;  %v6224_v44 = vsub.f32 %v631_v55, %v759_v54  ;;  %v4226_v30 = vpop.f32.mrb[78].mxu1 }
 0x626   : > { %7217 = vst [vmem:[#allocation115_spill] sm:$0xff] %v6212_v28  ;;  %v646_v23 = vld [vmem:[%s5080_s23 + $0x3a8] sm:$0xff]  ;;  %v760_v2 = vld [vmem:[%s5073_s22 + $0x338] sm:$0xff]  ;;  %v761_v10 = vld [vmem:[%s5073_s22 + $0x340] sm:$0xff]  ;;  %v4225_v28 = vadd.f32 %v4224_v35, %v4223_v40  ;;  %v4227_v16 = vpop.f32.mrb[79].mxu1 }
 0x627   : > { %v762_v13 = vld [vmem:[%s5073_s22 + $0x348] sm:$0xff]  ;;  %7218 = vst [vmem:[#allocation116_spill] sm:$0xff] %v6220_v47  ;;  %7219 = vst [vmem:[#allocation117_spill] sm:$0xff] %v6222_v29  ;;  %v647_v21 = vld [vmem:[%s5080_s23 + $0x3b0] sm:$0xff]  ;;  %v6236_v38 = vsub.f32 %v632_v9, %v760_v2  ;;  %v6238_v55 = vsub.f32 %v633_v41, %v761_v10  ;;  %v6256_v2 = vmul.f32 %v5771_v51, %v5771_v51 }
 0x628   : > { %7220 = vst [vmem:[#allocation118_spill] sm:$0xff] %v6224_v44  ;;  %7221 = vst [vmem:[#allocation119_spill] sm:$0xff] %v6228_v19  ;;  %v648_v34 = vld [vmem:[%s5080_s23 + $0x3b8] sm:$0xff]  ;;  %v649_v56 = vld [vmem:[%s5080_s23 + $0x3c0] sm:$0xff]  ;;  %v6240_v54 = vsub.f32 %v634_v61, %v762_v13  ;;  %v6259_v10 = vadd.f32 %v4225_v28, %v5653_v7  ;;  %v4228_v13 = vadd.f32 %v4227_v16, %v4226_v30 }
 0x629   : > { %v763_v52 = vld [vmem:[%s5073_s22 + $0x350] sm:$0xff]  ;;  %v764_v47 = vld [vmem:[%s5073_s22 + $0x358] sm:$0xff]  ;;  %v765_v15 = vld [vmem:[%s5073_s22 + $0x360] sm:$0xff]  ;;  %7222 = vst [vmem:[#allocation120_spill] sm:$0xff] %v6236_v38 }
 0x62a   : > { %7223 = vst [vmem:[#allocation121_spill] sm:$0xff] %v6238_v55  ;;  %7224 = vst [vmem:[#allocation122_spill] sm:$0xff] %v6240_v54  ;;  %v650_v35 = vld [vmem:[%s5080_s23 + $0x3c8] sm:$0xff]  ;;  %v651_v40 = vld [vmem:[%s5080_s23 + $0x3d0] sm:$0xff]  ;;  %v6248_v9 = vsub.f32 %v635_v18, %v763_v52  ;;  %v6250_v41 = vsub.f32 %v636_v31, %v764_v47  ;;  %v6252_v61 = vsub.f32 %v637_v12, %v765_v15  ;;  %3727 = vrot.lane.b32.xlu0 %v6259_v10, %s4815_s30 }
 0x62b   : > { %v652_v19 = vld [vmem:[%s5080_s23 + $0x3d8] sm:$0xff]  ;;  %v766_v44 = vld [vmem:[%s5073_s22 + $0x368] sm:$0xff]  ;;  %v767_v29 = vld [vmem:[%s5073_s22 + $0x370] sm:$0xff]  ;;  %7227 = vst [vmem:[#allocation125_spill] sm:$0xff] %v6256_v2 }
 0x62c   : > { %v768_v20 = vld [vmem:[%s5073_s22 + $0x378] sm:$0xff]  ;;  %7225 = vst [vmem:[#allocation123_spill] sm:$0xff] %v6250_v41  ;;  %7226 = vst [vmem:[#allocation124_spill] sm:$0xff] %v6252_v61  ;;  %v653_v54 = vld [vmem:[%s5080_s23 + $0x3e0] sm:$0xff]  ;;  %v6268_v12 = vsub.f32 %v6177_v27, %v766_v44  ;;  %v6271_v47 = vsub.f32 %v6180_v3, %v767_v29  ;;  %v6286_v27 = vadd.f32 %v4228_v13, %v5653_v7 }
 0x62d   : > { %7228 = vst [vmem:[#allocation126_spill] sm:$0xff] %v6259_v10  ;;  %v654_v55 = vld [vmem:[%s5080_s23 + $0x3e8] sm:$0xff]  ;;  %v655_v38 = vld [vmem:[%s5080_s23 + $0x3f0] sm:$0xff]  ;;  %v769_v18 = vld [vmem:[%s5073_s22 + $0x380] sm:$0xff]  ;;  %v6277_v16 = vsub.f32 %v640_v14, %v768_v20  ;;  %v6310_v10 = vmul.f32 %v5773_v53, %v5773_v53 }
 0x62e   : > { %v770_v52 = vld [vmem:[%s5073_s22 + $0x388] sm:$0xff]  ;;  %v771_v31 = vld [vmem:[%s5073_s22 + $0x390] sm:$0xff]  ;;  %v656_v51 = vld [vmem:[%s5080_s23 + $0x3f8] sm:$0xff]  ;;  %v6279_v2 = vsub.f32 %v641_v24, %v769_v18  ;;  %7229 = vst [vmem:[#allocation127_spill] sm:$0xff] %v6286_v27  ;;  %3729 = vrot.lane.b32.xlu1 %v6286_v27, %s4815_s30 }
 0x62f   : > { %v772_v28 = vld [vmem:[%s5073_s22 + $0x398] sm:$0xff]  ;;  %v773_v30 = vld [vmem:[%s5073_s22 + $0x3a0] sm:$0xff]  ;;  %v774_v15 = vld [vmem:[%s5073_s22 + $0x3a8] sm:$0xff]  ;;  %v6281_v61 = vsub.f32 %v642_v22, %v770_v52  ;;  %v6283_v41 = vsub.f32 %v643_v49, %v771_v31 }
 0x630   : > { %v775_v3 = vld [vmem:[%s5073_s22 + $0x3b0] sm:$0xff]  ;;  %v776_v29 = vld [vmem:[%s5073_s22 + $0x3b8] sm:$0xff]  ;;  %v777_v44 = vld [vmem:[%s5073_s22 + $0x3c0] sm:$0xff]  ;;  %v6293_v20 = vsub.f32 %v644_v5, %v772_v28  ;;  %v6295_v14 = vsub.f32 %v645_v37, %v773_v30  ;;  %v6297_v24 = vsub.f32 %v646_v23, %v774_v15  ;;  %v4229_v5 = vpop.f32.mrb[80].mxu1 }
 0x631   : > { %v778_v22 = vld [vmem:[%s5073_s22 + $0x3c8] sm:$0xff]  ;;  %v779_v49 = vld [vmem:[%s5073_s22 + $0x3d0] sm:$0xff]  ;;  %v780_v13 = vld [vmem:[%s5073_s22 + $0x3d8] sm:$0xff]  ;;  %v6302_v18 = vsub.f32 %v647_v21, %v775_v3  ;;  %v6304_v52 = vsub.f32 %v648_v34, %v776_v29  ;;  %v6306_v31 = vsub.f32 %v649_v56, %v777_v44  ;;  %v6325_v34 = vmul.f32 %v5786_v33, %v5786_v33  ;;  %v4230_v56 = vpop.f32.mrb[81].mxu1 }
 0x632   : > { %v781_v37 = vld [vmem:[%s5073_s22 + $0x3e0] sm:$0xff]  ;;  %v782_v23 = vld [vmem:[%s5073_s22 + $0x3e8] sm:$0xff]  ;;  %v783_v28 = vld [vmem:[%s5073_s22 + $0x3f0] sm:$0xff]  ;;  %v6317_v30 = vsub.f32 %v650_v35, %v778_v22  ;;  %v6319_v15 = vsub.f32 %v651_v40, %v779_v49  ;;  %v6321_v21 = vsub.f32 %v652_v19, %v780_v13  ;;  %v6336_v35 = vmul.f32 %v5788_v45, %v5788_v45  ;;  %v4232_v22 = vpop.f32.mrb[82].mxu1 }
 0x633   : > { %v784_v53 = vld [vmem:[%s5073_s22 + $0x3f8] sm:$0xff]  ;;  %v6328_v3 = vsub.f32 %v653_v54, %v781_v37  ;;  %v6330_v29 = vsub.f32 %v654_v55, %v782_v23  ;;  %v6332_v44 = vsub.f32 %v655_v38, %v783_v28  ;;  %v4231_v40 = vadd.f32 %v4230_v56, %v4229_v5  ;;  %v4233_v55 = vpop.f32.mrb[83].mxu1  ;;  %v7236_v56 = vld [vmem:[#allocation49_spill] sm:$0xff] }
 0x634   : > { %v6338_v19 = vsub.f32 %v656_v51, %v784_v53  ;;  %v6342_v33 = vmul.f32 %v5790_v59, %v5790_v59  ;;  %v6346_v54 = vmul.f32 %v5801_v60, %v5801_v60  ;;  %v6350_v38 = vmul.f32 %v5803_v17, %v5803_v17  ;;  %v7249_v27 = vld [vmem:[#allocation58_spill] sm:$0xff] }
 0x635   : > { %v6354_v45 = vmul.f32 %v5805_v46, %v5805_v46  ;;  %v6358_v51 = vmul.f32 %v5820_v63, %v5820_v63  ;;  %v6362_v59 = vmul.f32 %v5822_v6, %v5822_v6  ;;  %v6365_v60 = vadd.f32 %v4231_v40, %v5653_v7  ;;  %v7237_v40 = vld [vmem:[#allocation50_spill] sm:$0xff] }
 0x636   : > { %v4234_v49 = vadd.f32 %v4233_v55, %v4232_v22  ;;  %v6369_v17 = vmul.f32 %v5824_v25, %v5824_v25  ;;  %v6373_v46 = vmul.f32 %v5836_v26, %v5836_v26  ;;  %v6377_v63 = vmul.f32 %v5838_v39, %v5838_v39  ;;  %v7232_v26 = vld [vmem:[#allocation43_spill] sm:$0xff] }
 0x637   : > { %7230 = vst [vmem:[#allocation128_spill] sm:$0xff] %v6365_v60  ;;  %v6381_v6 = vmul.f32 %v5840_v4, %v5840_v4  ;;  %v6385_v13 = vmul.f32 %v5852_v62, %v5852_v62  ;;  %v6389_v25 = vmul.f32 %v5854_v1, %v5854_v1  ;;  %3731 = vrot.lane.b32.xlu0 %v6365_v60, %s4815_s30  ;;  %v7233_v4 = vld [vmem:[#allocation44_spill] sm:$0xff]  ;;  %v7234_v62 = vld [vmem:[#allocation45_spill] sm:$0xff]  ;;  %v7235_v1 = vld [vmem:[#allocation46_spill] sm:$0xff] }
 0x638   : > { %v6392_v5 = vadd.f32 %v4234_v49, %v5653_v7  ;;  %v6398_v39 = vmul.f32 %v7232_v26, %v7232_v26  ;;  %v6402_v37 = vmul.f32 %v7233_v4, %v7233_v4  ;;  %v6406_v23 = vmul.f32 %v7234_v62, %v7234_v62  ;;  %v7238_v49 = vld [vmem:[#allocation51_spill] sm:$0xff]  ;;  %v7247_v60 = vld [vmem:[#allocation57_spill] sm:$0xff] }
 0x639   : > { %v6410_v28 = vmul.f32 %v7235_v1, %v7235_v1  ;;  %v6414_v7 = vmul.f32 %v5884_v57, %v5884_v57  ;;  %v6418_v53 = vmul.f32 %v7236_v56, %v7236_v56  ;;  %v6422_v22 = vmul.f32 %v7237_v40, %v7237_v40  ;;  %v7239_v57 = vld [vmem:[#allocation52_spill] sm:$0xff]  ;;  %v7241_v1 = vld [vmem:[#allocation54_spill] sm:$0xff]  ;;  %v7243_v40 = vld [vmem:[#allocation55_spill] sm:$0xff] }
 0x63a   : > { %7231 = vst [vmem:[#allocation129_spill] sm:$0xff] %v6392_v5  ;;  %3733 = vrot.lane.b32.xlu1 %v6392_v5, %s4815_s30  ;;  %v6428_v55 = vmul.f32 %v5897_v50, %v5897_v50  ;;  %v6432_v26 = vmul.f32 %v7238_v49, %v7238_v49  ;;  %v6436_v4 = vmul.f32 %v7239_v57, %v7239_v57  ;;  %v7245_v5 = vld [vmem:[#allocation56_spill] sm:$0xff] }
 0x63b   : > { %v6440_v62 = vmul.f32 %v5914_v36, %v5914_v36  ;;  %v6444_v56 = vmul.f32 %v7241_v1, %v7241_v1  ;;  %v6448_v50 = vmul.f32 %v7243_v40, %v7243_v40  ;;  %v6452_v49 = vmul.f32 %v7245_v5, %v7245_v5 }
 0x63c   : > { %v6456_v57 = vmul.f32 %v7247_v60, %v7247_v60  ;;  %v6460_v36 = vmul.f32 %v7249_v27, %v7249_v27 }
 0x63d   : > { %7240 = vst [vmem:[#allocation43_spill] sm:$0xff] %v6440_v62  ;;  %7242 = vst [vmem:[#allocation44_spill] sm:$0xff] %v6444_v56  ;;  %v7251_v62 = vld [vmem:[#allocation60_spill] sm:$0xff]  ;;  %v7252_v56 = vld [vmem:[#allocation61_spill] sm:$0xff] }
 0x63e   : > { %7244 = vst [vmem:[#allocation45_spill] sm:$0xff] %v6448_v50  ;;  %7246 = vst [vmem:[#allocation46_spill] sm:$0xff] %v6452_v49  ;;  %v6464_v1 = vmul.f32 %v7251_v62, %v7251_v62  ;;  %v6468_v40 = vmul.f32 %v7252_v56, %v7252_v56  ;;  %v7254_v50 = vld [vmem:[#allocation62_spill] sm:$0xff]  ;;  %v7256_v49 = vld [vmem:[#allocation64_spill] sm:$0xff]  ;;  %v6488_v56 = vmul.f32 %v5980_v42, %v5980_v42 }
 0x63f   : > { %7248 = vst [vmem:[#allocation49_spill] sm:$0xff] %v6456_v57  ;;  %7250 = vst [vmem:[#allocation50_spill] sm:$0xff] %v6460_v36  ;;  %v6472_v5 = vmul.f32 %v7254_v50, %v7254_v50  ;;  %v6476_v60 = vmul.f32 %v7256_v49, %v7256_v49  ;;  %v7258_v57 = vld [vmem:[#allocation65_spill] sm:$0xff]  ;;  %v7260_v36 = vld [vmem:[#allocation66_spill] sm:$0xff] }
 0x640   : > { %7253 = vst [vmem:[#allocation51_spill] sm:$0xff] %v6468_v40  ;;  %v6480_v27 = vmul.f32 %v7258_v57, %v7258_v57  ;;  %v6484_v62 = vmul.f32 %v7260_v36, %v7260_v36  ;;  %v7262_v40 = vld [vmem:[#allocation68_spill] sm:$0xff] }
 0x641   : > { %7255 = vst [vmem:[#allocation52_spill] sm:$0xff] %v6472_v5  ;;  %7257 = vst [vmem:[#allocation54_spill] sm:$0xff] %v6476_v60  ;;  %v6492_v50 = vmul.f32 %v7262_v40, %v7262_v40  ;;  %v7264_v5 = vld [vmem:[#allocation69_spill] sm:$0xff]  ;;  %v7266_v60 = vld [vmem:[#allocation70_spill] sm:$0xff]  ;;  %v6512_v40 = vmul.f32 %v6012_v0, %v6012_v0 }
 0x642   : > { %7259 = vst [vmem:[#allocation55_spill] sm:$0xff] %v6480_v27  ;;  %7261 = vst [vmem:[#allocation56_spill] sm:$0xff] %v6484_v62  ;;  %v6496_v49 = vmul.f32 %v7264_v5, %v7264_v5  ;;  %v6500_v57 = vmul.f32 %v7266_v60, %v7266_v60  ;;  %v7267_v27 = vld [vmem:[#allocation71_spill] sm:$0xff]  ;;  %v7269_v62 = vld [vmem:[#allocation72_spill] sm:$0xff] }
 0x643   : > { %7263 = vst [vmem:[#allocation57_spill] sm:$0xff] %v6492_v50  ;;  %v6504_v36 = vmul.f32 %v7267_v27, %v7267_v27  ;;  %v6508_v42 = vmul.f32 %v7269_v62, %v7269_v62  ;;  %v7271_v50 = vld [vmem:[#allocation75_spill] sm:$0xff]  ;;  %v6524_v27 = vmul.f32 %v6025_v8, %v6025_v8 }
 0x644   : > { %7265 = vst [vmem:[#allocation58_spill] sm:$0xff] %v6496_v49  ;;  %v6516_v5 = vmul.f32 %v7271_v50, %v7271_v50  ;;  %v7273_v49 = vld [vmem:[#allocation76_spill] sm:$0xff]  ;;  %v6536_v50 = vmul.f32 %v6042_v58, %v6042_v58 }
 0x645   : > { %7268 = vst [vmem:[#allocation60_spill] sm:$0xff] %v6504_v36  ;;  %7270 = vst [vmem:[#allocation61_spill] sm:$0xff] %v6508_v42  ;;  %v6520_v60 = vmul.f32 %v7273_v49, %v7273_v49  ;;  %v7276_v36 = vld [vmem:[#allocation77_spill] sm:$0xff]  ;;  %v7278_v42 = vld [vmem:[#allocation78_spill] sm:$0xff] }
 0x646   : > { %7272 = vst [vmem:[#allocation62_spill] sm:$0xff] %v6516_v5  ;;  %7275 = vst [vmem:[#allocation65_spill] sm:$0xff] %v6524_v27  ;;  %v6528_v62 = vmul.f32 %v7276_v36, %v7276_v36  ;;  %v6532_v0 = vmul.f32 %v7278_v42, %v7278_v42  ;;  %v7281_v5 = vld [vmem:[#allocation80_spill] sm:$0xff]  ;;  %v7285_v27 = vld [vmem:[#allocation82_spill] sm:$0xff] }
 0x647   : > { %7274 = vst [vmem:[#allocation64_spill] sm:$0xff] %v6520_v60  ;;  %7280 = vst [vmem:[#allocation69_spill] sm:$0xff] %v6536_v50  ;;  %v6540_v49 = vmul.f32 %v7281_v5, %v7281_v5  ;;  %v7283_v60 = vld [vmem:[#allocation81_spill] sm:$0xff]  ;;  %v6548_v36 = vmul.f32 %v7285_v27, %v7285_v27  ;;  %v7291_v50 = vld [vmem:[#allocation86_spill] sm:$0xff] }
 0x648   : > { %7277 = vst [vmem:[#allocation66_spill] sm:$0xff] %v6528_v62  ;;  %7279 = vst [vmem:[#allocation68_spill] sm:$0xff] %v6532_v0  ;;  %v6544_v8 = vmul.f32 %v7283_v60, %v7283_v60  ;;  %v7287_v62 = vld [vmem:[#allocation83_spill] sm:$0xff]  ;;  %v7289_v0 = vld [vmem:[#allocation84_spill] sm:$0xff]  ;;  %v6560_v5 = vmul.f32 %v7291_v50, %v7291_v50 }
 0x649   : > { %7282 = vst [vmem:[#allocation70_spill] sm:$0xff] %v6540_v49  ;;  %7286 = vst [vmem:[#allocation72_spill] sm:$0xff] %v6548_v36  ;;  %v6552_v42 = vmul.f32 %v7287_v62, %v7287_v62  ;;  %v6556_v58 = vmul.f32 %v7289_v0, %v7289_v0  ;;  %v7292_v49 = vld [vmem:[#allocation87_spill] sm:$0xff]  ;;  %v7296_v36 = vld [vmem:[#allocation90_spill] sm:$0xff] }
 0x64a   : > { %7284 = vst [vmem:[#allocation71_spill] sm:$0xff] %v6544_v8  ;;  %v6564_v60 = vmul.f32 %v7292_v49, %v7292_v49  ;;  %v7294_v8 = vld [vmem:[#allocation88_spill] sm:$0xff]  ;;  %v6572_v62 = vmul.f32 %v7296_v36, %v7296_v36  ;;  %v6584_v49 = vmul.f32 %v6108_v32, %v6108_v32 }
 0x64b   : > { %7288 = vst [vmem:[#allocation75_spill] sm:$0xff] %v6552_v42  ;;  %7290 = vst [vmem:[#allocation76_spill] sm:$0xff] %v6556_v58  ;;  %v6568_v27 = vmul.f32 %v7294_v8, %v7294_v8  ;;  %v7298_v42 = vld [vmem:[#allocation91_spill] sm:$0xff]  ;;  %v7300_v58 = vld [vmem:[#allocation92_spill] sm:$0xff] }
 0x64c   : > { %7293 = vst [vmem:[#allocation77_spill] sm:$0xff] %v6564_v60  ;;  %7297 = vst [vmem:[#allocation80_spill] sm:$0xff] %v6572_v62  ;;  %v6576_v0 = vmul.f32 %v7298_v42, %v7298_v42  ;;  %v6580_v50 = vmul.f32 %v7300_v58, %v7300_v58  ;;  %v7302_v60 = vld [vmem:[#allocation94_spill] sm:$0xff]  ;;  %v7306_v62 = vld [vmem:[#allocation96_spill] sm:$0xff] }
 0x64d   : > { %7295 = vst [vmem:[#allocation78_spill] sm:$0xff] %v6568_v27  ;;  %v6588_v8 = vmul.f32 %v7302_v60, %v7302_v60  ;;  %v7304_v27 = vld [vmem:[#allocation95_spill] sm:$0xff]  ;;  %v6596_v42 = vmul.f32 %v7306_v62, %v7306_v62  ;;  %v6608_v60 = vmul.f32 %v6140_v48, %v6140_v48 }
 0x64e   : > { %7299 = vst [vmem:[#allocation81_spill] sm:$0xff] %v6576_v0  ;;  %7301 = vst [vmem:[#allocation82_spill] sm:$0xff] %v6580_v50  ;;  %v6592_v36 = vmul.f32 %v7304_v27, %v7304_v27  ;;  %v7307_v0 = vld [vmem:[#allocation97_spill] sm:$0xff]  ;;  %v7309_v50 = vld [vmem:[#allocation98_spill] sm:$0xff] }
 0x64f   : > { %7303 = vst [vmem:[#allocation83_spill] sm:$0xff] %v6588_v8  ;;  %v6600_v58 = vmul.f32 %v7307_v0, %v7307_v0  ;;  %v6604_v32 = vmul.f32 %v7309_v50, %v7309_v50  ;;  %v7311_v8 = vld [vmem:[#allocation101_spill] sm:$0xff]  ;;  %v6620_v0 = vmul.f32 %v6153_v43, %v6153_v43 }
 0x650   : > { %7305 = vst [vmem:[#allocation84_spill] sm:$0xff] %v6592_v36  ;;  %v6612_v27 = vmul.f32 %v7311_v8, %v7311_v8  ;;  %v7313_v36 = vld [vmem:[#allocation102_spill] sm:$0xff]  ;;  %v6632_v8 = vmul.f32 %v6170_v11, %v6170_v11 }
 0x651   : > { %7308 = vst [vmem:[#allocation86_spill] sm:$0xff] %v6600_v58  ;;  %7310 = vst [vmem:[#allocation87_spill] sm:$0xff] %v6604_v32  ;;  %v6616_v62 = vmul.f32 %v7313_v36, %v7313_v36  ;;  %v7316_v58 = vld [vmem:[#allocation103_spill] sm:$0xff]  ;;  %v7318_v32 = vld [vmem:[#allocation104_spill] sm:$0xff] }
 0x652   : > { %7312 = vst [vmem:[#allocation88_spill] sm:$0xff] %v6612_v27  ;;  %7315 = vst [vmem:[#allocation91_spill] sm:$0xff] %v6620_v0  ;;  %v6624_v50 = vmul.f32 %v7316_v58, %v7316_v58  ;;  %v6628_v48 = vmul.f32 %v7318_v32, %v7318_v32  ;;  %v7321_v27 = vld [vmem:[#allocation106_spill] sm:$0xff]  ;;  %v7325_v0 = vld [vmem:[#allocation108_spill] sm:$0xff] }
 0x653   : > { %7314 = vst [vmem:[#allocation90_spill] sm:$0xff] %v6616_v62  ;;  %7320 = vst [vmem:[#allocation95_spill] sm:$0xff] %v6632_v8  ;;  %v6636_v36 = vmul.f32 %v7321_v27, %v7321_v27  ;;  %v7323_v62 = vld [vmem:[#allocation107_spill] sm:$0xff]  ;;  %v6644_v58 = vmul.f32 %v7325_v0, %v7325_v0  ;;  %v7331_v8 = vld [vmem:[#allocation112_spill] sm:$0xff] }
 0x654   : > { %7317 = vst [vmem:[#allocation92_spill] sm:$0xff] %v6624_v50  ;;  %7319 = vst [vmem:[#allocation94_spill] sm:$0xff] %v6628_v48  ;;  %v6640_v43 = vmul.f32 %v7323_v62, %v7323_v62  ;;  %v7327_v50 = vld [vmem:[#allocation109_spill] sm:$0xff]  ;;  %v7329_v48 = vld [vmem:[#allocation110_spill] sm:$0xff]  ;;  %v6656_v27 = vmul.f32 %v7331_v8, %v7331_v8 }
 0x655   : > { %7322 = vst [vmem:[#allocation96_spill] sm:$0xff] %v6636_v36  ;;  %7326 = vst [vmem:[#allocation98_spill] sm:$0xff] %v6644_v58  ;;  %v6648_v32 = vmul.f32 %v7327_v50, %v7327_v50  ;;  %v6652_v11 = vmul.f32 %v7329_v48, %v7329_v48  ;;  %v7333_v36 = vld [vmem:[#allocation113_spill] sm:$0xff]  ;;  %v7337_v58 = vld [vmem:[#allocation116_spill] sm:$0xff] }
 0x656   : > { %7324 = vst [vmem:[#allocation97_spill] sm:$0xff] %v6640_v43  ;;  %7332 = vst [vmem:[#allocation103_spill] sm:$0xff] %v6656_v27  ;;  %v6660_v62 = vmul.f32 %v7333_v36, %v7333_v36  ;;  %v7335_v43 = vld [vmem:[#allocation114_spill] sm:$0xff]  ;;  %v6668_v50 = vmul.f32 %v7337_v58, %v7337_v58  ;;  %v7342_v27 = vld [vmem:[#allocation120_spill] sm:$0xff] }
 0x657   : > { %7328 = vst [vmem:[#allocation101_spill] sm:$0xff] %v6648_v32  ;;  %7330 = vst [vmem:[#allocation102_spill] sm:$0xff] %v6652_v11  ;;  %v6664_v0 = vmul.f32 %v7335_v43, %v7335_v43  ;;  %v7338_v32 = vld [vmem:[#allocation117_spill] sm:$0xff]  ;;  %v7340_v11 = vld [vmem:[#allocation118_spill] sm:$0xff]  ;;  %v6680_v36 = vmul.f32 %v7342_v27, %v7342_v27 }
 0x658   : > { %7334 = vst [vmem:[#allocation104_spill] sm:$0xff] %v6660_v62  ;;  %v6672_v48 = vmul.f32 %v7338_v32, %v7338_v32  ;;  %v6676_v8 = vmul.f32 %v7340_v11, %v7340_v11  ;;  %v7343_v62 = vld [vmem:[#allocation121_spill] sm:$0xff]  ;;  %v6692_v32 = vmul.f32 %v6248_v9, %v6248_v9  ;;  %v6712_v9 = vmul.f32 %v6277_v16, %v6277_v16 }
 0x659   : > { %7336 = vst [vmem:[#allocation106_spill] sm:$0xff] %v6664_v0  ;;  %v6684_v43 = vmul.f32 %v7343_v62, %v7343_v62  ;;  %v7344_v0 = vld [vmem:[#allocation122_spill] sm:$0xff]  ;;  %v6704_v62 = vmul.f32 %v6268_v12, %v6268_v12  ;;  %v6724_v12 = vmul.f32 %v6283_v41, %v6283_v41  ;;  %v6732_v16 = vmul.f32 %v6295_v14, %v6295_v14 }
 0x65a   : > { %7339 = vst [vmem:[#allocation107_spill] sm:$0xff] %v6672_v48  ;;  %7341 = vst [vmem:[#allocation108_spill] sm:$0xff] %v6676_v8  ;;  %v6688_v58 = vmul.f32 %v7344_v0, %v7344_v0  ;;  %v7345_v48 = vld [vmem:[#allocation123_spill] sm:$0xff]  ;;  %v7346_v8 = vld [vmem:[#allocation124_spill] sm:$0xff]  ;;  %v6708_v0 = vmul.f32 %v6271_v47, %v6271_v47  ;;  %v6728_v47 = vmul.f32 %v6293_v20, %v6293_v20 }
 0x65b   : > { %v6696_v11 = vmul.f32 %v7345_v48, %v7345_v48  ;;  %v6700_v27 = vmul.f32 %v7346_v8, %v7346_v8  ;;  %7347 = vst [vmem:[#allocation109_spill] sm:$0xff] %v6704_v62  ;;  %7349 = vst [vmem:[#allocation112_spill] sm:$0xff] %v6712_v9  ;;  %v6716_v48 = vmul.f32 %v6279_v2, %v6279_v2  ;;  %v7380_v9 = vld [vmem:[#allocation63_spill] sm:$0xff] }
 0x65c   : > { %7348 = vst [vmem:[#allocation110_spill] sm:$0xff] %v6708_v0  ;;  %v6720_v8 = vmul.f32 %v6281_v61, %v6281_v61  ;;  %7352 = vst [vmem:[#allocation116_spill] sm:$0xff] %v6724_v12  ;;  %v6736_v2 = vmul.f32 %v6297_v24, %v6297_v24  ;;  %v6740_v61 = vmul.f32 %v6302_v18, %v6302_v18  ;;  %v7377_v12 = vld [vmem:[#allocation99_spill] sm:$0xff] }
 0x65d   : > { %7350 = vst [vmem:[#allocation113_spill] sm:$0xff] %v6716_v48  ;;  %7353 = vst [vmem:[#allocation117_spill] sm:$0xff] %v6728_v47  ;;  %v6744_v41 = vmul.f32 %v6304_v52, %v6304_v52  ;;  %v6748_v20 = vmul.f32 %v6306_v31, %v6306_v31  ;;  %v6752_v14 = vmul.f32 %v6317_v30, %v6317_v30  ;;  %v7375_v47 = vld [vmem:[#allocation93_spill] sm:$0xff]  ;;  %v7382_v0 = vld [vmem:[#allocation119_spill] sm:$0xff] }
 0x65e   : > { %7351 = vst [vmem:[#allocation114_spill] sm:$0xff] %v6720_v8  ;;  %7354 = vst [vmem:[#allocation118_spill] sm:$0xff] %v6732_v16  ;;  %v6756_v24 = vmul.f32 %v6319_v15, %v6319_v15  ;;  %v6760_v18 = vmul.f32 %v6321_v21, %v6321_v21  ;;  %v6764_v52 = vmul.f32 %v6328_v3, %v6328_v3  ;;  %v7370_v3 = vld [vmem:[#allocation40_spill] sm:$0xff]  ;;  %v7374_v16 = vld [vmem:[#allocation42_spill] sm:$0xff] }
 0x65f   : > { %7355 = vst [vmem:[#allocation120_spill] sm:$0xff] %v6736_v2  ;;  %7356 = vst [vmem:[#allocation121_spill] sm:$0xff] %v6740_v61  ;;  %v6768_v31 = vmul.f32 %v6330_v29, %v6330_v29  ;;  %v6772_v30 = vmul.f32 %v6332_v44, %v6332_v44  ;;  %v6776_v15 = vmul.f32 %v6338_v19, %v6338_v19  ;;  %v7372_v2 = vld [vmem:[#allocation41_spill] sm:$0xff]  ;;  %v7378_v19 = vld [vmem:[#allocation59_spill] sm:$0xff] }
 0x660   : > { %7357 = vst [vmem:[#allocation122_spill] sm:$0xff] %v6744_v41  ;;  %7358 = vst [vmem:[#allocation123_spill] sm:$0xff] %v6748_v20  ;;  %v7369_v20 = vld [vmem:[#allocation73_spill] sm:$0xff]  ;;  %v1126_v44 = vadd.f32 %v7375_v47, %v7374_v16 }
 0x661   : > { %7359 = vst [vmem:[#allocation124_spill] sm:$0xff] %v6752_v14  ;;  %7360 = vst [vmem:[#allocation130_spill] sm:$0xff] %v6756_v24  ;;  %v7366_v24 = vld [vmem:[#allocation36_spill] sm:$0xff]  ;;  %v7367_v14 = vld [vmem:[#allocation67_spill] sm:$0xff] }
 0x662   : > { %7361 = vst [vmem:[#allocation131_spill] sm:$0xff] %v6760_v18  ;;  %7362 = vst [vmem:[#allocation132_spill] sm:$0xff] %v6764_v52  ;;  %v1042_v21 = vadd.f32 %v7367_v14, %v7366_v24  ;;  %v7368_v18 = vld [vmem:[#allocation37_spill] sm:$0xff]  ;;  %v7381_v14 = vld [vmem:[#allocation115_spill] sm:$0xff] }
 0x663   : > { %7363 = vst [vmem:[#allocation133_spill] sm:$0xff] %v6768_v31  ;;  %7364 = vst [vmem:[#allocation134_spill] sm:$0xff] %v6772_v30  ;;  %v1063_v41 = vadd.f32 %v7369_v20, %v7368_v18  ;;  %v7371_v52 = vld [vmem:[#allocation85_spill] sm:$0xff]  ;;  %v7376_v30 = vld [vmem:[#allocation47_spill] sm:$0xff]  ;;  %v1189_v24 = vadd.f32 %v7381_v14, %v7380_v9 }
 0x664   : > { %7365 = vst [vmem:[#allocation135_spill] sm:$0xff] %v6776_v15  ;;  %v1084_v61 = vadd.f32 %v7371_v52, %v7370_v3  ;;  %v7373_v29 = vld [vmem:[#allocation89_spill] sm:$0xff]  ;;  %v1147_v8 = vadd.f32 %v7377_v12, %v7376_v30  ;;  %v7379_v15 = vld [vmem:[#allocation111_spill] sm:$0xff]  ;;  %v1043_v20 = vadd.f32 %v1042_v21, %v7382_v0  ;;  %v1127_v3 = vadd.f32 %v1126_v44, %v6336_v35  ;;  %v7392_v44 = vld [vmem:[#allocation54_spill] sm:$0xff] }
 0x665   : > { %v1105_v31 = vadd.f32 %v7373_v29, %v7372_v2  ;;  %v1168_v48 = vadd.f32 %v7379_v15, %v7378_v19  ;;  %v7383_v18 = vld [vmem:[#allocation125_spill] sm:$0xff]  ;;  %v1190_v16 = vadd.f32 %v1189_v24, %v6350_v38  ;;  %v7389_v15 = vld [vmem:[#allocation50_spill] sm:$0xff]  ;;  %v7390_v21 = vld [vmem:[#allocation51_spill] sm:$0xff] }
 0x666   : > { %v1064_v62 = vadd.f32 %v1063_v41, %v7383_v18  ;;  %v1085_v52 = vadd.f32 %v1084_v61, %v6310_v10  ;;  %v1148_v47 = vadd.f32 %v1147_v8, %v6342_v33  ;;  %v1044_v30 = vadd.f32 %v1043_v20, %v6354_v45  ;;  %v7386_v8 = vld [vmem:[#allocation45_spill] sm:$0xff]  ;;  %v7387_v61 = vld [vmem:[#allocation46_spill] sm:$0xff]  ;;  %v7391_v29 = vld [vmem:[#allocation52_spill] sm:$0xff] }
 0x667   : > { %v1106_v2 = vadd.f32 %v1105_v31, %v6325_v34  ;;  %v1169_v12 = vadd.f32 %v1168_v48, %v6346_v54  ;;  %v1128_v10 = vadd.f32 %v1127_v3, %v6373_v46  ;;  %v1191_v33 = vadd.f32 %v1190_v16, %v6385_v13  ;;  %v7385_v48 = vld [vmem:[#allocation44_spill] sm:$0xff]  ;;  %v7388_v31 = vld [vmem:[#allocation49_spill] sm:$0xff]  ;;  %v7393_v19 = vld [vmem:[#allocation55_spill] sm:$0xff] }
 0x668   : > { %v1065_v9 = vadd.f32 %v1064_v62, %v6358_v51  ;;  %v1086_v0 = vadd.f32 %v1085_v52, %v6362_v59  ;;  %v1149_v34 = vadd.f32 %v1148_v47, %v6377_v63  ;;  %v1045_v54 = vadd.f32 %v1044_v30, %v6389_v25  ;;  %v7384_v62 = vld [vmem:[#allocation43_spill] sm:$0xff]  ;;  %v7394_v24 = vld [vmem:[#allocation56_spill] sm:$0xff]  ;;  %v7395_v52 = vld [vmem:[#allocation57_spill] sm:$0xff] }
 0x669   : > { %v1107_v41 = vadd.f32 %v1106_v2, %v6369_v17  ;;  %v1170_v35 = vadd.f32 %v1169_v12, %v6381_v6  ;;  %v1129_v59 = vadd.f32 %v1128_v10, %v6410_v28  ;;  %v1192_v63 = vadd.f32 %v1191_v33, %v6422_v22  ;;  %v7396_v3 = vld [vmem:[#allocation58_spill] sm:$0xff]  ;;  %v7397_v16 = vld [vmem:[#allocation60_spill] sm:$0xff]  ;;  %v7398_v30 = vld [vmem:[#allocation61_spill] sm:$0xff] }
 0x66a   : > { %v1066_v38 = vadd.f32 %v1065_v9, %v6398_v39  ;;  %v1087_v45 = vadd.f32 %v1086_v0, %v6402_v37  ;;  %v1150_v17 = vadd.f32 %v1149_v34, %v6414_v7  ;;  %v1046_v6 = vadd.f32 %v1045_v54, %v6428_v55  ;;  %v7400_v34 = vld [vmem:[#allocation64_spill] sm:$0xff]  ;;  %v7401_v33 = vld [vmem:[#allocation65_spill] sm:$0xff] }
 0x66b   : > { %v1108_v51 = vadd.f32 %v1107_v41, %v6406_v23  ;;  %v1171_v46 = vadd.f32 %v1170_v35, %v6418_v53  ;;  %v1130_v37 = vadd.f32 %v1129_v59, %v7385_v48  ;;  %v1193_v7 = vadd.f32 %v1192_v63, %v7388_v31  ;;  %v7399_v41 = vld [vmem:[#allocation62_spill] sm:$0xff]  ;;  %v7404_v59 = vld [vmem:[#allocation69_spill] sm:$0xff]  ;;  %v7406_v63 = vld [vmem:[#allocation71_spill] sm:$0xff] }
 0x66c   : > { %v1067_v13 = vadd.f32 %v1066_v38, %v6432_v26  ;;  %v1088_v25 = vadd.f32 %v1087_v45, %v6436_v4  ;;  %v1151_v23 = vadd.f32 %v1150_v17, %v7386_v8  ;;  %v1047_v53 = vadd.f32 %v1046_v6, %v7389_v15  ;;  %v7402_v38 = vld [vmem:[#allocation66_spill] sm:$0xff]  ;;  %v7403_v45 = vld [vmem:[#allocation68_spill] sm:$0xff]  ;;  %v7410_v8 = vld [vmem:[#allocation77_spill] sm:$0xff] }
 0x66d   : > { %v1109_v39 = vadd.f32 %v1108_v51, %v7384_v62  ;;  %v1172_v28 = vadd.f32 %v1171_v46, %v7387_v61  ;;  %v1131_v4 = vadd.f32 %v1130_v37, %v7392_v44  ;;  %v1194_v18 = vadd.f32 %v1193_v7, %v6488_v56  ;;  %v7405_v46 = vld [vmem:[#allocation70_spill] sm:$0xff]  ;;  %v7408_v62 = vld [vmem:[#allocation75_spill] sm:$0xff]  ;;  %v7412_v31 = vld [vmem:[#allocation80_spill] sm:$0xff] }
 0x66e   : > { %v1068_v22 = vadd.f32 %v1067_v13, %v6464_v1  ;;  %v1089_v55 = vadd.f32 %v1088_v25, %v7390_v21  ;;  %v1152_v14 = vadd.f32 %v1151_v23, %v7393_v19  ;;  %v1048_v2 = vadd.f32 %v1047_v53, %v7395_v52  ;;  %v7407_v13 = vld [vmem:[#allocation72_spill] sm:$0xff]  ;;  %v7411_v61 = vld [vmem:[#allocation78_spill] sm:$0xff]  ;;  %v7413_v15 = vld [vmem:[#allocation81_spill] sm:$0xff] }
 0x66f   : > { %v1110_v26 = vadd.f32 %v1109_v39, %v7391_v29  ;;  %v1173_v20 = vadd.f32 %v1172_v28, %v7394_v24  ;;  %v1132_v9 = vadd.f32 %v1131_v4, %v7398_v30  ;;  %v1195_v35 = vadd.f32 %v1194_v18, %v7400_v34  ;;  %v7409_v39 = vld [vmem:[#allocation76_spill] sm:$0xff]  ;;  %v7415_v29 = vld [vmem:[#allocation83_spill] sm:$0xff]  ;;  %v7423_v30 = vld [vmem:[#allocation94_spill] sm:$0xff] }
 0x670   : > { %v1069_v47 = vadd.f32 %v1068_v22, %v7396_v3  ;;  %v1090_v12 = vadd.f32 %v1089_v55, %v6500_v57  ;;  %v1153_v0 = vadd.f32 %v1152_v14, %v6512_v40  ;;  %v1049_v54 = vadd.f32 %v1048_v2, %v7401_v33  ;;  %v7414_v22 = vld [vmem:[#allocation82_spill] sm:$0xff]  ;;  %v7416_v44 = vld [vmem:[#allocation84_spill] sm:$0xff]  ;;  %v7418_v24 = vld [vmem:[#allocation87_spill] sm:$0xff] }
 0x671   : > { %v1111_v1 = vadd.f32 %v1110_v26, %v7397_v16  ;;  %v1174_v10 = vadd.f32 %v1173_v20, %v7399_v41  ;;  %v1133_v57 = vadd.f32 %v1132_v9, %v7405_v46  ;;  %v1196_v40 = vadd.f32 %v1195_v35, %v7408_v62  ;;  %v7417_v14 = vld [vmem:[#allocation86_spill] sm:$0xff]  ;;  %v7419_v52 = vld [vmem:[#allocation88_spill] sm:$0xff]  ;;  %v7426_v34 = vld [vmem:[#allocation97_spill] sm:$0xff] }
 0x672   : > { %v1070_v56 = vadd.f32 %v1069_v47, %v7402_v38  ;;  %v1091_v51 = vadd.f32 %v1090_v12, %v7403_v45  ;;  %v1154_v6 = vadd.f32 %v1153_v0, %v7406_v63  ;;  %v1050_v48 = vadd.f32 %v1049_v54, %v7409_v39  ;;  %v7420_v3 = vld [vmem:[#allocation90_spill] sm:$0xff]  ;;  %v7421_v12 = vld [vmem:[#allocation91_spill] sm:$0xff]  ;;  %v7428_v38 = vld [vmem:[#allocation101_spill] sm:$0xff] }
 0x673   : > { %v1112_v17 = vadd.f32 %v1111_v1, %v7404_v59  ;;  %v1175_v25 = vadd.f32 %v1174_v10, %v7407_v13  ;;  %v1134_v7 = vadd.f32 %v1133_v57, %v7412_v31  ;;  %v1197_v55 = vadd.f32 %v1196_v40, %v6584_v49  ;;  %v7422_v1 = vld [vmem:[#allocation92_spill] sm:$0xff]  ;;  %v7424_v0 = vld [vmem:[#allocation95_spill] sm:$0xff]  ;;  %v7427_v33 = vld [vmem:[#allocation98_spill] sm:$0xff] }
 0x674   : > { %v1071_v37 = vadd.f32 %v1070_v56, %v6560_v5  ;;  %v1092_v23 = vadd.f32 %v1091_v51, %v7410_v8  ;;  %v1155_v53 = vadd.f32 %v1154_v6, %v7413_v15  ;;  %v1051_v26 = vadd.f32 %v1050_v48, %v7415_v29  ;;  %v7425_v10 = vld [vmem:[#allocation96_spill] sm:$0xff]  ;;  %v7429_v56 = vld [vmem:[#allocation102_spill] sm:$0xff]  ;;  %v7430_v51 = vld [vmem:[#allocation103_spill] sm:$0xff] }
 0x675   : > { %v1113_v28 = vadd.f32 %v1112_v17, %v7411_v61  ;;  %v1176_v21 = vadd.f32 %v1175_v25, %v7414_v22  ;;  %v1135_v20 = vadd.f32 %v1134_v7, %v7418_v24  ;;  %v1198_v47 = vadd.f32 %v1197_v55, %v7420_v3  ;;  %v7431_v17 = vld [vmem:[#allocation104_spill] sm:$0xff]  ;;  %v7432_v57 = vld [vmem:[#allocation106_spill] sm:$0xff]  ;;  %v7433_v13 = vld [vmem:[#allocation107_spill] sm:$0xff] }
 0x676   : > { %v1072_v4 = vadd.f32 %v1071_v37, %v7416_v44  ;;  %v1093_v19 = vadd.f32 %v1092_v23, %v6596_v42  ;;  %v1156_v18 = vadd.f32 %v1155_v53, %v6608_v60  ;;  %v1052_v16 = vadd.f32 %v1051_v26, %v7421_v12  ;;  %v7434_v62 = vld [vmem:[#allocation108_spill] sm:$0xff]  ;;  %v7436_v7 = vld [vmem:[#allocation110_spill] sm:$0xff]  ;;  %v7438_v22 = vld [vmem:[#allocation113_spill] sm:$0xff] }
 0x677   : > { %v1114_v5 = vadd.f32 %v1113_v28, %v7417_v14  ;;  %v1177_v2 = vadd.f32 %v1176_v21, %v7419_v52  ;;  %v1136_v42 = vadd.f32 %v1135_v20, %v7425_v10  ;;  %v1199_v60 = vadd.f32 %v1198_v47, %v7428_v38  ;;  %v7435_v28 = vld [vmem:[#allocation109_spill] sm:$0xff]  ;;  %v7437_v15 = vld [vmem:[#allocation112_spill] sm:$0xff]  ;;  %v7439_v55 = vld [vmem:[#allocation114_spill] sm:$0xff] }
 0x678   : > { %v1073_v49 = vadd.f32 %v1072_v4, %v7422_v1  ;;  %v1094_v9 = vadd.f32 %v1093_v19, %v7423_v30  ;;  %v1157_v35 = vadd.f32 %v1156_v18, %v7426_v34  ;;  %v1053_v45 = vadd.f32 %v1052_v16, %v7429_v56  ;;  %v7440_v29 = vld [vmem:[#allocation116_spill] sm:$0xff]  ;;  %v7441_v26 = vld [vmem:[#allocation117_spill] sm:$0xff]  ;;  %v7442_v44 = vld [vmem:[#allocation118_spill] sm:$0xff] }
 0x679   : > { %v1115_v41 = vadd.f32 %v1114_v5, %v7424_v0  ;;  %v1178_v54 = vadd.f32 %v1177_v2, %v7427_v33  ;;  %v1137_v6 = vadd.f32 %v1136_v42, %v6668_v50  ;;  %v1200_v39 = vadd.f32 %v1199_v60, %v6680_v36  ;;  %v7443_v4 = vld [vmem:[#allocation120_spill] sm:$0xff]  ;;  %v7445_v14 = vld [vmem:[#allocation122_spill] sm:$0xff]  ;;  %v7446_v24 = vld [vmem:[#allocation123_spill] sm:$0xff] }
 0x67a   : > { %v1074_v59 = vadd.f32 %v1073_v49, %v7430_v51  ;;  %v1095_v46 = vadd.f32 %v1094_v9, %v7431_v17  ;;  %v1158_v25 = vadd.f32 %v1157_v35, %v7433_v13  ;;  %v1054_v48 = vadd.f32 %v1053_v45, %v6684_v43  ;;  %v7447_v18 = vld [vmem:[#allocation124_spill] sm:$0xff]  ;;  %v7448_v2 = vld [vmem:[#allocation130_spill] sm:$0xff]  ;;  %v7449_v47 = vld [vmem:[#allocation131_spill] sm:$0xff] }
 0x67b   : > { %v1116_v63 = vadd.f32 %v1115_v41, %v7432_v57  ;;  %v1179_v40 = vadd.f32 %v1178_v54, %v7434_v62  ;;  %v1138_v61 = vadd.f32 %v1137_v6, %v6700_v27  ;;  %v1201_v53 = vadd.f32 %v1200_v39, %v7437_v15  ;;  %v7444_v27 = vld [vmem:[#allocation121_spill] sm:$0xff]  ;;  %v7450_v16 = vld [vmem:[#allocation132_spill] sm:$0xff]  ;;  %v7452_v9 = vld [vmem:[#allocation134_spill] sm:$0xff] }
 0x67c   : > { %v1075_v37 = vadd.f32 %v1074_v59, %v6688_v58  ;;  %v1096_v8 = vadd.f32 %v1095_v46, %v6692_v32  ;;  %v1159_v31 = vadd.f32 %v1158_v25, %v7435_v28  ;;  %v1055_v21 = vadd.f32 %v1054_v48, %v7438_v22  ;;  %v7451_v49 = vld [vmem:[#allocation133_spill] sm:$0xff]  ;;  %v7453_v41 = vld [vmem:[#allocation135_spill] sm:$0xff]  ;;  %v3704_v25 = vpop.permute.xlu0 %3703 }
 0x67d   : > { %v1117_v23 = vadd.f32 %v1116_v63, %v6696_v11  ;;  %v1180_v50 = vadd.f32 %v1179_v40, %v7436_v7  ;;  %v1139_v32 = vadd.f32 %v1138_v61, %v7442_v44  ;;  %v1202_v5 = vadd.f32 %v1201_v53, %v7445_v14  ;;  %v4618_v54 = vld [vmem:[%s5108_s25 + $0x58] sm:$0xff] }
 0x67e   : > { %v1076_v36 = vadd.f32 %v1075_v37, %v7439_v55  ;;  %v1097_v43 = vadd.f32 %v1096_v8, %v7440_v29  ;;  %v1160_v11 = vadd.f32 %v1159_v31, %v7443_v4  ;;  %v1056_v20 = vadd.f32 %v1055_v21, %v7446_v24 }
 0x67f   : > { %v1118_v58 = vadd.f32 %v1117_v23, %v7441_v26  ;;  %v1181_v19 = vadd.f32 %v1180_v50, %v7444_v27  ;;  %v1140_v1 = vadd.f32 %v1139_v32, %v7450_v16  ;;  %v1203_v10 = vadd.f32 %v1202_v5, %v7453_v41  ;;  %v7454_v26 = vld [vmem:[#allocation34_spill] sm:$0xff]  ;;  %v7455_v5 = vld [vmem:[#allocation32_spill] sm:$0xff] }
 0x680   : > { %v1077_v52 = vadd.f32 %v1076_v36, %v7447_v18  ;;  %v1098_v3 = vadd.f32 %v1097_v43, %v7448_v2  ;;  %v1161_v30 = vadd.f32 %v1160_v11, %v7451_v49  ;;  %v1057_v42 = vrot.slane %v1056_v20, 4  ;;  %v3706_v21 = vpop.permute.xlu0 %3705  ;;  %v7458_v41 = vld [vmem:[#allocation28_spill] sm:$0xff] }
 0x681   : > { %v1119_v12 = vadd.f32 %v1118_v58, %v7449_v47  ;;  %v1182_v0 = vadd.f32 %v1181_v19, %v7452_v9  ;;  %v1458_v38 = vmul.f32 1.442695, %v4618_v54  ;;  %v1141_v60 = vrot.slane %v1140_v1, 4  ;;  %v7459_v54 = vld [vmem:[#allocation20_spill] sm:$0xff] }
 0x682   : > { %v1078_v34 = vrot.slane %v1077_v52, 4  ;;  %v1099_v35 = vrot.slane %v1098_v3, 4  ;;  %v1162_v56 = vrot.slane %v1161_v30, 4  ;;  %v1058_v51 = vadd.f32 %v1057_v42, %v1056_v20  ;;  %v3708_v20 = vpop.permute.xlu1 %3707 }
 0x683   : > { %v1120_v33 = vrot.slane %v1119_v12, 4  ;;  %v1183_v45 = vrot.slane %v1182_v0, 4  ;;  %v1142_v57 = vadd.f32 %v1141_v60, %v1140_v1  ;;  %v1204_v13 = vrot.slane %v1203_v10, 4  ;;  %v7456_v1 = vld [vmem:[#allocation31_spill] sm:$0xff] }
 0x684   : > { %v1079_v59 = vadd.f32 %v1078_v34, %v1077_v52  ;;  %v1100_v17 = vadd.f32 %v1099_v35, %v1098_v3  ;;  %v1163_v63 = vadd.f32 %v1162_v56, %v1161_v30  ;;  %v1059_v62 = vrot.slane %v1058_v51, 2  ;;  %v7457_v30 = vld [vmem:[#allocation33_spill] sm:$0xff] }
 0x685   : > { %v1121_v46 = vadd.f32 %v1120_v33, %v1119_v12  ;;  %v1184_v6 = vadd.f32 %v1183_v45, %v1182_v0  ;;  %v1143_v37 = vrot.slane %v1142_v57, 2  ;;  %v1205_v22 = vadd.f32 %v1204_v13, %v1203_v10  ;;  %v4619_v45 = vld [vmem:[%s5102_s19 + $0x60] sm:$0xff] }
 0x686   : > { %v1080_v40 = vrot.slane %v1079_v59, 2  ;;  %v1101_v39 = vrot.slane %v1100_v17, 2  ;;  %v1164_v8 = vrot.slane %v1163_v63, 2  ;;  %v1060_v61 = vadd.f32 %v1059_v62, %v1058_v51 }
 0x687   : > { %v1122_v48 = vrot.slane %v1121_v46, 2  ;;  %v1185_v23 = vrot.slane %v1184_v6, 2  ;;  %v1144_v50 = vadd.f32 %v1143_v37, %v1142_v57  ;;  %4605 = vpow2.f32 %v7454_v26 }
 0x688   : > { %v1081_v28 = vadd.f32 %v1080_v40, %v1079_v59  ;;  %v1102_v31 = vadd.f32 %v1101_v39, %v1100_v17  ;;  %v1165_v15 = vadd.f32 %v1164_v8, %v1163_v63  ;;  %v1061_v55 = vrot.slane %v1060_v61, 1  ;;  %v4620_v63 = vld [vmem:[%s5102_s19 + $0x68] sm:$0xff]  ;;  %v3710_v40 = vpop.permute.xlu1 %3709 }
 0x689   : > { %v1123_v7 = vadd.f32 %v1122_v48, %v1121_v46  ;;  %v1186_v53 = vadd.f32 %v1185_v23, %v1184_v6  ;;  %v1145_v58 = vrot.slane %v1144_v50, 1  ;;  %v4816_v32 = vmov 1966171168  }
 0x68a   : > { %v1082_v36 = vrot.slane %v1081_v28, 1  ;;  %v1103_v29 = vrot.slane %v1102_v31, 1  ;;  %v1166_v44 = vrot.slane %v1165_v15, 1  ;;  %v1223_v4 = vunpack.c.l.s4 %v4816_v32 }
 0x68b   : > { %v1124_v43 = vrot.slane %v1123_v7, 1  ;;  %v1062_v11 = vadd.f32 %v1061_v55, %v1060_v61  ;;  %4607 = vpow2.f32 %v1458_v38  ;;  %v3752_v24 = vsub.f32 %v7455_v5, %v3706_v21  ;;  %v4622_v21 = vld [vmem:[%s5108_s25 + $0x68] sm:$0xff] }
 0x68c   : > { %v1083_v27 = vadd.f32 %v1082_v36, %v1081_v28  ;;  %v1104_v19 = vadd.f32 %v1103_v29, %v1102_v31  ;;  %v1146_v18 = vadd.f32 %v1145_v58, %v1144_v50  ;;  %v1167_v52 = vadd.f32 %v1166_v44, %v1165_v15  ;;  %v3712_v50 = vpop.permute.xlu0 %3711  ;;  %v4623_v36 = vld [vmem:[%s5108_s25 + $0x70] sm:$0xff]  ;;  %v4624_v44 = vld [vmem:[%s5108_s25 + $0x78] sm:$0xff] }
 0x68d   : > { %v1125_v14 = vadd.f32 %v1124_v43, %v1123_v7  ;;  %v1187_v2 = vrot.slane %v1186_v53, 1  ;;  %v1206_v3 = vrot.slane %v1205_v22, 2  ;;  %v1224_v16 = vunpack.c.0.s8 %v1223_v4  ;;  %v7460_v43 = vld [vmem:[#allocation35_spill] sm:$0xff]  ;;  %v7461_v4 = vld [vmem:[#allocation21_spill] sm:$0xff] }
 0x68e   : > { %v1218_v47 = vcombine.low %v1062_v11, %v1083_v27  ;;  %v3751_v49 = vsub.f32 %v7456_v1, %v3704_v25  ;;  %v3753_v9 = vsub.f32 %v7457_v30, %v3708_v20  ;;  %v3769_v42 = vsel %vm3767_vm2, %v3752_v24, 0.0  ;;  %v7462_v11 = vld [vmem:[#allocation24_spill] sm:$0xff]  ;;  %v7464_v24 = vld [vmem:[#allocation22_spill] sm:$0xff]  ;;  %v7465_v20 = vld [vmem:[#allocation25_spill] sm:$0xff] }
 0x68f   : > { %v1219_v12 = vcombine.low %v1104_v19, %v1125_v14  ;;  %v1207_v0 = vadd.f32 %v1206_v3, %v1205_v22  ;;  %v1227_v10 = vsub.s32 %v1224_v16, %v7458_v41  ;;  %v1188_v34 = vadd.f32 %v1187_v2, %v1186_v53  ;;  %v4621_v53 = vld [vmem:[%s5108_s25 + $0x60] sm:$0xff]  ;;  %v7467_v2 = vld [vmem:[#allocation38_spill] sm:$0xff] }
 0x690   : > { %v1220_v33 = vcombine.low %v1146_v18, %v1167_v52  ;;  %v1498_v38 = vsel %vm1484_vm1, %v7459_v54, 0.0  ;;  %v6916_v51 = vmul.f32 %v4619_v45, %v4619_v45  ;;  %v3768_v59 = vsel %vm3767_vm2, %v3751_v49, 0.0  ;;  %v7469_v16 = vld [vmem:[#allocation26_spill] sm:$0xff]  ;;  %v3714_v49 = vpop.permute.xlu1 %3713 }
 0x691   : > { %v1208_v35 = vrot.slane %v1207_v0, 1  ;;  %v1228_v60 = vrot.slane %v1218_v47, %v1227_v10  ;;  %v1235_v56 = vrot.slane %v1219_v12, %v1227_v10  ;;  %v3771_v17 = vsel %vm3767_vm2, %v3753_v9, 0.0  ;;  %v4606_v57 = vpop.eup %4605  ;;  %v7468_v47 = vld [vmem:[#allocation23_spill] sm:$0xff] }
 0x692   : > { %v6921_v6 = vmul.f32 %v4620_v63, %v4620_v63  ;;  %v3770_v13 = vadd.f32 %v3769_v42, %v3768_v59  ;;  %v1285_v25 = vsub.s32 2, %v7458_v41  ;;  %v1289_v62 = vsub.s32 3, %v7458_v41  ;;  %v4626_v59 = vld [vmem:[%s5102_s19 + $0x78] sm:$0xff] }
 0x693   : > { %v1209_v46 = vadd.f32 %v1208_v35, %v1207_v0  ;;  %v1242_v48 = vrot.slane %v1220_v33, %v1227_v10  ;;  %v1250_v37 = vcombine.low %v1228_v60, %v1235_v56  ;;  %v1293_v8 = vsub.s32 4, %v7458_v41  ;;  %v7470_v0 = vld [vmem:[#allocation27_spill] sm:$0xff]  ;;  %v3716_v60 = vpop.permute.xlu0 %3715 }
 0x694   : > { %v3772_v61 = vadd.f32 %v3771_v17, %v3770_v13  ;;  %v1297_v28 = vsub.s32 5, %v7458_v41  ;;  %v1301_v31 = vsub.s32 6, %v7458_v41  ;;  %v1305_v7 = vsub.s32 7, %v7458_v41  ;;  %v7472_v13 = vld [vmem:[#allocation48_spill] sm:$0xff]  ;;  %v7477_v41 = vld [vmem:[#allocation79_spill] sm:$0xff] }
 0x695   : > { %v1221_v39 = vcombine.low %v1188_v34, %v1209_v46  ;;  %v4608_v23 = vpop.eup %4607  ;;  %v1460_v22 = vmul.f32 1.442695, %v4621_v53  ;;  %v1462_v55 = vmul.f32 1.442695, %v4622_v21  ;;  %v1464_v29 = vmul.f32 1.442695, %v4623_v36 }
 0x696   : > { %v3754_v26 = vsub.f32 %v7460_v43, %v3710_v40  ;;  %v1400_v58 = vadd.f32 1.0, %v4621_v53  ;;  %v1466_v32 = vmul.f32 1.442695, %v4624_v44  ;;  %v7463_v27 = vsub.f32 %v7461_v4, %v7462_v11 }
 0x697   : > { %v1249_v15 = vrot.slane %v1221_v39, %v1227_v10  ;;  %v1258_v5 = vrot.slane %v1250_v37, %v1227_v10  ;;  %4609 = vpow2.f32 %v1460_v22  ;;  %v7466_v18 = vsub.f32 %v7464_v24, %v7465_v20  ;;  %v7473_v39 = vld [vmem:[#allocation29_spill] sm:$0xff]  ;;  %v7474_v37 = vld [vmem:[#allocation30_spill] sm:$0xff] }
 0x698   : > { %v1478_v19 = vsub.f32 %v7463_v27, %v4606_v57  ;;  %v3755_v3 = vsub.f32 %v7467_v2, %v3712_v50  ;;  %4611 = vpow2.f32 %v1462_v55  ;;  %v1499_v12 = vadd.f32 %v1498_v38, %v7468_v47  ;;  %v4625_v38 = vld [vmem:[%s5102_s19 + $0x70] sm:$0xff] }
 0x699   : > { %v1251_v14 = vcombine.low %v1242_v48, %v1249_v15  ;;  %v1479_v52 = vsub.f32 %v7466_v18, %v4608_v23  ;;  %v1500_v1 = vsel %vm1484_vm1, %v7469_v16, 0.0  ;;  %v1401_v9 = vadd.f32 1.0, %v4622_v21  ;;  %v7475_v24 = vld [vmem:[#allocation53_spill] sm:$0xff]  ;;  %v3720_v18 = vpop.permute.xlu0 %3719 }
 0x69a   : > { %4613 = vpow2.f32 %v1464_v29  ;;  %v1502_v42 = vsel %vm1484_vm1, %v7470_v0, 0.0  ;;  %v1402_v34 = vadd.f32 1.0, %v4623_v36  ;;  %v1403_v35 = vadd.f32 1.0, %v4624_v44  ;;  %v3718_v44 = vpop.permute.xlu1 %3717 }
 0x69b   : > { %v1265_v30 = vrot.slane %v1251_v14, %v1227_v10  ;;  %4615 = vpow2.f32 %v1466_v32  ;;  %v1501_v33 = vadd.f32 %v1500_v1, %v1499_v12  ;;  %v3773_v54 = vsel %vm3767_vm2, %v3754_v26, 0.0  ;;  %v7471_v10 = vld [vmem:[#allocation39_spill] sm:$0xff] }
 0x69c   : > { %v1418_v45 = vmul.f32 %v4625_v38, %v4625_v38  ;;  %v1419_v17 = vmul.f32 %v4626_v59, %v4626_v59  ;;  %v3775_v46 = vsel %vm3767_vm2, %v3755_v3, 0.0  ;;  %v3756_v57 = vsub.f32 %v7471_v10, %v3714_v49 }
 0x69d   : > { %v1266_v56 = vcombine.low %v1258_v5, %v1265_v30  ;;  %v1503_v63 = vadd.f32 %v1502_v42, %v1501_v33  ;;  %v3757_v40 = vsub.f32 %v7472_v13, %v3716_v60  ;;  %v3774_v15 = vadd.f32 %v3773_v54, %v3772_v61  ;;  %v7476_v42 = vld [vmem:[#allocation74_spill] sm:$0xff] }
 0x69e   : > { %v1432_v22 = vsub.f32 %v1400_v58, %v6916_v51  ;;  %v1433_v21 = vsub.f32 %v1401_v9, %v6921_v6  ;;  %v1434_v36 = vsub.f32 %v1402_v34, %v1418_v45  ;;  %v1435_v29 = vsub.f32 %v1403_v35, %v1419_v17  ;;  %v3722_v60 = vpop.permute.xlu1 %3721 }
 0x69f   : > { %v1278_v48 = vrot.slane %v1266_v56, %v7473_v39  ;;  %v1282_v23 = vrot.slane %v1266_v56, %v7474_v37  ;;  %v1286_v50 = vrot.slane %v1266_v56, %v1285_v25  ;;  %v1290_v53 = vrot.slane %v1266_v56, %v1289_v62  ;;  %v3724_v39 = vpop.permute.xlu0 %3723  ;;  %v7478_v37 = vld [vmem:[#allocation100_spill] sm:$0xff] }
 0x6a0   : > { %v1504_v43 = vsel %vm1484_vm1, %v1478_v19, 0.0  ;;  %v3776_v26 = vadd.f32 %v3775_v46, %v3774_v15  ;;  %v1294_v32 = vrot.slane %v1266_v56, %v1293_v8  ;;  %v3777_v62 = vsel %vm3767_vm2, %v3756_v57, 0.0 }
 0x6a1   : > { %v1316_v55 = vsel %vm1315_vm3, %v1278_v48, 0.0  ;;  %v1317_v4 = vsel %vm1315_vm3, %v1282_v23, 0.0  ;;  %v1319_v11 = vsel %vm1315_vm3, %v1286_v50, 0.0  ;;  %v4610_v25 = vpop.eup %4609  ;;  %v3779_v51 = vsel %vm3767_vm2, %v3757_v40, 0.0 }
 0x6a2   : > { %v1318_v61 = vadd.f32 %v1317_v4, %v1316_v55  ;;  %v1506_v6 = vsel %vm1484_vm1, %v1479_v52, 0.0  ;;  %v4612_v58 = vpop.eup %4611  ;;  %v1298_v27 = vrot.slane %v1266_v56, %v1297_v28  ;;  %v1321_v19 = vsel %vm1315_vm3, %v1290_v53, 0.0  ;;  %v3726_v53 = vpop.permute.xlu1 %3725  ;;  %v7480_v4 = vld [vmem:[#allocation126_spill] sm:$0xff] }
 0x6a3   : > { %v1480_v14 = vsub.f32 %v1432_v22, %v4610_v25  ;;  %v1505_v8 = vadd.f32 %v1504_v43, %v1503_v63  ;;  %v3758_v20 = vsub.f32 %v7475_v24, %v3718_v44  ;;  %v1302_v2 = vrot.slane %v1266_v56, %v1301_v31  ;;  %v3728_v44 = vpop.permute.xlu0 %3727 }
 0x6a4   : > { %v4614_v5 = vpop.eup %4613  ;;  %v1320_v3 = vadd.f32 %v1319_v11, %v1318_v61  ;;  %v1481_v47 = vsub.f32 %v1433_v21, %v4612_v58  ;;  %v1323_v52 = vsel %vm1315_vm3, %v1294_v32, 0.0  ;;  %v3778_v49 = vadd.f32 %v3777_v62, %v3776_v26 }
 0x6a5   : > { %v4616_v12 = vpop.eup %4615  ;;  %v1482_v16 = vsub.f32 %v1434_v36, %v4614_v5  ;;  %v1507_v1 = vadd.f32 %v1506_v6, %v1505_v8  ;;  %v1508_v28 = vsel %vm1484_vm1, %v1480_v14, 0.0  ;;  %v3759_v34 = vsub.f32 %v7476_v42, %v3720_v18  ;;  %v7479_v36 = vld [vmem:[#allocation105_spill] sm:$0xff]  ;;  %v7482_v14 = vld [vmem:[#allocation128_spill] sm:$0xff] }
 0x6a6   : > { %v1322_v30 = vadd.f32 %v1321_v19, %v1320_v3  ;;  %v1483_v9 = vsub.f32 %v1435_v29, %v4616_v12  ;;  %v1510_v0 = vsel %vm1484_vm1, %v1481_v47, 0.0  ;;  %v1306_v35 = vrot.slane %v1266_v56, %v1305_v7  ;;  %v3730_v25 = vpop.permute.xlu1 %3729  ;;  %v7483_v18 = vld [vmem:[#allocation129_spill] sm:$0xff] }
 0x6a7   : > { %v1325_v31 = vsel %vm1315_vm3, %v1298_v27, 0.0  ;;  %v1509_v33 = vadd.f32 %v1508_v28, %v1507_v1  ;;  %v3780_v54 = vadd.f32 %v3779_v51, %v3778_v49  ;;  %v1512_v45 = vsel %vm1484_vm1, %v1482_v16, 0.0  ;;  %v7481_v51 = vld [vmem:[#allocation127_spill] sm:$0xff] }
 0x6a8   : > { %v1324_v38 = vadd.f32 %v1323_v52, %v1322_v30  ;;  %v3781_v59 = vsel %vm3767_vm2, %v3758_v20, 0.0  ;;  %v1327_v17 = vsel %vm1315_vm3, %v1302_v2, 0.0  ;;  %v1514_v57 = vsel %vm1484_vm1, %v1483_v9, 0.0 }
 0x6a9   : > { %v1511_v46 = vadd.f32 %v1510_v0, %v1509_v33  ;;  %v3783_v63 = vsel %vm3767_vm2, %v3759_v34, 0.0  ;;  %v3760_v7 = vsub.f32 %v7477_v41, %v3722_v60  ;;  %v1329_v56 = vsel %vm1315_vm3, %v1306_v35, 0.0  ;;  %v3732_v19 = vpop.permute.xlu0 %3731 }
 0x6aa   : > { %v1326_v10 = vadd.f32 %v1325_v31, %v1324_v38  ;;  %v3782_v40 = vadd.f32 %v3781_v59, %v3780_v54  ;;  %v3761_v23 = vsub.f32 %v7478_v37, %v3724_v39  ;;  %v3762_v29 = vsub.f32 %v7479_v36, %v3726_v53 }
 0x6ab   : > { %v1513_v13 = vadd.f32 %v1512_v45, %v1511_v46  ;;  %v3785_v21 = vsel %vm3767_vm2, %v3760_v7, 0.0  ;;  %v3763_v11 = vsub.f32 %v7480_v4, %v3728_v44  ;;  %v3764_v61 = vsub.f32 %v7481_v51, %v3730_v25 }
 0x6ac   : > { %v1328_v48 = vadd.f32 %v1327_v17, %v1326_v10  ;;  %v3784_v15 = vadd.f32 %v3783_v63, %v3782_v40  ;;  %v3787_v55 = vsel %vm3767_vm2, %v3761_v23, 0.0  ;;  %v3789_v32 = vsel %vm3767_vm2, %v3762_v29, 0.0  ;;  %v3734_v24 = vpop.permute.xlu1 %3733 }
 0x6ad   : > { %v1515_v50 = vadd.f32 %v1514_v57, %v1513_v13  ;;  %v3791_v62 = vsel %vm3767_vm2, %v3763_v11, 0.0  ;;  %v3793_v27 = vsel %vm3767_vm2, %v3764_v61, 0.0  ;;  %v3765_v8 = vsub.f32 %v7482_v14, %v3732_v19 }
 0x6ae   : > { %v1330_v22 = vadd.f32 %v1329_v56, %v1328_v48  ;;  %v3786_v43 = vadd.f32 %v3785_v21, %v3784_v15  ;;  %v3766_v2 = vsub.f32 %v7483_v18, %v3734_v24  ;;  %v7484_v57 = vlaneseq }
 0x6af   : > { %1516 = vadd.xlane.f32.xlu1 %v1515_v50  ;;  %v3795_v20 = vsel %vm3767_vm2, %v3765_v8, 0.0 }
 0x6b0   : > { %1331 = vadd.xlane.f32.xlu0 %v1330_v22  ;;  %v3788_v26 = vadd.f32 %v3787_v55, %v3786_v43  ;;  %v3797_v47 = vsel %vm3767_vm2, %v3766_v2, 0.0  ;;  %v3809_v63 = vand.u32 127, %v7484_v57 }
 0x6b2   : > { %v3790_v6 = vadd.f32 %v3789_v32, %v3788_v26  ;;  %vm3812_vm4 = vcmp.eq.s32.totalorder %v3809_v63, 2  ;;  %vm3811_vm5 = vcmp.eq.s32.totalorder %v3809_v63, 1  ;;  %vm3810_vm6 = vcmp.eq.s32.totalorder %v3809_v63, 0 }
 0x6b4   : > { %v3792_v58 = vadd.f32 %v3791_v62, %v3790_v6 }
 0x6b6   : > { %v3794_v5 = vadd.f32 %v3793_v27, %v3792_v58 }
 0x6b8   : > { %v3796_v3 = vadd.f32 %v3795_v20, %v3794_v5 }
 0x6ba   : > { %v3798_v12 = vadd.f32 %v3797_v47, %v3796_v3 }
 0x6bc   : > { %3799 = vadd.xlane.f32.xlu0 %v3798_v12 }
 0x73c   : > { %v1517_v52 = vpop.xlane.xlu1 %1516 }
 0x73d   : > { %v1332_v16 = vpop.xlane.xlu0 %1331  ;;  %v1518_v1 = vrot.slane %v1517_v52, 4 }
 0x73e   : > { %v1333_v28 = vrot.slane %v1332_v16, 4 }
 0x73f   : > { %v1519_v49 = vadd.f32 %v1518_v1, %v1517_v52 }
 0x740   : > { %v1334_v30 = vadd.f32 %v1333_v28, %v1332_v16 }
 0x741   : > { %v1520_v9 = vrot.slane %v1519_v49, 2 }
 0x742   : > { %v1335_v0 = vrot.slane %v1334_v30, 2 }
 0x743   : > { %v1521_v42 = vadd.f32 %v1520_v9, %v1519_v49 }
 0x744   : > { %v1336_v34 = vadd.f32 %v1335_v0, %v1334_v30 }
 0x745   : > { %v1522_v35 = vrot.slane %v1521_v42, 1 }
 0x746   : > { %v1337_v31 = vrot.slane %v1336_v34, 1 }
 0x747   : > { %v1523_v33 = vadd.f32 %v1522_v35, %v1521_v42 }
 0x748   : > { %v1338_v54 = vadd.f32 %v1337_v31, %v1336_v34 }
 0x749   : > { %v3800_v60 = vpop.xlane.xlu0 %3799 }
 0x74a   : > { %4251 = vpush %v1338_v54  ;;  %v3801_v38 = vrot.slane %v3800_v60, 4 }
 0x74b   : > { %4253 = vpush %v1523_v33 }
 0x74c   : > { %v3802_v45 = vadd.f32 %v3801_v38, %v3800_v60 }
 0x74e   : > { %v3803_v59 = vrot.slane %v3802_v45, 2 }
 0x750   : > { %v3804_v17 = vadd.f32 %v3803_v59, %v3802_v45 }
 0x752   : > { %v3805_v46 = vrot.slane %v3804_v17, 1 }
 0x754   : > { %v3806_v10 = vadd.f32 %v3805_v46, %v3804_v17 }
 0x756   : > { %4255 = vpush %v3806_v10 }
 0x77b   : > { %s4252_s22 = spop %4251 }
 0x77c   : > { %s4254_s23 = spop %4253  ;;  %v3817_v13 = vstv %s4252_s22 }
 0x77d   : > { %s1525_s19 = smul.f32 -0.5, %s4254_s23 }
 0x77f   : > { %v3815_v7 = vstv %s1525_s19 }
 0x787   : > { %s4256_s25 = spop %4255 }
 0x788   : > { %v3813_v41 = vstv %s4256_s25 }
 0x789   : > { %v3814_v56 = vsel %vm3812_vm4, %v3813_v41, 0.0 }
 0x78a   : > { %v3816_v40 = vsel %vm3811_vm5, %v3815_v7, %v3814_v56 }
 0x78b   : > { %v3818_v39 = vsel %vm3810_vm6, %v3817_v13, %v3816_v40 }
 0x78c   : > { %3819 = vst [vmem:[%s500_s11] sm:$0x1] %v3818_v39 }
 0x78d   : > { %4728 = shalt.err (!%p4725_p12)
}
 0x78e   : > { %s4729_s26 = scalar_lea.hbm %s7002_s27, 16  ;;  %s4733_s30 = scalar_lea.hbm %s7486_s24, 32 }
 0x78f   : > { %p4730_p11 = scmp.ne.s32.totalorder %s7002_s27, %s4729_s26  ;;  %p4734_p13 = scmp.lt.u32.totalorder %s7002_s27, %s7486_s24 }
 0x790   : > { %p4735_p0 = scmp.lt.u32.totalorder %s4733_s30, %s4729_s26  ;;  %p4737_p9 = scmp.lt.u32.totalorder %s4729_s26, %s7002_s27 }
 0x791   : > { %p4731_p3 = pnand %p4730_p11, %p4965_p10 }
 0x792   : > { %p4736_p5 = por %p4735_p0, %p4734_p13 }
 0x793   : > { %p4732_p6 = pneg %p4731_p3 }
 0x794   : > { %p4738_p1 = por %p4737_p9, %p4736_p5 }
 0x796   : > { %p4739_p2 = pnand %p4738_p1, %p4732_p6 }
 0x798   : > { %4742 = shalt.err (!%p4739_p2)
}
 0x799   : > { %4265 = dma.vmem_to_hbm [thread:$0]  (%p4965_p10), %s7004_s12, 16, %s7002_s27, %s3821_s28  }
 0x79a PF: > { %s7487_s19 = sld [smem:[#allocation14_spill]]  ;;  %s7488_s25 = sld [smem:[#allocation16_spill]] }
 0x79b   : > { %p7490_p4 = scmp.ge.s32.totalorder %s4805_s18, 2 }
 0x7a0   : > { %s3845_s11 = sand.u32 1, %s7487_s19   ;;  %p7489_p7 = scmp.ne.s32.totalorder %s7488_s25, 0 }
 0x7a1   : > { %s3846_s16 = scalar_lea.sflag [#allocation5], %s3845_s11 }
 0x7a2   : > { %p4279_p8 = pnand %p7490_p4, %p7489_p7 }
 0x7a4   : > { %4780 = dma.done.wait (!%p4279_p8), %s3846_s16, 16  }
 0x7a5   : > { %4782 = vsyncadd (!%p4279_p8), %s3846_s16, 4294967280  ;;  %s29_s18 = sadd.s32 1, %s4805_s18   ;;  %s7491_s15 = sld [smem:[#allocation15_spill]] }
 0x7a6   : > { %p26_p12 = scmp.ge.s32.totalorder %s29_s18, 4   ;;  %s7492_s21 = sld [smem:[#allocation19_spill]] }
 0x7a7   : > { %s7493_s6 = sld [smem:[#allocation17_spill]]  ;;  %s7494_s13 = smov %s4789_s14 }
 0x7a8   : > { %s7497_s16 = smov %s4801_s17  ;;  %28 = sbr.rel (!%p26_p12) target bundleno = 12 (0xc), region = 146 }
 0x7ab   : > { %s7495_s14 = smov %s7491_s15 }
 0x7ac   : > { %s7496_s15 = smov %s7492_s21 }
 0x7ad   : > { %s7498_s17 = smov %s7493_s6 }
 0x7af   :  { %3850 = vsyncpa [#allocation4], 1 }
 0x7b0   :  { %3852 = vsyncpa [#allocation4 + $0x1], 1 }
 0x7b1   :  { %3853 = vsyncpa [#allocation7], 1 }
 0x7b2   :  { %3855 = vsyncpa [#allocation7 + $0x1], 1 }
 0x7b3   :  { %3856 = vsyncpa [#allocation5], 1 }
 0x7b4   :  { %3858 = vsyncpa [#allocation5 + $0x1], 1 }

</bundles_post_ra>
